<compile_context>
chip_gen: v7x
topology: tpu7x:2x2x1
jax: 0.10.0
libtpu: 0.0.40
codegen_flags: <defaults>
</compile_context>

<pallas_src>
import numpy as np
import jax
import jax.numpy as jnp
from jax.experimental import pallas as pl
from jax.experimental.pallas import tpu as pltpu

PARENT_MAPPING = [-1, 0, 0, 0, 0, 1, 5, 2, 7, 3, 9, 4, 11]
NUM_JOINTS = 13
BONE_DIM = 2
FEAT_DIM = 6                          # local_feature_size
HIDDEN = BONE_DIM + FEAT_DIM          # 8  : BoneMLP hidden width
DF_HID = 512
N_MID = 4                             # lin1..lin4 (512->512); lin0 = 78->512, lin5 = 512->1

# Kinematic-tree levels (each level's joints depend only on the previous level;
# the k-th joint of level l has the k-th joint of level l-1 as its parent).
LEVELS = [[0], [1, 2, 3, 4], [5, 7, 9, 11], [6, 8, 10, 12]]

X_PAD = 32        # padded input lanes: level-l bones live at lanes [8l, 8l + 2*len(level))
LVL_HID = 32      # per-level BoneMLP hidden width (4 joints x 8)
LVL_FEAT = 24     # per-level feature width (4 joints x 6; level 0 zero-padded to 24)


def posendf_kernel(x_ref,
                   ea0_ref, eb10_ref, ew20_ref, eb20_ref,
                   eA_ref, eB_ref, eb1_ref, eW2_ref, eb2_ref,
                   wi_ref, bi_ref, wm_ref, bm_ref, wo_ref, bo_ref,
                   out_ref):
    f32 = jnp.float32
    xb = x_ref[...].astype(jnp.bfloat16)                        # (tb, 32)

    # ---- StructureEncoder, batched by kinematic-tree depth (no concats, no slices) ----
    # Level 0 (root joint): ea0 rows 2:32 are zero, so non-root lanes contribute nothing.
    h = jnp.dot(xb, ea0_ref[...], preferred_element_type=f32) + eb10_ref[...]
    h = jnp.maximum(h, 0.0)                                     # (tb, 8)
    f = jnp.dot(h.astype(jnp.bfloat16), ew20_ref[...],
                preferred_element_type=f32) + eb20_ref[...]
    f = jnp.maximum(f, 0.0)                                     # (tb, 24); lanes 6:24 zero
    fb = f.astype(jnp.bfloat16)

    # Split-K accumulation of DFNet's first layer (no z scratch assembly/round trip).
    acc = jnp.dot(fb, wi_ref[0], preferred_element_type=f32)    # (tb, 512), f32

    # Levels 1..3 (4 joints each): h = x @ A_l + parent_feats @ B_l + b  (block-diagonal
    # per level, bone/parent parts of the first BoneMLP linear split), then layer 2.
    for l in range(3):
        h = (jnp.dot(xb, eA_ref[l], preferred_element_type=f32)
             + jnp.dot(fb, eB_ref[l], preferred_element_type=f32)
             + eb1_ref[l])
        h = jnp.maximum(h, 0.0)                                 # (tb, 32)
        f = jnp.dot(h.astype(jnp.bfloat16), eW2_ref[l],
                    preferred_element_type=f32) + eb2_ref[l]
        f = jnp.maximum(f, 0.0)                                 # (tb, 24)
        fb = f.astype(jnp.bfloat16)
        acc = acc + jnp.dot(fb, wi_ref[l + 1], preferred_element_type=f32)

    # ---- DFNet: (78->)512 -> 512 x4 -> 1; bf16 matmul operands, f32 accumulation ----
    h = jnp.maximum(acc + bi_ref[...], 0.0)                     # (tb, 512)
    for l in range(N_MID):
        h = jnp.dot(h.astype(jnp.bfloat16), wm_ref[l],
                    preferred_element_type=f32) + bm_ref[l]
        h = jnp.maximum(h, 0.0)
    # Final 512 -> 1 layer: VPU multiply + lane reduction (skip an N=1 MXU pass),
    # written lane-dense as a (1, tb) row.
    o = jnp.sum(h * wo_ref[...], axis=-1)                       # (tb,)
    o = o[None, :] + bo_ref[...]                                # (1, tb)
    out_ref[...] = jnp.maximum(o, 0.0)


def posendf_forward(x, kp, tile_b=1024):
    B = x.shape[0]
    x_flat = x.astype(jnp.float32).reshape(B, NUM_JOINTS * BONE_DIM)

    # Lane-aligned input layout (B, 32): level-l bones at lanes [8l, ...), zeros elsewhere.
    x_padcol = jnp.concatenate([x_flat, jnp.zeros((B, 1), jnp.float32)], axis=1)
    idx = np.full((X_PAD,), NUM_JOINTS * BONE_DIM, np.int32)    # sentinel -> zero lane
    idx[0], idx[1] = 0, 1
    for l in range(1, 4):
        for k, j in enumerate(LEVELS[l]):
            idx[8 * l + 2 * k] = 2 * j
            idx[8 * l + 2 * k + 1] = 2 * j + 1
    x32 = jnp.take(x_padcol, jnp.asarray(idx), axis=1)          # (B, 32)

    # Batch tile: sublane-aligned; lane-aligned (multiple of 128) when multiple tiles
    # are needed so the lane-dense output blocks stay legal.
    tb = min(tile_b, B)
    tb = max(8, ((tb + 7) // 8) * 8)
    if tb < B:
        tb = ((tb + 127) // 128) * 128
    padded_B = ((B + tb - 1) // tb) * tb
    if padded_B != B:
        x32 = jnp.pad(x32, ((0, padded_B - B), (0, 0)))

    names = ["ea0", "eb10", "ew20", "eb20", "eA", "eB", "eb1", "eW2", "eb2",
             "wi", "bi", "wm", "bm", "wo", "bo"]
    plist = [kp[n] for n in names]

    def full_spec(a):
        nd = a.ndim
        return pl.BlockSpec(a.shape, lambda b, _nd=nd: (0,) * _nd)  # constant -> no re-DMA

    out = pl.pallas_call(
        posendf_kernel,
        grid=(padded_B // tb,),
        in_specs=[pl.BlockSpec((tb, X_PAD), lambda b: (b, 0))]
                 + [full_spec(a) for a in plist],
        out_specs=pl.BlockSpec((1, tb), lambda b: (0, b)),
        out_shape=jax.ShapeDtypeStruct((1, padded_B), jnp.float32),
        compiler_params=pltpu.CompilerParams(
            dimension_semantics=("parallel",),
            vmem_limit_bytes=32 * 1024 * 1024),
    )(x32, *plist)
    return out[0, :B][:, None]


# ---------------- deterministic parameter construction (glue) ----------------

def _linear_params(key, fan_in, fan_out, weight_norm):
    kv, kb, kg = jax.random.split(key, 3)
    bound = 1.0 / np.sqrt(fan_in)
    v = jax.random.uniform(kv, (fan_out, fan_in), jnp.float32, -bound, bound)
    b = jax.random.uniform(kb, (fan_out,), jnp.float32, -bound, bound)
    if weight_norm:
        # torch weight_norm (dim=0): w = g * v / ||v||, norm per output row.
        g = jax.random.uniform(kg, (fan_out,), jnp.float32, 0.5, 1.5)
        w = v * (g / (jnp.linalg.norm(v, axis=1) + 1e-12))[:, None]
    else:
        w = v
    return jnp.asarray(w.T), jnp.asarray(b)          # [in, out], [out]


def init_params(key):
    """Raw (torch-equivalent) effective weights, stored [in, out]."""
    keys = jax.random.split(key, 2 * NUM_JOINTS + 6)
    ki = iter(range(len(keys)))
    enc_w1, enc_b1, enc_w2, enc_b2 = [], [], [], []
    for j in range(NUM_JOINTS):
        in_feat = BONE_DIM if PARENT_MAPPING[j] == -1 else BONE_DIM + FEAT_DIM
        w1, b1 = _linear_params(keys[next(ki)], in_feat, HIDDEN, weight_norm=False)
        w2, b2 = _linear_params(keys[next(ki)], HIDDEN, FEAT_DIM, weight_norm=False)
        enc_w1.append(w1); enc_b1.append(b1)
        enc_w2.append(w2); enc_b2.append(b2)

    dims = [NUM_JOINTS * FEAT_DIM] + [DF_HID] * 5 + [1]
    df_w, df_b = [], []
    for l in range(len(dims) - 1):
        w, b = _linear_params(keys[next(ki)], dims[l], dims[l + 1], weight_norm=True)
        df_w.append(w); df_b.append(b)
    return {"enc_w1": enc_w1, "enc_b1": enc_b1, "enc_w2": enc_w2, "enc_b2": enc_b2,
            "df_w": df_w, "df_b": df_b}


def prepare_kernel_params(raw):
    """Level-batched / split / lane-padded weights for the fused kernel."""
    w1, b1, w2, b2 = raw["enc_w1"], raw["enc_b1"], raw["enc_w2"], raw["enc_b2"]

    # Level 0 (root joint 0): bone weight rows at x lanes 0:2, feature output padded to 24.
    ea0 = np.zeros((X_PAD, HIDDEN), np.float32)
    ea0[0:BONE_DIM, :] = np.asarray(w1[0])
    eb10 = np.asarray(b1[0]).reshape(1, HIDDEN).astype(np.float32)
    ew20 = np.zeros((HIDDEN, LVL_FEAT), np.float32)
    ew20[:, 0:FEAT_DIM] = np.asarray(w2[0])
    eb20 = np.zeros((1, LVL_FEAT), np.float32)
    eb20[0, 0:FEAT_DIM] = np.asarray(b2[0])

    # Levels 1..3: W1 split into bone part (vs full 32-lane x) and parent-feature part
    # (vs the previous level's 24-lane feature vector), block-diagonal per level.
    eA = np.zeros((3, X_PAD, LVL_HID), np.float32)
    eB = np.zeros((3, LVL_FEAT, LVL_HID), np.float32)
    eb1 = np.zeros((3, 1, LVL_HID), np.float32)
    eW2 = np.zeros((3, LVL_HID, LVL_FEAT), np.float32)
    eb2 = np.zeros((3, 1, LVL_FEAT), np.float32)
    for l in range(1, 4):
        for k, j in enumerate(LEVELS[l]):
            w1j = np.asarray(w1[j])                               # [8, 8] = [in, out]
            eA[l - 1, 8 * l + 2 * k: 8 * l + 2 * k + 2, 8 * k: 8 * k + 8] = w1j[0:BONE_DIM]
            poff = 0 if l == 1 else FEAT_DIM * k                  # parent feature lane offset
            eB[l - 1, poff: poff + FEAT_DIM, 8 * k: 8 * k + 8] = w1j[BONE_DIM:]
            eb1[l - 1, 0, 8 * k: 8 * k + 8] = np.asarray(b1[j])
            eW2[l - 1, 8 * k: 8 * k + 8, 6 * k: 6 * k + 6] = np.asarray(w2[j])
            eb2[l - 1, 0, 6 * k: 6 * k + 6] = np.asarray(b2[j])

    # DFNet input layer split into 4 per-level row blocks (split-K accumulation in-kernel).
    w_in = np.asarray(raw["df_w"][0])                             # [78, 512]
    wi = np.zeros((4, LVL_FEAT, DF_HID), np.float32)
    wi[0, 0:FEAT_DIM] = w_in[0:FEAT_DIM]                          # joint 0
    for l in range(1, 4):
        for k, j in enumerate(LEVELS[l]):
            wi[l, 6 * k: 6 * k + 6] = w_in[6 * j: 6 * j + 6]

    wm = np.stack([np.asarray(raw["df_w"][i]) for i in range(1, 5)])             # [4,512,512]
    bm = np.stack([np.asarray(raw["df_b"][i]).reshape(1, DF_HID) for i in range(1, 5)])
    bi = np.asarray(raw["df_b"][0]).reshape(1, DF_HID)
    wo = np.asarray(raw["df_w"][5]).reshape(1, DF_HID)            # [512,1] -> [1,512]
    bo = np.asarray(raw["df_b"][5]).reshape(1, 1)

    bf = jnp.bfloat16
    return {
        # Encoder matmul weights in bf16 (f32 accumulation); biases stay f32.
        "ea0": jnp.asarray(ea0).astype(bf), "eb10": jnp.asarray(eb10),
        "ew20": jnp.asarray(ew20).astype(bf), "eb20": jnp.asarray(eb20),
        "eA": jnp.asarray(eA).astype(bf), "eB": jnp.asarray(eB).astype(bf),
        "eb1": jnp.asarray(eb1), "eW2": jnp.asarray(eW2).astype(bf),
        "eb2": jnp.asarray(eb2),
        # DFNet matmul weights in bf16; biases / final row vector in f32.
        "wi": jnp.asarray(wi).astype(bf), "bi": jnp.asarray(bi),
        "wm": jnp.asarray(wm).astype(bf), "bm": jnp.asarray(bm),
        "wo": jnp.asarray(wo), "bo": jnp.asarray(bo),
    }


def posendf_reference(x, raw):
    """Pure-JAX mirror of the PyTorch forward (same effective weights)."""
    feats = [None] * NUM_JOINTS
    for i in range(NUM_JOINTS):
        p = PARENT_MAPPING[i]
        inp = x[:, i, :] if p == -1 else jnp.concatenate([x[:, i, :], feats[p]], axis=-1)
        h = jax.nn.relu(inp @ raw["enc_w1"][i] + raw["enc_b1"][i])
        feats[i] = jax.nn.relu(h @ raw["enc_w2"][i] + raw["enc_b2"][i])
    h = jnp.concatenate(feats, axis=-1)
    for l in range(6):
        h = h @ raw["df_w"][l] + raw["df_b"][l]
        if l < 5:
            h = jax.nn.relu(h)
    return jax.nn.relu(h)


if __name__ == "__main__":
    key = jax.random.PRNGKey(0)
    kp_key, kx_key = jax.random.split(key)
    raw = init_params(kp_key)
    kparams = prepare_kernel_params(raw)

    B = 2
    x = jax.random.normal(kx_key, (B, NUM_JOINTS, BONE_DIM), dtype=jnp.float32)

    out = posendf_forward(x, kparams)
    out = jax.block_until_ready(out)

    ref = posendf_reference(x.astype(jnp.float32), raw)
    assert out.shape == (B, 1), out.shape
    assert bool(jnp.all(jnp.isfinite(out)))
    # bf16 matmul operands throughout the kernel (MXU-native, f32 accumulation) vs the
    # f32 reference: allow ~2% tolerance.
    assert np.allclose(np.asarray(out), np.asarray(ref), rtol=2e-2, atol=2e-2), (out, ref)
    print("KERNEL_OK")
</pallas_src>

<mosaic_0001>
module attributes {stable_mosaic.version = 11 : i64} {
  func.func @posendf_kernel(%arg0: i32, %arg1: memref<8x32xf32, #tpu.memory_space<vmem>>, %arg2: memref<32x8xbf16, #tpu.memory_space<vmem>>, %arg3: memref<1x8xf32, #tpu.memory_space<vmem>>, %arg4: memref<8x24xbf16, #tpu.memory_space<vmem>>, %arg5: memref<1x24xf32, #tpu.memory_space<vmem>>, %arg6: memref<3x32x32xbf16, #tpu.memory_space<vmem>>, %arg7: memref<3x24x32xbf16, #tpu.memory_space<vmem>>, %arg8: memref<3x1x32xf32, #tpu.memory_space<vmem>>, %arg9: memref<3x32x24xbf16, #tpu.memory_space<vmem>>, %arg10: memref<3x1x24xf32, #tpu.memory_space<vmem>>, %arg11: memref<4x24x512xbf16, #tpu.memory_space<vmem>>, %arg12: memref<1x512xf32, #tpu.memory_space<vmem>>, %arg13: memref<4x512x512xbf16, #tpu.memory_space<vmem>>, %arg14: memref<4x1x512xf32, #tpu.memory_space<vmem>>, %arg15: memref<1x512xf32, #tpu.memory_space<vmem>>, %arg16: memref<1x1xf32, #tpu.memory_space<vmem>>, %arg17: memref<1x8xf32, #tpu.memory_space<vmem>>) attributes {dimension_semantics = [#tpu.dimension_semantics<parallel>], iteration_bounds = array<i64: 1>, scalar_prefetch = 0 : i64, scratch_operands = 0 : i64, tpu.core_type = #tpu.core_type<tc>, window_params = [{transform_indices = @transform_0, window_bounds = array<i64: 8, 32>}, {pipeline_mode = #tpu.pipeline_mode<synchronous>, transform_indices = @transform_1, window_bounds = array<i64: 32, 8>}, {pipeline_mode = #tpu.pipeline_mode<synchronous>, transform_indices = @transform_2, window_bounds = array<i64: 1, 8>}, {pipeline_mode = #tpu.pipeline_mode<synchronous>, transform_indices = @transform_3, window_bounds = array<i64: 8, 24>}, {pipeline_mode = #tpu.pipeline_mode<synchronous>, transform_indices = @transform_4, window_bounds = array<i64: 1, 24>}, {pipeline_mode = #tpu.pipeline_mode<synchronous>, transform_indices = @transform_5, window_bounds = array<i64: 3, 32, 32>}, {pipeline_mode = #tpu.pipeline_mode<synchronous>, transform_indices = @transform_6, window_bounds = array<i64: 3, 24, 32>}, {pipeline_mode = #tpu.pipeline_mode<synchronous>, transform_indices = @transform_7, window_bounds = array<i64: 3, 1, 32>}, {pipeline_mode = #tpu.pipeline_mode<synchronous>, transform_indices = @transform_8, window_bounds = array<i64: 3, 32, 24>}, {pipeline_mode = #tpu.pipeline_mode<synchronous>, transform_indices = @transform_9, window_bounds = array<i64: 3, 1, 24>}, {pipeline_mode = #tpu.pipeline_mode<synchronous>, transform_indices = @transform_10, window_bounds = array<i64: 4, 24, 512>}, {pipeline_mode = #tpu.pipeline_mode<synchronous>, transform_indices = @transform_11, window_bounds = array<i64: 1, 512>}, {pipeline_mode = #tpu.pipeline_mode<synchronous>, transform_indices = @transform_12, window_bounds = array<i64: 4, 512, 512>}, {pipeline_mode = #tpu.pipeline_mode<synchronous>, transform_indices = @transform_13, window_bounds = array<i64: 4, 1, 512>}, {pipeline_mode = #tpu.pipeline_mode<synchronous>, transform_indices = @transform_14, window_bounds = array<i64: 1, 512>}, {pipeline_mode = #tpu.pipeline_mode<synchronous>, transform_indices = @transform_15, window_bounds = array<i64: 1, 1>}, {transform_indices = @transform_16, window_bounds = array<i64: 1, 8>}]} {
    %c0 = arith.constant 0 : index
    %c0_0 = arith.constant 0 : index
    %0 = vector.load %arg1[%c0, %c0_0] : memref<8x32xf32, #tpu.memory_space<vmem>>, vector<8x32xf32>
    %1 = arith.truncf %0 : vector<8x32xf32> to vector<8x32xbf16>
    %c0_1 = arith.constant 0 : index
    %c0_2 = arith.constant 0 : index
    %2 = vector.load %arg2[%c0_1, %c0_2] : memref<32x8xbf16, #tpu.memory_space<vmem>>, vector<32x8xbf16>
    %cst = arith.constant dense<0.000000e+00> : vector<8x8xf32>
    %3 = tpu.matmul %1, %2, %cst {dimension_numbers = #tpu.dot_dimension_numbers<[1], [0], [0], [1], [0, 0, 1, 1], [], []>} : vector<8x32xbf16>, vector<32x8xbf16>, vector<8x8xf32> -> vector<8x8xf32>
    %c0_3 = arith.constant 0 : index
    %c0_4 = arith.constant 0 : index
    %4 = vector.load %arg3[%c0_3, %c0_4] : memref<1x8xf32, #tpu.memory_space<vmem>>, vector<1x8xf32>
    %5 = vector.broadcast %4 : vector<1x8xf32> to vector<8x8xf32>
    %6 = arith.addf %3, %5 : vector<8x8xf32>
    %cst_5 = arith.constant 0.000000e+00 : f32
    %7 = vector.broadcast %cst_5 : f32 to vector<8x8xf32>
    %8 = arith.maximumf %6, %7 : vector<8x8xf32>
    %9 = arith.truncf %8 : vector<8x8xf32> to vector<8x8xbf16>
    %c0_6 = arith.constant 0 : index
    %c0_7 = arith.constant 0 : index
    %10 = vector.load %arg4[%c0_6, %c0_7] : memref<8x24xbf16, #tpu.memory_space<vmem>>, vector<8x24xbf16>
    %cst_8 = arith.constant dense<0.000000e+00> : vector<8x24xf32>
    %11 = tpu.matmul %9, %10, %cst_8 {dimension_numbers = #tpu.dot_dimension_numbers<[1], [0], [0], [1], [0, 0, 1, 1], [], []>} : vector<8x8xbf16>, vector<8x24xbf16>, vector<8x24xf32> -> vector<8x24xf32>
    %c0_9 = arith.constant 0 : index
    %c0_10 = arith.constant 0 : index
    %12 = vector.load %arg5[%c0_9, %c0_10] : memref<1x24xf32, #tpu.memory_space<vmem>>, vector<1x24xf32>
    %13 = vector.broadcast %12 : vector<1x24xf32> to vector<8x24xf32>
    %14 = arith.addf %11, %13 : vector<8x24xf32>
    %cst_11 = arith.constant 0.000000e+00 : f32
    %15 = vector.broadcast %cst_11 : f32 to vector<8x24xf32>
    %16 = arith.maximumf %14, %15 : vector<8x24xf32>
    %17 = arith.truncf %16 : vector<8x24xf32> to vector<8x24xbf16>
    %c0_12 = arith.constant 0 : index
    %c0_13 = arith.constant 0 : index
    %c0_14 = arith.constant 0 : index
    %18 = vector.load %arg11[%c0_12, %c0_13, %c0_14] : memref<4x24x512xbf16, #tpu.memory_space<vmem>>, vector<1x24x512xbf16>
    %19 = vector.shape_cast %18 : vector<1x24x512xbf16> to vector<24x512xbf16>
    %cst_15 = arith.constant dense<0.000000e+00> : vector<8x512xf32>
    %20 = tpu.matmul %17, %19, %cst_15 {dimension_numbers = #tpu.dot_dimension_numbers<[1], [0], [0], [1], [0, 0, 1, 1], [], []>} : vector<8x24xbf16>, vector<24x512xbf16>, vector<8x512xf32> -> vector<8x512xf32>
    %c0_16 = arith.constant 0 : index
    %c0_17 = arith.constant 0 : index
    %c0_18 = arith.constant 0 : index
    %21 = vector.load %arg6[%c0_16, %c0_17, %c0_18] : memref<3x32x32xbf16, #tpu.memory_space<vmem>>, vector<1x32x32xbf16>
    %22 = vector.shape_cast %21 : vector<1x32x32xbf16> to vector<32x32xbf16>
    %cst_19 = arith.constant dense<0.000000e+00> : vector<8x32xf32>
    %23 = tpu.matmul %1, %22, %cst_19 {dimension_numbers = #tpu.dot_dimension_numbers<[1], [0], [0], [1], [0, 0, 1, 1], [], []>} : vector<8x32xbf16>, vector<32x32xbf16>, vector<8x32xf32> -> vector<8x32xf32>
    %c0_20 = arith.constant 0 : index
    %c0_21 = arith.constant 0 : index
    %c0_22 = arith.constant 0 : index
    %24 = vector.load %arg7[%c0_20, %c0_21, %c0_22] : memref<3x24x32xbf16, #tpu.memory_space<vmem>>, vector<1x24x32xbf16>
    %25 = vector.shape_cast %24 : vector<1x24x32xbf16> to vector<24x32xbf16>
    %cst_23 = arith.constant dense<0.000000e+00> : vector<8x32xf32>
    %26 = tpu.matmul %17, %25, %cst_23 {dimension_numbers = #tpu.dot_dimension_numbers<[1], [0], [0], [1], [0, 0, 1, 1], [], []>} : vector<8x24xbf16>, vector<24x32xbf16>, vector<8x32xf32> -> vector<8x32xf32>
    %27 = arith.addf %23, %26 : vector<8x32xf32>
    %c0_24 = arith.constant 0 : index
    %c0_25 = arith.constant 0 : index
    %c0_26 = arith.constant 0 : index
    %28 = vector.load %arg8[%c0_24, %c0_25, %c0_26] : memref<3x1x32xf32, #tpu.memory_space<vmem>>, vector<1x1x32xf32>
    %29 = vector.shape_cast %28 : vector<1x1x32xf32> to vector<1x32xf32>
    %30 = vector.broadcast %29 : vector<1x32xf32> to vector<8x32xf32>
    %31 = arith.addf %27, %30 : vector<8x32xf32>
    %cst_27 = arith.constant 0.000000e+00 : f32
    %32 = vector.broadcast %cst_27 : f32 to vector<8x32xf32>
    %33 = arith.maximumf %31, %32 : vector<8x32xf32>
    %34 = arith.truncf %33 : vector<8x32xf32> to vector<8x32xbf16>
    %c0_28 = arith.constant 0 : index
    %c0_29 = arith.constant 0 : index
    %c0_30 = arith.constant 0 : index
    %35 = vector.load %arg9[%c0_28, %c0_29, %c0_30] : memref<3x32x24xbf16, #tpu.memory_space<vmem>>, vector<1x32x24xbf16>
    %36 = vector.shape_cast %35 : vector<1x32x24xbf16> to vector<32x24xbf16>
    %cst_31 = arith.constant dense<0.000000e+00> : vector<8x24xf32>
    %37 = tpu.matmul %34, %36, %cst_31 {dimension_numbers = #tpu.dot_dimension_numbers<[1], [0], [0], [1], [0, 0, 1, 1], [], []>} : vector<8x32xbf16>, vector<32x24xbf16>, vector<8x24xf32> -> vector<8x24xf32>
    %c0_32 = arith.constant 0 : index
    %c0_33 = arith.constant 0 : index
    %c0_34 = arith.constant 0 : index
    %38 = vector.load %arg10[%c0_32, %c0_33, %c0_34] : memref<3x1x24xf32, #tpu.memory_space<vmem>>, vector<1x1x24xf32>
    %39 = vector.shape_cast %38 : vector<1x1x24xf32> to vector<1x24xf32>
    %40 = vector.broadcast %39 : vector<1x24xf32> to vector<8x24xf32>
    %41 = arith.addf %37, %40 : vector<8x24xf32>
    %cst_35 = arith.constant 0.000000e+00 : f32
    %42 = vector.broadcast %cst_35 : f32 to vector<8x24xf32>
    %43 = arith.maximumf %41, %42 : vector<8x24xf32>
    %44 = arith.truncf %43 : vector<8x24xf32> to vector<8x24xbf16>
    %c1 = arith.constant 1 : index
    %c0_36 = arith.constant 0 : index
    %c0_37 = arith.constant 0 : index
    %45 = vector.load %arg11[%c1, %c0_36, %c0_37] : memref<4x24x512xbf16, #tpu.memory_space<vmem>>, vector<1x24x512xbf16>
    %46 = vector.shape_cast %45 : vector<1x24x512xbf16> to vector<24x512xbf16>
    %cst_38 = arith.constant dense<0.000000e+00> : vector<8x512xf32>
    %47 = tpu.matmul %44, %46, %cst_38 {dimension_numbers = #tpu.dot_dimension_numbers<[1], [0], [0], [1], [0, 0, 1, 1], [], []>} : vector<8x24xbf16>, vector<24x512xbf16>, vector<8x512xf32> -> vector<8x512xf32>
    %48 = arith.addf %20, %47 : vector<8x512xf32>
    %c1_39 = arith.constant 1 : index
    %c0_40 = arith.constant 0 : index
    %c0_41 = arith.constant 0 : index
    %49 = vector.load %arg6[%c1_39, %c0_40, %c0_41] : memref<3x32x32xbf16, #tpu.memory_space<vmem>>, vector<1x32x32xbf16>
    %50 = vector.shape_cast %49 : vector<1x32x32xbf16> to vector<32x32xbf16>
    %cst_42 = arith.constant dense<0.000000e+00> : vector<8x32xf32>
    %51 = tpu.matmul %1, %50, %cst_42 {dimension_numbers = #tpu.dot_dimension_numbers<[1], [0], [0], [1], [0, 0, 1, 1], [], []>} : vector<8x32xbf16>, vector<32x32xbf16>, vector<8x32xf32> -> vector<8x32xf32>
    %c1_43 = arith.constant 1 : index
    %c0_44 = arith.constant 0 : index
    %c0_45 = arith.constant 0 : index
    %52 = vector.load %arg7[%c1_43, %c0_44, %c0_45] : memref<3x24x32xbf16, #tpu.memory_space<vmem>>, vector<1x24x32xbf16>
    %53 = vector.shape_cast %52 : vector<1x24x32xbf16> to vector<24x32xbf16>
    %cst_46 = arith.constant dense<0.000000e+00> : vector<8x32xf32>
    %54 = tpu.matmul %44, %53, %cst_46 {dimension_numbers = #tpu.dot_dimension_numbers<[1], [0], [0], [1], [0, 0, 1, 1], [], []>} : vector<8x24xbf16>, vector<24x32xbf16>, vector<8x32xf32> -> vector<8x32xf32>
    %55 = arith.addf %51, %54 : vector<8x32xf32>
    %c1_47 = arith.constant 1 : index
    %c0_48 = arith.constant 0 : index
    %c0_49 = arith.constant 0 : index
    %56 = vector.load %arg8[%c1_47, %c0_48, %c0_49] : memref<3x1x32xf32, #tpu.memory_space<vmem>>, vector<1x1x32xf32>
    %57 = vector.shape_cast %56 : vector<1x1x32xf32> to vector<1x32xf32>
    %58 = vector.broadcast %57 : vector<1x32xf32> to vector<8x32xf32>
    %59 = arith.addf %55, %58 : vector<8x32xf32>
    %cst_50 = arith.constant 0.000000e+00 : f32
    %60 = vector.broadcast %cst_50 : f32 to vector<8x32xf32>
    %61 = arith.maximumf %59, %60 : vector<8x32xf32>
    %62 = arith.truncf %61 : vector<8x32xf32> to vector<8x32xbf16>
    %c1_51 = arith.constant 1 : index
    %c0_52 = arith.constant 0 : index
    %c0_53 = arith.constant 0 : index
    %63 = vector.load %arg9[%c1_51, %c0_52, %c0_53] : memref<3x32x24xbf16, #tpu.memory_space<vmem>>, vector<1x32x24xbf16>
    %64 = vector.shape_cast %63 : vector<1x32x24xbf16> to vector<32x24xbf16>
    %cst_54 = arith.constant dense<0.000000e+00> : vector<8x24xf32>
    %65 = tpu.matmul %62, %64, %cst_54 {dimension_numbers = #tpu.dot_dimension_numbers<[1], [0], [0], [1], [0, 0, 1, 1], [], []>} : vector<8x32xbf16>, vector<32x24xbf16>, vector<8x24xf32> -> vector<8x24xf32>
    %c1_55 = arith.constant 1 : index
    %c0_56 = arith.constant 0 : index
    %c0_57 = arith.constant 0 : index
    %66 = vector.load %arg10[%c1_55, %c0_56, %c0_57] : memref<3x1x24xf32, #tpu.memory_space<vmem>>, vector<1x1x24xf32>
    %67 = vector.shape_cast %66 : vector<1x1x24xf32> to vector<1x24xf32>
    %68 = vector.broadcast %67 : vector<1x24xf32> to vector<8x24xf32>
    %69 = arith.addf %65, %68 : vector<8x24xf32>
    %cst_58 = arith.constant 0.000000e+00 : f32
    %70 = vector.broadcast %cst_58 : f32 to vector<8x24xf32>
    %71 = arith.maximumf %69, %70 : vector<8x24xf32>
    %72 = arith.truncf %71 : vector<8x24xf32> to vector<8x24xbf16>
    %c2 = arith.constant 2 : index
    %c0_59 = arith.constant 0 : index
    %c0_60 = arith.constant 0 : index
    %73 = vector.load %arg11[%c2, %c0_59, %c0_60] : memref<4x24x512xbf16, #tpu.memory_space<vmem>>, vector<1x24x512xbf16>
    %74 = vector.shape_cast %73 : vector<1x24x512xbf16> to vector<24x512xbf16>
    %cst_61 = arith.constant dense<0.000000e+00> : vector<8x512xf32>
    %75 = tpu.matmul %72, %74, %cst_61 {dimension_numbers = #tpu.dot_dimension_numbers<[1], [0], [0], [1], [0, 0, 1, 1], [], []>} : vector<8x24xbf16>, vector<24x512xbf16>, vector<8x512xf32> -> vector<8x512xf32>
    %76 = arith.addf %48, %75 : vector<8x512xf32>
    %c2_62 = arith.constant 2 : index
    %c0_63 = arith.constant 0 : index
    %c0_64 = arith.constant 0 : index
    %77 = vector.load %arg6[%c2_62, %c0_63, %c0_64] : memref<3x32x32xbf16, #tpu.memory_space<vmem>>, vector<1x32x32xbf16>
    %78 = vector.shape_cast %77 : vector<1x32x32xbf16> to vector<32x32xbf16>
    %cst_65 = arith.constant dense<0.000000e+00> : vector<8x32xf32>
    %79 = tpu.matmul %1, %78, %cst_65 {dimension_numbers = #tpu.dot_dimension_numbers<[1], [0], [0], [1], [0, 0, 1, 1], [], []>} : vector<8x32xbf16>, vector<32x32xbf16>, vector<8x32xf32> -> vector<8x32xf32>
    %c2_66 = arith.constant 2 : index
    %c0_67 = arith.constant 0 : index
    %c0_68 = arith.constant 0 : index
    %80 = vector.load %arg7[%c2_66, %c0_67, %c0_68] : memref<3x24x32xbf16, #tpu.memory_space<vmem>>, vector<1x24x32xbf16>
    %81 = vector.shape_cast %80 : vector<1x24x32xbf16> to vector<24x32xbf16>
    %cst_69 = arith.constant dense<0.000000e+00> : vector<8x32xf32>
    %82 = tpu.matmul %72, %81, %cst_69 {dimension_numbers = #tpu.dot_dimension_numbers<[1], [0], [0], [1], [0, 0, 1, 1], [], []>} : vector<8x24xbf16>, vector<24x32xbf16>, vector<8x32xf32> -> vector<8x32xf32>
    %83 = arith.addf %79, %82 : vector<8x32xf32>
    %c2_70 = arith.constant 2 : index
    %c0_71 = arith.constant 0 : index
    %c0_72 = arith.constant 0 : index
    %84 = vector.load %arg8[%c2_70, %c0_71, %c0_72] : memref<3x1x32xf32, #tpu.memory_space<vmem>>, vector<1x1x32xf32>
    %85 = vector.shape_cast %84 : vector<1x1x32xf32> to vector<1x32xf32>
    %86 = vector.broadcast %85 : vector<1x32xf32> to vector<8x32xf32>
    %87 = arith.addf %83, %86 : vector<8x32xf32>
    %cst_73 = arith.constant 0.000000e+00 : f32
    %88 = vector.broadcast %cst_73 : f32 to vector<8x32xf32>
    %89 = arith.maximumf %87, %88 : vector<8x32xf32>
    %90 = arith.truncf %89 : vector<8x32xf32> to vector<8x32xbf16>
    %c2_74 = arith.constant 2 : index
    %c0_75 = arith.constant 0 : index
    %c0_76 = arith.constant 0 : index
    %91 = vector.load %arg9[%c2_74, %c0_75, %c0_76] : memref<3x32x24xbf16, #tpu.memory_space<vmem>>, vector<1x32x24xbf16>
    %92 = vector.shape_cast %91 : vector<1x32x24xbf16> to vector<32x24xbf16>
    %cst_77 = arith.constant dense<0.000000e+00> : vector<8x24xf32>
    %93 = tpu.matmul %90, %92, %cst_77 {dimension_numbers = #tpu.dot_dimension_numbers<[1], [0], [0], [1], [0, 0, 1, 1], [], []>} : vector<8x32xbf16>, vector<32x24xbf16>, vector<8x24xf32> -> vector<8x24xf32>
    %c2_78 = arith.constant 2 : index
    %c0_79 = arith.constant 0 : index
    %c0_80 = arith.constant 0 : index
    %94 = vector.load %arg10[%c2_78, %c0_79, %c0_80] : memref<3x1x24xf32, #tpu.memory_space<vmem>>, vector<1x1x24xf32>
    %95 = vector.shape_cast %94 : vector<1x1x24xf32> to vector<1x24xf32>
    %96 = vector.broadcast %95 : vector<1x24xf32> to vector<8x24xf32>
    %97 = arith.addf %93, %96 : vector<8x24xf32>
    %cst_81 = arith.constant 0.000000e+00 : f32
    %98 = vector.broadcast %cst_81 : f32 to vector<8x24xf32>
    %99 = arith.maximumf %97, %98 : vector<8x24xf32>
    %100 = arith.truncf %99 : vector<8x24xf32> to vector<8x24xbf16>
    %c3 = arith.constant 3 : index
    %c0_82 = arith.constant 0 : index
    %c0_83 = arith.constant 0 : index
    %101 = vector.load %arg11[%c3, %c0_82, %c0_83] : memref<4x24x512xbf16, #tpu.memory_space<vmem>>, vector<1x24x512xbf16>
    %102 = vector.shape_cast %101 : vector<1x24x512xbf16> to vector<24x512xbf16>
    %cst_84 = arith.constant dense<0.000000e+00> : vector<8x512xf32>
    %103 = tpu.matmul %100, %102, %cst_84 {dimension_numbers = #tpu.dot_dimension_numbers<[1], [0], [0], [1], [0, 0, 1, 1], [], []>} : vector<8x24xbf16>, vector<24x512xbf16>, vector<8x512xf32> -> vector<8x512xf32>
    %104 = arith.addf %76, %103 : vector<8x512xf32>
    %c0_85 = arith.constant 0 : index
    %c0_86 = arith.constant 0 : index
    %105 = vector.load %arg12[%c0_85, %c0_86] : memref<1x512xf32, #tpu.memory_space<vmem>>, vector<1x512xf32>
    %106 = vector.broadcast %105 : vector<1x512xf32> to vector<8x512xf32>
    %107 = arith.addf %104, %106 : vector<8x512xf32>
    %cst_87 = arith.constant 0.000000e+00 : f32
    %108 = vector.broadcast %cst_87 : f32 to vector<8x512xf32>
    %109 = arith.maximumf %107, %108 : vector<8x512xf32>
    %110 = arith.truncf %109 : vector<8x512xf32> to vector<8x512xbf16>
    %c0_88 = arith.constant 0 : index
    %c0_89 = arith.constant 0 : index
    %c0_90 = arith.constant 0 : index
    %111 = vector.load %arg13[%c0_88, %c0_89, %c0_90] : memref<4x512x512xbf16, #tpu.memory_space<vmem>>, vector<1x512x512xbf16>
    %112 = vector.shape_cast %111 : vector<1x512x512xbf16> to vector<512x512xbf16>
    %cst_91 = arith.constant dense<0.000000e+00> : vector<8x512xf32>
    %113 = tpu.matmul %110, %112, %cst_91 {dimension_numbers = #tpu.dot_dimension_numbers<[1], [0], [0], [1], [0, 0, 1, 1], [], []>} : vector<8x512xbf16>, vector<512x512xbf16>, vector<8x512xf32> -> vector<8x512xf32>
    %c0_92 = arith.constant 0 : index
    %c0_93 = arith.constant 0 : index
    %c0_94 = arith.constant 0 : index
    %114 = vector.load %arg14[%c0_92, %c0_93, %c0_94] : memref<4x1x512xf32, #tpu.memory_space<vmem>>, vector<1x1x512xf32>
    %115 = vector.shape_cast %114 : vector<1x1x512xf32> to vector<1x512xf32>
    %116 = vector.broadcast %115 : vector<1x512xf32> to vector<8x512xf32>
    %117 = arith.addf %113, %116 : vector<8x512xf32>
    %cst_95 = arith.constant 0.000000e+00 : f32
    %118 = vector.broadcast %cst_95 : f32 to vector<8x512xf32>
    %119 = arith.maximumf %117, %118 : vector<8x512xf32>
    %120 = arith.truncf %119 : vector<8x512xf32> to vector<8x512xbf16>
    %c1_96 = arith.constant 1 : index
    %c0_97 = arith.constant 0 : index
    %c0_98 = arith.constant 0 : index
    %121 = vector.load %arg13[%c1_96, %c0_97, %c0_98] : memref<4x512x512xbf16, #tpu.memory_space<vmem>>, vector<1x512x512xbf16>
    %122 = vector.shape_cast %121 : vector<1x512x512xbf16> to vector<512x512xbf16>
    %cst_99 = arith.constant dense<0.000000e+00> : vector<8x512xf32>
    %123 = tpu.matmul %120, %122, %cst_99 {dimension_numbers = #tpu.dot_dimension_numbers<[1], [0], [0], [1], [0, 0, 1, 1], [], []>} : vector<8x512xbf16>, vector<512x512xbf16>, vector<8x512xf32> -> vector<8x512xf32>
    %c1_100 = arith.constant 1 : index
    %c0_101 = arith.constant 0 : index
    %c0_102 = arith.constant 0 : index
    %124 = vector.load %arg14[%c1_100, %c0_101, %c0_102] : memref<4x1x512xf32, #tpu.memory_space<vmem>>, vector<1x1x512xf32>
    %125 = vector.shape_cast %124 : vector<1x1x512xf32> to vector<1x512xf32>
    %126 = vector.broadcast %125 : vector<1x512xf32> to vector<8x512xf32>
    %127 = arith.addf %123, %126 : vector<8x512xf32>
    %cst_103 = arith.constant 0.000000e+00 : f32
    %128 = vector.broadcast %cst_103 : f32 to vector<8x512xf32>
    %129 = arith.maximumf %127, %128 : vector<8x512xf32>
    %130 = arith.truncf %129 : vector<8x512xf32> to vector<8x512xbf16>
    %c2_104 = arith.constant 2 : index
    %c0_105 = arith.constant 0 : index
    %c0_106 = arith.constant 0 : index
    %131 = vector.load %arg13[%c2_104, %c0_105, %c0_106] : memref<4x512x512xbf16, #tpu.memory_space<vmem>>, vector<1x512x512xbf16>
    %132 = vector.shape_cast %131 : vector<1x512x512xbf16> to vector<512x512xbf16>
    %cst_107 = arith.constant dense<0.000000e+00> : vector<8x512xf32>
    %133 = tpu.matmul %130, %132, %cst_107 {dimension_numbers = #tpu.dot_dimension_numbers<[1], [0], [0], [1], [0, 0, 1, 1], [], []>} : vector<8x512xbf16>, vector<512x512xbf16>, vector<8x512xf32> -> vector<8x512xf32>
    %c2_108 = arith.constant 2 : index
    %c0_109 = arith.constant 0 : index
    %c0_110 = arith.constant 0 : index
    %134 = vector.load %arg14[%c2_108, %c0_109, %c0_110] : memref<4x1x512xf32, #tpu.memory_space<vmem>>, vector<1x1x512xf32>
    %135 = vector.shape_cast %134 : vector<1x1x512xf32> to vector<1x512xf32>
    %136 = vector.broadcast %135 : vector<1x512xf32> to vector<8x512xf32>
    %137 = arith.addf %133, %136 : vector<8x512xf32>
    %cst_111 = arith.constant 0.000000e+00 : f32
    %138 = vector.broadcast %cst_111 : f32 to vector<8x512xf32>
    %139 = arith.maximumf %137, %138 : vector<8x512xf32>
    %140 = arith.truncf %139 : vector<8x512xf32> to vector<8x512xbf16>
    %c3_112 = arith.constant 3 : index
    %c0_113 = arith.constant 0 : index
    %c0_114 = arith.constant 0 : index
    %141 = vector.load %arg13[%c3_112, %c0_113, %c0_114] : memref<4x512x512xbf16, #tpu.memory_space<vmem>>, vector<1x512x512xbf16>
    %142 = vector.shape_cast %141 : vector<1x512x512xbf16> to vector<512x512xbf16>
    %cst_115 = arith.constant dense<0.000000e+00> : vector<8x512xf32>
    %143 = tpu.matmul %140, %142, %cst_115 {dimension_numbers = #tpu.dot_dimension_numbers<[1], [0], [0], [1], [0, 0, 1, 1], [], []>} : vector<8x512xbf16>, vector<512x512xbf16>, vector<8x512xf32> -> vector<8x512xf32>
    %c3_116 = arith.constant 3 : index
    %c0_117 = arith.constant 0 : index
    %c0_118 = arith.constant 0 : index
    %144 = vector.load %arg14[%c3_116, %c0_117, %c0_118] : memref<4x1x512xf32, #tpu.memory_space<vmem>>, vector<1x1x512xf32>
    %145 = vector.shape_cast %144 : vector<1x1x512xf32> to vector<1x512xf32>
    %146 = vector.broadcast %145 : vector<1x512xf32> to vector<8x512xf32>
    %147 = arith.addf %143, %146 : vector<8x512xf32>
    %cst_119 = arith.constant 0.000000e+00 : f32
    %148 = vector.broadcast %cst_119 : f32 to vector<8x512xf32>
    %149 = arith.maximumf %147, %148 : vector<8x512xf32>
    %c0_120 = arith.constant 0 : index
    %c0_121 = arith.constant 0 : index
    %150 = vector.load %arg15[%c0_120, %c0_121] : memref<1x512xf32, #tpu.memory_space<vmem>>, vector<1x512xf32>
    %151 = vector.broadcast %150 : vector<1x512xf32> to vector<8x512xf32>
    %152 = arith.mulf %149, %151 : vector<8x512xf32>
    %cst_122 = arith.constant dense<0.000000e+00> : vector<8xf32>
    %153 = vector.multi_reduction <add>, %152, %cst_122 [1] : vector<8x512xf32> to vector<8xf32>
    %154 = vector.shape_cast %153 : vector<8xf32> to vector<1x8xf32>
    %c0_123 = arith.constant 0 : index
    %c0_124 = arith.constant 0 : index
    %155 = vector.load %arg16[%c0_123, %c0_124] : memref<1x1xf32, #tpu.memory_space<vmem>>, vector<1x1xf32>
    %156 = vector.broadcast %155 : vector<1x1xf32> to vector<1x8xf32>
    %157 = arith.addf %154, %156 : vector<1x8xf32>
    %cst_125 = arith.constant 0.000000e+00 : f32
    %158 = vector.broadcast %cst_125 : f32 to vector<1x8xf32>
    %159 = arith.maximumf %157, %158 : vector<1x8xf32>
    %c0_126 = arith.constant 0 : index
    %c0_127 = arith.constant 0 : index
    %160 = vector.load %arg17[%c0_126, %c0_127] : memref<1x8xf32, #tpu.memory_space<vmem>>, vector<1x8xf32>
    tpu.vector_store %arg17[%c0_126, %c0_127], %159 {strides = array<i32>} : memref<1x8xf32, #tpu.memory_space<vmem>>, vector<1x8xf32>,
    return
  }
  func.func @transform_0(%arg0: i32) -> (i32, i32) {
    %c0_i32 = arith.constant 0 : i32
    %c0_i32_0 = arith.constant 0 : i32
    return %arg0, %c0_i32 : i32, i32
  }
  func.func @transform_1(%arg0: i32) -> (i32, i32) {
    %c0_i32 = arith.constant 0 : i32
    %c0_i32_0 = arith.constant 0 : i32
    %c0_i32_1 = arith.constant 0 : i32
    return %c0_i32, %c0_i32_0 : i32, i32
  }
  func.func @transform_2(%arg0: i32) -> (i32, i32) {
    %c0_i32 = arith.constant 0 : i32
    %c0_i32_0 = arith.constant 0 : i32
    %c0_i32_1 = arith.constant 0 : i32
    return %c0_i32, %c0_i32_0 : i32, i32
  }
  func.func @transform_3(%arg0: i32) -> (i32, i32) {
    %c0_i32 = arith.constant 0 : i32
    %c0_i32_0 = arith.constant 0 : i32
    %c0_i32_1 = arith.constant 0 : i32
    return %c0_i32, %c0_i32_0 : i32, i32
  }
  func.func @transform_4(%arg0: i32) -> (i32, i32) {
    %c0_i32 = arith.constant 0 : i32
    %c0_i32_0 = arith.constant 0 : i32
    %c0_i32_1 = arith.constant 0 : i32
    return %c0_i32, %c0_i32_0 : i32, i32
  }
  func.func @transform_5(%arg0: i32) -> (i32, i32, i32) {
    %c0_i32 = arith.constant 0 : i32
    %c0_i32_0 = arith.constant 0 : i32
    %c0_i32_1 = arith.constant 0 : i32
    %c0_i32_2 = arith.constant 0 : i32
    return %c0_i32, %c0_i32_0, %c0_i32_1 : i32, i32, i32
  }
  func.func @transform_6(%arg0: i32) -> (i32, i32, i32) {
    %c0_i32 = arith.constant 0 : i32
    %c0_i32_0 = arith.constant 0 : i32
    %c0_i32_1 = arith.constant 0 : i32
    %c0_i32_2 = arith.constant 0 : i32
    return %c0_i32, %c0_i32_0, %c0_i32_1 : i32, i32, i32
  }
  func.func @transform_7(%arg0: i32) -> (i32, i32, i32) {
    %c0_i32 = arith.constant 0 : i32
    %c0_i32_0 = arith.constant 0 : i32
    %c0_i32_1 = arith.constant 0 : i32
    %c0_i32_2 = arith.constant 0 : i32
    return %c0_i32, %c0_i32_0, %c0_i32_1 : i32, i32, i32
  }
  func.func @transform_8(%arg0: i32) -> (i32, i32, i32) {
    %c0_i32 = arith.constant 0 : i32
    %c0_i32_0 = arith.constant 0 : i32
    %c0_i32_1 = arith.constant 0 : i32
    %c0_i32_2 = arith.constant 0 : i32
    return %c0_i32, %c0_i32_0, %c0_i32_1 : i32, i32, i32
  }
  func.func @transform_9(%arg0: i32) -> (i32, i32, i32) {
    %c0_i32 = arith.constant 0 : i32
    %c0_i32_0 = arith.constant 0 : i32
    %c0_i32_1 = arith.constant 0 : i32
    %c0_i32_2 = arith.constant 0 : i32
    return %c0_i32, %c0_i32_0, %c0_i32_1 : i32, i32, i32
  }
  func.func @transform_10(%arg0: i32) -> (i32, i32, i32) {
    %c0_i32 = arith.constant 0 : i32
    %c0_i32_0 = arith.constant 0 : i32
    %c0_i32_1 = arith.constant 0 : i32
    %c0_i32_2 = arith.constant 0 : i32
    return %c0_i32, %c0_i32_0, %c0_i32_1 : i32, i32, i32
  }
  func.func @transform_11(%arg0: i32) -> (i32, i32) {
    %c0_i32 = arith.constant 0 : i32
    %c0_i32_0 = arith.constant 0 : i32
    %c0_i32_1 = arith.constant 0 : i32
    return %c0_i32, %c0_i32_0 : i32, i32
  }
  func.func @transform_12(%arg0: i32) -> (i32, i32, i32) {
    %c0_i32 = arith.constant 0 : i32
    %c0_i32_0 = arith.constant 0 : i32
    %c0_i32_1 = arith.constant 0 : i32
    %c0_i32_2 = arith.constant 0 : i32
    return %c0_i32, %c0_i32_0, %c0_i32_1 : i32, i32, i32
  }
  func.func @transform_13(%arg0: i32) -> (i32, i32, i32) {
    %c0_i32 = arith.constant 0 : i32
    %c0_i32_0 = arith.constant 0 : i32
    %c0_i32_1 = arith.constant 0 : i32
    %c0_i32_2 = arith.constant 0 : i32
    return %c0_i32, %c0_i32_0, %c0_i32_1 : i32, i32, i32
  }
  func.func @transform_14(%arg0: i32) -> (i32, i32) {
    %c0_i32 = arith.constant 0 : i32
    %c0_i32_0 = arith.constant 0 : i32
    %c0_i32_1 = arith.constant 0 : i32
    return %c0_i32, %c0_i32_0 : i32, i32
  }
  func.func @transform_15(%arg0: i32) -> (i32, i32) {
    %c0_i32 = arith.constant 0 : i32
    %c0_i32_0 = arith.constant 0 : i32
    %c0_i32_1 = arith.constant 0 : i32
    return %c0_i32, %c0_i32_0 : i32, i32
  }
  func.func @transform_16(%arg0: i32) -> (i32, i32) {
    %c0_i32 = arith.constant 0 : i32
    %c0_i32_0 = arith.constant 0 : i32
    return %c0_i32, %arg0 : i32, i32
  }
}

</mosaic_0001>

<bundles_post_ra>
// kernel: tpu_custom_call.1
= control target key start
LH: loop header
LB: loop body
LE: loop exit
PB: predicated region body
PF: predicated region fallthrough
CT: control target
= control target key end

     0   :  { %s7893_s0 = inlined_call_operand.hbm [shape: f32[8,32], index: 0, kind: input, shape index: {}]   ;;  %s7894_s1 = inlined_call_operand.vmem [shape: bf16[32,8], index: 1, kind: input, shape index: {}]   ;;  %s7895_s2 = inlined_call_operand.hbm [shape: f32[1,8], index: 2, kind: input, shape index: {}]   ;;  %s7896_s3 = inlined_call_operand.hbm [shape: bf16[8,24], index: 3, kind: input, shape index: {}]   ;;  %s7897_s4 = inlined_call_operand.hbm [shape: f32[1,24], index: 4, kind: input, shape index: {}]   ;;  %s7898_s5 = inlined_call_operand.hbm [shape: bf16[3,32,32], index: 5, kind: input, shape index: {}]   ;;  %s7899_s6 = inlined_call_operand.hbm [shape: bf16[3,24,32], index: 6, kind: input, shape index: {}]   ;;  %s7900_s7 = inlined_call_operand.hbm [shape: f32[3,1,32], index: 7, kind: input, shape index: {}]   ;;  %s7901_s8 = inlined_call_operand.vmem [shape: bf16[3,32,24], index: 8, kind: input, shape index: {}]   ;;  %s7902_s9 = inlined_call_operand.hbm [shape: f32[3,1,24], index: 9, kind: input, shape index: {}]   ;;  %s7903_s10 = inlined_call_operand.hbm [shape: bf16[4,24,512], index: 10, kind: input, shape index: {}]   ;;  %s7904_s11 = inlined_call_operand.hbm [shape: f32[1,512], index: 11, kind: input, shape index: {}]   ;;  %s7905_s12 = inlined_call_operand.hbm [shape: bf16[4,512,512], index: 12, kind: input, shape index: {}]   ;;  %s7906_s13 = inlined_call_operand.hbm [shape: f32[4,1,512], index: 13, kind: input, shape index: {}]   ;;  %s7907_s14 = inlined_call_operand.hbm [shape: f32[1,512], index: 14, kind: input, shape index: {}]   ;;  %s7908_s15 = inlined_call_operand.<no memory space> [shape: f32[1,1], index: 15, kind: input, shape index: {}]   ;;  %s7909_s16 = inlined_call_operand.hbm [shape: f32[1,8], index: 16, kind: output, shape index: {}]  }
   0x1   :  { %7911 = sst [smem:[#allocation33_spill]] %s7893_s0  ;;  %v21_v0 = vstv %s7908_s15 }
   0x2   :  { %22 = vst [vmem:[#allocation2] sm:$0x1] %v21_v0 }
   0x3   :  { %23 = vsyncpa [#allocation4], 0 }
   0x4   :  { %24 = vsyncpa [#allocation7], 0 }
   0x5   :  { %25 = vsyncpa [#allocation10], 0 }
   0x6   :  { %26 = vsyncpa [#allocation13], 0 }
   0x7   :  { %27 = vsyncpa [#allocation16], 0 }
   0x8   :  { %28 = vsyncpa [#allocation19], 0 }
   0x9   :  { %29 = vsyncpa [#allocation22], 0 }
   0xa   :  { %30 = vsyncpa [#allocation5], 0  ;;  %s7377_s23 = smov [#allocation6]   ;;  %s7378_s25 = smov [#allocation9]  }
   0xb   :  { %s49_s24 = sshll.u32 %s7377_s23, 4  ;;  %s69_s26 = sshll.u32 %s7378_s25, 4  ;;  %s50_s24 = int_to_ptr.vmem [resolvable:$true] %s49_s24  ;;  %s70_s26 = int_to_ptr.vmem [resolvable:$true] %s69_s26 }
   0xc   :  { %s7053_s29 = scalar_lea.hbm %s7895_s2, 16 }
   0xd   :  { %p7054_p0 = scmp.ne.s32.totalorder %s7895_s2, %s7053_s29  ;;  %p7057_p1 = scmp.lt.u32.totalorder %s7053_s29, %s7895_s2 }
   0xf   :  { %p7059_p2 = pnand %p7057_p1, %p7054_p0 }
  0x11   :  { %7062 = shalt.err (!%p7059_p2)
}
  0x12   :  { %s7063_s18 = scalar_lea.vmem %s50_s24, 16  ;;  %s7067_s19 = scalar_lea.vmem %s50_s24, 32 }
  0x13   :  { %p7064_p3 = scmp.ne.s32.totalorder %s50_s24, %s7063_s18  ;;  %p7068_p4 = scmp.lt.s32.totalorder %s50_s24, %s50_s24 }
  0x14   :  { %p7069_p5 = scmp.lt.s32.totalorder %s7067_s19, %s7063_s18 }
  0x16   :  { %p7070_p6 = por %p7069_p5, %p7068_p4 }
  0x18   :  { %p7071_p7 = pnand %p7070_p6, %p7064_p3 }
  0x1a   :  { %7074 = shalt.err (!%p7071_p7)
}
  0x1b   :  { %52 = dma.hbm_to_vmem [thread:$0]  %s7895_s2, 16, %s50_s24, [#allocation7]  }
  0x1c   :  { %s7075_s25 = scalar_lea.hbm %s7897_s4, 16 }
  0x1d   :  { %p7076_p8 = scmp.ne.s32.totalorder %s7897_s4, %s7075_s25  ;;  %p7079_p9 = scmp.lt.u32.totalorder %s7075_s25, %s7897_s4 }
  0x1f   :  { %p7081_p10 = pnand %p7079_p9, %p7076_p8 }
  0x21   :  { %7084 = shalt.err (!%p7081_p10)
}
  0x22   :  { %s7085_s30 = scalar_lea.vmem %s70_s26, 16  ;;  %s7089_s0 = scalar_lea.vmem %s70_s26, 32 }
  0x23   :  { %p7086_p11 = scmp.ne.s32.totalorder %s70_s26, %s7085_s30  ;;  %p7090_p12 = scmp.lt.s32.totalorder %s70_s26, %s70_s26 }
  0x24   :  { %p7091_p13 = scmp.lt.s32.totalorder %s7089_s0, %s7085_s30 }
  0x26   :  { %p7092_p0 = por %p7091_p13, %p7090_p12 }
  0x28   :  { %p7093_p1 = pnand %p7092_p0, %p7086_p11 }
  0x2a   :  { %7096 = shalt.err (!%p7093_p1)
}
  0x2b   :  { %72 = dma.hbm_to_vmem [thread:$0]  %s7897_s4, 16, %s70_s26, [#allocation10]  }
  0x2c   :  { %s7379_s17 = smov [#allocation12]   ;;  %s7097_s21 = scalar_lea.hbm %s7899_s6, 576 }
  0x2d   :  { %s90_s18 = sshll.u32 %s7379_s17, 4  ;;  %p7098_p2 = scmp.ne.s32.totalorder %s7899_s6, %s7097_s21  ;;  %s91_s18 = int_to_ptr.vmem [resolvable:$true] %s90_s18 }
  0x2e   :  { %p7101_p3 = scmp.lt.u32.totalorder %s7097_s21, %s7899_s6 }
  0x30   :  { %p7103_p4 = pnand %p7101_p3, %p7098_p2 }
  0x32   :  { %7106 = shalt.err (!%p7103_p4)
}
  0x33   :  { %s7107_s28 = scalar_lea.vmem %s91_s18, 576  ;;  %p7112_p6 = scmp.lt.s32.totalorder %s91_s18, %s91_s18 }
  0x34   :  { %p7108_p5 = scmp.ne.s32.totalorder %s91_s18, %s7107_s28  ;;  %p7113_p7 = scmp.lt.s32.totalorder %s7107_s28, %s7107_s28 }
  0x36   :  { %p7114_p8 = por %p7113_p7, %p7112_p6 }
  0x38   :  { %p7115_p9 = pnand %p7114_p8, %p7108_p5 }
  0x3a   :  { %7118 = shalt.err (!%p7115_p9)
}
  0x3b   :  { %s7380_s4 = smov 64   ;;  %s7381_s26 = smov 4  }
  0x3c   :  { %96 = dma.hbm_to_vmem [thread:$0]  %s7899_s6, 576, %s91_s18, [#allocation13], %s7380_s4, %s7380_s4, %s7381_s26  }
  0x3d   :  { %s7382_s30 = smov [#allocation15]   ;;  %s7383_s2 = smov [#allocation18]  }
  0x3e   :  { %s116_s0 = sshll.u32 %s7382_s30, 4  ;;  %s141_s24 = sshll.u32 %s7383_s2, 4  ;;  %s117_s0 = int_to_ptr.vmem [resolvable:$true] %s116_s0  ;;  %s142_s24 = int_to_ptr.vmem [resolvable:$true] %s141_s24 }
  0x3f   :  { %s7119_s20 = scalar_lea.hbm %s7902_s9, 48 }
  0x40   :  { %p7120_p10 = scmp.ne.s32.totalorder %s7902_s9, %s7119_s20  ;;  %p7123_p11 = scmp.lt.u32.totalorder %s7119_s20, %s7902_s9 }
  0x42   :  { %p7125_p12 = pnand %p7123_p11, %p7120_p10 }
  0x44   :  { %7128 = shalt.err (!%p7125_p12)
}
  0x45   :  { %s7129_s6 = scalar_lea.vmem %s117_s0, 48  ;;  %s7133_s18 = scalar_lea.vmem %s117_s0, 64 }
  0x46   :  { %p7130_p13 = scmp.ne.s32.totalorder %s117_s0, %s7129_s6  ;;  %p7134_p0 = scmp.lt.s32.totalorder %s117_s0, %s117_s0 }
  0x47   :  { %p7135_p1 = scmp.lt.s32.totalorder %s7133_s18, %s7129_s6 }
  0x49   :  { %p7136_p2 = por %p7135_p1, %p7134_p0 }
  0x4b   :  { %p7137_p3 = pnand %p7136_p2, %p7130_p13 }
  0x4d   :  { %7140 = shalt.err (!%p7137_p3)
}
  0x4e   :  { %s7384_s27 = smov 16   ;;  %s7385_s28 = smov 1  }
  0x4f   :  { %122 = dma.hbm_to_vmem [thread:$0]  %s7902_s9, 48, %s117_s0, [#allocation16], %s7384_s27, %s7384_s27, %s7385_s28  }
  0x50   :  { %s7141_s17 = scalar_lea.hbm %s7904_s11, 64 }
  0x51   :  { %p7142_p4 = scmp.ne.s32.totalorder %s7904_s11, %s7141_s17  ;;  %p7145_p5 = scmp.lt.u32.totalorder %s7141_s17, %s7904_s11 }
  0x53   :  { %p7147_p6 = pnand %p7145_p5, %p7142_p4 }
  0x55   :  { %7150 = shalt.err (!%p7147_p6)
}
  0x56   :  { %s7151_s23 = scalar_lea.vmem %s142_s24, 64  ;;  %p7156_p8 = scmp.lt.s32.totalorder %s142_s24, %s142_s24 }
  0x57   :  { %p7152_p7 = scmp.ne.s32.totalorder %s142_s24, %s7151_s23  ;;  %p7157_p9 = scmp.lt.s32.totalorder %s7151_s23, %s7151_s23 }
  0x59   :  { %p7158_p10 = por %p7157_p9, %p7156_p8 }
  0x5b   :  { %p7159_p11 = pnand %p7158_p10, %p7152_p7 }
  0x5d   :  { %7162 = shalt.err (!%p7159_p11)
}
  0x5e   :  { %144 = dma.hbm_to_vmem [thread:$0]  %s7904_s11, 64, %s142_s24, [#allocation19]  }
  0x5f   :  { %s7386_s25 = smov [#allocation21]   ;;  %s7387_s18 = smov [#allocation3]  }
  0x60   :  { %s162_s6 = sshll.u32 %s7386_s25, 4  ;;  %s37_s29 = sshll.u32 %s7387_s18, 4  ;;  %s163_s6 = int_to_ptr.vmem [resolvable:$true] %s162_s6  ;;  %s38_s29 = int_to_ptr.vmem [resolvable:$true] %s37_s29 }
  0x61   :  { %s7163_s2 = scalar_lea.hbm %s7906_s13, 256 }
  0x62   :  { %p7164_p12 = scmp.ne.s32.totalorder %s7906_s13, %s7163_s2  ;;  %p7167_p13 = scmp.lt.u32.totalorder %s7163_s2, %s7906_s13 }
  0x64   :  { %p7169_p0 = pnand %p7167_p13, %p7164_p12 }
  0x66   :  { %7172 = shalt.err (!%p7169_p0)
}
  0x67   :  { %s7173_s11 = scalar_lea.vmem %s163_s6, 256  ;;  %p7178_p2 = scmp.lt.s32.totalorder %s163_s6, %s163_s6 }
  0x68   :  { %p7174_p1 = scmp.ne.s32.totalorder %s163_s6, %s7173_s11  ;;  %p7179_p3 = scmp.lt.s32.totalorder %s7173_s11, %s7173_s11 }
  0x6a   :  { %p7180_p4 = por %p7179_p3, %p7178_p2 }
  0x6c   :  { %p7181_p5 = pnand %p7180_p4, %p7174_p1 }
  0x6e   :  { %7184 = shalt.err (!%p7181_p5)
}
  0x6f   :  { %168 = dma.hbm_to_vmem [thread:$0]  %s7906_s13, 256, %s163_s6, [#allocation22], %s7380_s4, %s7380_s4, %s7381_s26  }
  0x70   :  { %s7912_s0 = sld [smem:[#allocation33_spill]] }
  0x76   :  { %s7185_s25 = scalar_lea.hbm %s7912_s0, 128 }
  0x77   :  { %p7186_p6 = scmp.ne.s32.totalorder %s7912_s0, %s7185_s25  ;;  %p7189_p7 = scmp.lt.u32.totalorder %s7185_s25, %s7912_s0 }
  0x79   :  { %p7191_p8 = pnand %p7189_p7, %p7186_p6 }
  0x7b   :  { %7194 = shalt.err (!%p7191_p8)
}
  0x7c   :  { %s7195_s17 = scalar_lea.vmem %s38_s29, 128  ;;  %p7200_p10 = scmp.lt.s32.totalorder %s38_s29, %s38_s29 }
  0x7d   :  { %p7196_p9 = scmp.ne.s32.totalorder %s38_s29, %s7195_s17  ;;  %p7201_p11 = scmp.lt.s32.totalorder %s7195_s17, %s7195_s17 }
  0x7f   :  { %p7202_p12 = por %p7201_p11, %p7200_p10 }
  0x81   :  { %p7203_p13 = pnand %p7202_p12, %p7196_p9 }
  0x83   :  { %7206 = shalt.err (!%p7203_p13)
}
  0x84   :  { %40 = dma.hbm_to_vmem [thread:$0]  %s7912_s0, 128, %s38_s29, [#allocation4]  }
  0x85   :  { %s7388_s19 = smov [#allocation8]   ;;  %s7389_s21 = smov [#allocation11]  }
  0x86   :  { %s59_s20 = sshll.u32 %s7388_s19, 4  ;;  %s78_s11 = sshll.u32 %s7389_s21, 4  ;;  %s60_s20 = int_to_ptr.vmem [resolvable:$true] %s59_s20  ;;  %s79_s11 = int_to_ptr.vmem [resolvable:$true] %s78_s11 }
  0x87   :  { %s7207_s23 = scalar_lea.hbm %s7896_s3, 64 }
  0x88   :  { %p7208_p0 = scmp.ne.s32.totalorder %s7896_s3, %s7207_s23  ;;  %p7211_p1 = scmp.lt.u32.totalorder %s7207_s23, %s7896_s3 }
  0x8a   :  { %p7213_p2 = pnand %p7211_p1, %p7208_p0 }
  0x8c   :  { %7216 = shalt.err (!%p7213_p2)
}
  0x8d   :  { %s7217_s29 = scalar_lea.vmem %s60_s20, 64  ;;  %p7222_p4 = scmp.lt.s32.totalorder %s60_s20, %s60_s20 }
  0x8e   :  { %p7218_p3 = scmp.ne.s32.totalorder %s60_s20, %s7217_s29  ;;  %p7223_p5 = scmp.lt.s32.totalorder %s7217_s29, %s7217_s29 }
  0x90   :  { %p7224_p6 = por %p7223_p5, %p7222_p4 }
  0x92   :  { %p7225_p7 = pnand %p7224_p6, %p7218_p3 }
  0x94   :  { %7228 = shalt.err (!%p7225_p7)
}
  0x95   :  { %62 = dma.hbm_to_vmem [thread:$0]  %s7896_s3, 64, %s60_s20, [#allocation7]  }
  0x96   :  { %s7229_s13 = scalar_lea.hbm %s7898_s5, 768 }
  0x97   :  { %p7230_p8 = scmp.ne.s32.totalorder %s7898_s5, %s7229_s13  ;;  %p7233_p9 = scmp.lt.u32.totalorder %s7229_s13, %s7898_s5 }
  0x99   :  { %p7235_p10 = pnand %p7233_p9, %p7230_p8 }
  0x9b   :  { %7238 = shalt.err (!%p7235_p10)
}
  0x9c   :  { %s7239_s22 = scalar_lea.vmem %s79_s11, 768  ;;  %p7244_p12 = scmp.lt.s32.totalorder %s79_s11, %s79_s11 }
  0x9d   :  { %p7240_p11 = scmp.ne.s32.totalorder %s79_s11, %s7239_s22  ;;  %p7245_p13 = scmp.lt.s32.totalorder %s7239_s22, %s7239_s22 }
  0x9f   :  { %p7246_p0 = por %p7245_p13, %p7244_p12 }
  0xa1   :  { %p7247_p1 = pnand %p7246_p0, %p7240_p11 }
  0xa3   :  { %7250 = shalt.err (!%p7247_p1)
}
  0xa4   :  { %84 = dma.hbm_to_vmem [thread:$0]  %s7898_s5, 768, %s79_s11, [#allocation10], %s7380_s4, %s7380_s4, %s7381_s26  }
  0xa5   :  { %s7390_s23 = smov [#allocation14]   ;;  %s7391_s25 = smov [#allocation17]  }
  0xa6   :  { %s102_s9 = sshll.u32 %s7390_s23, 4  ;;  %s128_s18 = sshll.u32 %s7391_s25, 4  ;;  %s103_s9 = int_to_ptr.vmem [resolvable:$true] %s102_s9  ;;  %s129_s18 = int_to_ptr.vmem [resolvable:$true] %s128_s18 }
  0xa7   :  { %s7251_s0 = scalar_lea.hbm %s7900_s7, 48 }
  0xa8   :  { %p7252_p2 = scmp.ne.s32.totalorder %s7900_s7, %s7251_s0  ;;  %p7255_p3 = scmp.lt.u32.totalorder %s7251_s0, %s7900_s7 }
  0xaa   :  { %p7257_p4 = pnand %p7255_p3, %p7252_p2 }
  0xac   :  { %7260 = shalt.err (!%p7257_p4)
}
  0xad   :  { %s7261_s5 = scalar_lea.vmem %s103_s9, 48  ;;  %s7265_s4 = scalar_lea.vmem %s103_s9, 64 }
  0xae   :  { %p7262_p5 = scmp.ne.s32.totalorder %s103_s9, %s7261_s5  ;;  %p7266_p6 = scmp.lt.s32.totalorder %s103_s9, %s103_s9 }
  0xaf   :  { %p7267_p7 = scmp.lt.s32.totalorder %s7265_s4, %s7261_s5 }
  0xb1   :  { %p7268_p8 = por %p7267_p7, %p7266_p6 }
  0xb3   :  { %p7269_p9 = pnand %p7268_p8, %p7262_p5 }
  0xb5   :  { %7272 = shalt.err (!%p7269_p9)
}
  0xb6   :  { %108 = dma.hbm_to_vmem [thread:$0]  %s7900_s7, 48, %s103_s9, [#allocation13], %s7384_s27, %s7384_s27, %s7385_s28  }
  0xb7   :  { %s7273_s21 = scalar_lea.hbm %s7903_s10, 3072 }
  0xb8   :  { %p7274_p10 = scmp.ne.s32.totalorder %s7903_s10, %s7273_s21  ;;  %p7277_p11 = scmp.lt.u32.totalorder %s7273_s21, %s7903_s10 }
  0xba   :  { %p7279_p12 = pnand %p7277_p11, %p7274_p10 }
  0xbc   :  { %7282 = shalt.err (!%p7279_p12)
}
  0xbd   :  { %s7283_s23 = scalar_lea.vmem %s129_s18, 3072  ;;  %p7288_p0 = scmp.lt.s32.totalorder %s129_s18, %s129_s18 }
  0xbe   :  { %p7284_p13 = scmp.ne.s32.totalorder %s129_s18, %s7283_s23  ;;  %p7289_p1 = scmp.lt.s32.totalorder %s7283_s23, %s7283_s23 }
  0xc0   :  { %p7290_p2 = por %p7289_p1, %p7288_p0 }
  0xc2   :  { %p7291_p3 = pnand %p7290_p2, %p7284_p13 }
  0xc4   :  { %7294 = shalt.err (!%p7291_p3)
}
  0xc5   :  { %s7392_s7 = smov 256   ;;  %s7393_s25 = smov [#allocation20]  }
  0xc6   :  { %134 = dma.hbm_to_vmem [thread:$0]  %s7903_s10, 3072, %s129_s18, [#allocation16], %s7392_s7, %s7392_s7, %s7384_s27  }
  0xc7   :  { %s150_s15 = sshll.u32 %s7393_s25, 4  ;;  %s7394_s29 = smov [#allocation23]   ;;  %s151_s15 = int_to_ptr.vmem [resolvable:$true] %s150_s15 }
  0xc8   :  { %s175_s0 = sshll.u32 %s7394_s29, 4  ;;  %s7295_s17 = scalar_lea.hbm %s7905_s12, 65536  ;;  %s176_s0 = int_to_ptr.vmem [resolvable:$true] %s175_s0 }
  0xc9   :  { %p7296_p4 = scmp.ne.s32.totalorder %s7905_s12, %s7295_s17  ;;  %p7299_p5 = scmp.lt.u32.totalorder %s7295_s17, %s7905_s12 }
  0xcb   :  { %p7301_p6 = pnand %p7299_p5, %p7296_p4 }
  0xcd   :  { %7304 = shalt.err (!%p7301_p6)
}
  0xce   :  { %s7305_s10 = scalar_lea.vmem %s151_s15, 65536  ;;  %p7310_p8 = scmp.lt.s32.totalorder %s151_s15, %s151_s15 }
  0xcf   :  { %p7306_p7 = scmp.ne.s32.totalorder %s151_s15, %s7305_s10  ;;  %p7311_p9 = scmp.lt.s32.totalorder %s7305_s10, %s7305_s10 }
  0xd1   :  { %p7312_p10 = por %p7311_p9, %p7310_p8 }
  0xd3   :  { %p7313_p11 = pnand %p7312_p10, %p7306_p7 }
  0xd5   :  { %7316 = shalt.err (!%p7313_p11)
}
  0xd6   :  { %156 = dma.hbm_to_vmem [thread:$0]  %s7905_s12, 65536, %s151_s15, [#allocation19], %s7392_s7, %s7392_s7, %s7384_s27  }
  0xd7   :  { %s7317_s21 = scalar_lea.hbm %s7907_s14, 64 }
  0xd8   :  { %p7318_p12 = scmp.ne.s32.totalorder %s7907_s14, %s7317_s21  ;;  %p7321_p13 = scmp.lt.u32.totalorder %s7317_s21, %s7907_s14 }
  0xda   :  { %p7323_p0 = pnand %p7321_p13, %p7318_p12 }
  0xdc   :  { %7326 = shalt.err (!%p7323_p0)
}
  0xdd   :  { %s7327_s23 = scalar_lea.vmem %s176_s0, 64  ;;  %p7332_p2 = scmp.lt.s32.totalorder %s176_s0, %s176_s0 }
  0xde   :  { %p7328_p1 = scmp.ne.s32.totalorder %s176_s0, %s7327_s23  ;;  %p7333_p3 = scmp.lt.s32.totalorder %s7327_s23, %s7327_s23 }
  0xe0   :  { %p7334_p4 = por %p7333_p3, %p7332_p2 }
  0xe2   :  { %p7335_p5 = pnand %p7334_p4, %p7328_p1 }
  0xe4   :  { %7338 = shalt.err (!%p7335_p5)
}
  0xe5   :  { %178 = dma.hbm_to_vmem [thread:$0]  %s7907_s14, 64, %s176_s0, [#allocation22]  }
  0xe6   :  { %7361 = dma.done.wait [#allocation4], 128  }
  0xe7   :  { %7362 = vsyncadd [#allocation4], 4294967168 }
  0xe8   :  { %7363 = dma.done.wait [#allocation7], 80  }
  0xe9   :  { %7364 = vsyncadd [#allocation7], 4294967216 }
  0xea   :  { %7365 = dma.done.wait [#allocation10], 784  }
  0xeb   :  { %7366 = vsyncadd [#allocation10], 4294966512 }
  0xec   :  { %7367 = dma.done.wait [#allocation13], 624  }
  0xed   :  { %7368 = vsyncadd [#allocation13], 4294966672 }
  0xee   :  { %7369 = dma.done.wait [#allocation16], 3120  }
  0xef   :  { %7370 = vsyncadd [#allocation16], 4294964176 }
  0xf0   :  { %7371 = dma.done.wait [#allocation19], 65600  }
  0xf1   :  { %7372 = vsyncadd [#allocation19], 4294901696 }
  0xf2   :  { %7373 = dma.done.wait [#allocation22], 320  }
  0xf3   :  { %7374 = vsyncadd [#allocation22], 4294966976  ;;  %v7395_v1 = vmov 0.0   ;;  %vm7396_vm0 = vmmov 0   ;;  %v6225_v2 = vld [vmem:[%s7894_s1] sm:$0xff]   ;;  %v6226_v3 = vld [vmem:[%s7894_s1 + $0x8] sm:$0xff]  }
  0xf4   :  { %6068 = vmatprep.subr.bf16.mxu0 %v7395_v1  ;;  %6072 = vmatprep.mubr.msk.bf16.mxu0 %vm7396_vm0, %v7395_v1  ;;  %v221_v4 = vld [vmem:[#allocation3] sm:$0xff]  ;;  %vm246_vm1 = vcmask 261120   ;;  %v292_v6 = vld [vmem:[#allocation8] sm:$0xf]  ;;  %vm304_vm2 = vcmask 1043456   ;;  %v6227_v8 = vld [vmem:[#allocation11] sm:$0xff]  }
  0xf5   :  { %6076 = vmatprep.subr.bf16.mxu1 %v7395_v1  ;;  %6078 = vmatprep.mubr.msk.bf16.mxu1 %vm7396_vm0, %v7395_v1  ;;  %v7673_v5 = vpack.c.bf16 %v221_v4, %v221_v4  ;;  %v306_v7 = vsel %vm304_vm2, %v292_v6, 0  ;;  %v5429_v9 = vld [vmem:[#allocation6] ss:$0 sm:$0xff]  ;;  %vm300_vm3 = vcmask 64512   ;;  %v6228_v16 = vld [vmem:[#allocation12] sm:$0xff]   ;;  %v6229_v18 = vld [vmem:[#allocation11 + $0x8] sm:$0xff]  }
  0xf6   :  { %6069 = vmatpush3.bf16.msra.mxu0 %v6225_v2  ;;  %6077 = vmatpush3.bf16.msra.mxu1 %v306_v7  ;;  %v6230_v19 = vld [vmem:[#allocation12 + $0x8] ss:$0 sps:$4 sm:$0xff]   ;;  %v5433_v21 = vld [vmem:[#allocation9] ss:$0 sm:$0xff]  ;;  %vm372_vm4 = vcmask 195584   ;;  %v6231_v33 = vld [vmem:[%s7901_s8] sm:$0xff]  }
  0xf7   :  { %6070 = vmatprep.subr.bf16.mxu0 %v7395_v1  ;;  %6082 = vmatprep.subr.bf16.mxu1 %v7395_v1  ;;  %v377_v20 = vsel %vm304_vm2, %v6230_v19, 0  ;;  %v6232_v34 = vld [vmem:[%s7901_s8 + $0x8] sm:$0xff]   ;;  %v6235_v36 = vld [vmem:[#allocation17 + $0x34] ss:$16 sps:$4 sm:$0xff]   ;;  %v5441_v39 = vld [vmem:[#allocation14] ss:$0 sm:$0xff] }
  0xf8   :  { %v6233_v35 = vld [vmem:[#allocation17 + $0x30] ss:$16 sps:$4 sm:$0xff]   ;;  %v6238_v37 = vld [vmem:[#allocation17 + $0x3c] ss:$16 sps:$4 sm:$0xff]   ;;  %v6236_v46 = vld [vmem:[#allocation17 + $0x38] ss:$16 sps:$4 sm:$0xff]  }
  0xf9   :  { %v554_v48 = vld [vmem:[#allocation17 + $0x50] sm:$0xff]  ;;  %v555_v49 = vld [vmem:[#allocation17 + $0x58] sm:$0xff]  ;;  %v7397_v57 = vmov 0   ;;  %v354_v63 = vld [vmem:[#allocation17 + $0x20] sm:$0xff]  ;;  %vm5406_vm5 = vcmask 57344  }
  0xfa   :  { %6071 = vmatpush3.bf16.msra.mxu0 %v6226_v3  ;;  %v5451_v50 = vcombine.high %v554_v48, %v554_v48  ;;  %v5453_v51 = vcombine.high %v555_v49, %v555_v49  ;;  %v5450_v52 = vcombine.low %v554_v48, %v554_v48  ;;  %v5452_v53 = vcombine.low %v555_v49, %v555_v49  ;;  %v6245_v56 = vld [vmem:[#allocation17 + $0x4] ss:$16 sps:$4 sm:$0xff]   ;;  %v6248_v58 = vld [vmem:[#allocation17 + $0xc] ss:$16 sps:$4 sm:$0xff]   ;;  %v6243_v6 = vld [vmem:[#allocation17] ss:$16 sps:$4 sm:$0xff]  }
  0xfb   :  { %6090 = vmatprep.subr.bf16.mxu0 %v7395_v1  ;;  %6224 = vset.pattern.permute.xlu0 %v7397_v57  ;;  %v5442_v59 = vld [vmem:[#allocation15] ss:$0 sm:$0xff]  ;;  %v355_v2 = vld [vmem:[#allocation17 + $0x28] sm:$0xff] }
  0xfc   :  { %v590_v54 = vsel %vm304_vm2, %v5450_v52, 0  ;;  %v596_v55 = vsel %vm304_vm2, %v5452_v53, 0  ;;  %v6246_v7 = vld [vmem:[#allocation17 + $0x8] ss:$16 sps:$4 sm:$0xff]  }
  0xfd   :  { %6073 = vmatmul.mubr.msk.bf16.vlgmr.msra.gmra.mrb[0].mxu0 %vm246_vm1, %v7673_v5 }
  0xfe   :  { %6094 = vmatprep.mubr.msk.bf16.mxu0 %vm7396_vm0, %v7395_v1  ;;  %6091 = vmatpush3.bf16.msra.mxu0 %v6227_v8  ;;  %v5463_v8 = vcombine.high %v354_v63, %v354_v63 }
  0xff   :  { %6092 = vmatprep.subr.bf16.mxu0 %v7395_v1 }
 0x102   :  { %6093 = vmatpush3.bf16.msra.mxu0 %v6229_v18  ;;  %v6256_v18 = vld [vmem:[#allocation11 + $0x18] sm:$0xff]  }
 0x103   :  { %601 = vmatprep.subr.bf16.mxu0 %v6235_v36 }
 0x105   :  { %6095 = vmatmul.mubr.msk.bf16.vlgmr.msra.gmra.mrb[4].mxu0 %vm246_vm1, %v7673_v5 }
 0x106   :  { %602 = vmatpush1.bf16.msra.mxu0 %v6233_v35  ;;  %633 = vmatprep.mubr.bf16.mxu0 %v7397_v57 }
 0x107   :  { %5454 = vmatprep.subr.msk.bf16.mxu0 %vm304_vm2, %v5451_v50 }
 0x10a   :  { %604 = vmatpush1.bf16.msra.mxu0 %v590_v54 }
 0x10b   :  { %725 = vmatprep.subr.bf16.mxu0 %v6245_v56 }
 0x1d0   :  { %v284_v10 = vpop.f32.mrb[0].mxu0 }
 0x1d1   :  { %v285_v11 = vadd.f32 %v5429_v9, %v284_v10  ;;  %v6074_v12 = vpop.f32.mrb[1].mxu0  ;;  %v5465_v10 = vcombine.high %v355_v2, %v355_v2 }
 0x1d2   :  { %v287_v13 = vpop.f32.mrb[2].mxu0  ;;  %v5464_v12 = vcombine.low %v355_v2, %v355_v2 }
 0x1d3   :  { %v290_v14 = vmax.f32 %v285_v11, 0.0  ;;  %v6075_v15 = vpop.f32.mrb[3].mxu0  ;;  %v5462_v11 = vcombine.low %v354_v63, %v354_v63 }
 0x1d4   :  { %v6253_v15 = vld [vmem:[#allocation12 + $0xc] sm:$0xff]  }
 0x1d5   :  { %v291_v17 = vpack.c.bf16 %v290_v14, %v290_v14  ;;  %v714_v13 = vsel %vm304_vm2, %v5462_v11, 0  ;;  %v720_v14 = vsel %vm304_vm2, %v5464_v12, 0 }
 0x1d7   :  { %6079 = vmatmul.mubr.msk.bf16.vlgmr.msra.gmra.mrb[0].mxu1 %vm300_vm3, %v291_v17  ;;  %v6255_v17 = vld [vmem:[#allocation12 + $0x14] ss:$0 sps:$4 sm:$0xff]  }
 0x1d8   :  { %6083 = vmatpush3.bf16.msra.mxu1 %v6228_v16  ;;  %6086 = vmatprep.mubr.msk.bf16.mxu1 %vm7396_vm0, %v7395_v1  ;;  %v465_v29 = vpop.f32.mrb[4].mxu0  ;;  %v6254_v16 = vld [vmem:[#allocation11 + $0x10] sm:$0xff]   ;;  %v826_v19 = vsel %vm304_vm2, %v6255_v17, 0  ;;  %v6272_v17 = vld [vmem:[#allocation11 + $0x28] sm:$0xff]  }
 0x1d9   :  { %6084 = vmatprep.subr.bf16.mxu1 %v7395_v1  ;;  %v6096_v30 = vpop.f32.mrb[5].mxu0 }
 0x1da   :  { %v468_v31 = vpop.f32.mrb[6].mxu0 }
 0x1db   :  { %v6097_v32 = vpop.f32.mrb[7].mxu0 }
 0x1dc   :  { %6085 = vmatpush3.bf16.msra.mxu1 %v377_v20  ;;  %v6257_v20 = vld [vmem:[%s7901_s8 + $0x10] sm:$0xff]  }
 0x1dd   :  { %6098 = vmatprep.subr.bf16.mxu1 %v7395_v1 }
 0x2aa   :  { %v342_v22 = vpop.f32.mrb[0].mxu1 }
 0x2ab   :  { %v343_v23 = vadd.f32 %v5433_v21, %v342_v22  ;;  %v6080_v24 = vpop.f32.mrb[1].mxu1  ;;  %v6258_v21 = vld [vmem:[%s7901_s8 + $0x18] sm:$0xff]  }
 0x2ac   :  { %v345_v25 = vpop.f32.mrb[2].mxu1  ;;  %v6259_v22 = vld [vmem:[#allocation17 + $0x60] ss:$16 sps:$4 sm:$0xff]   ;;  %v6264_v24 = vld [vmem:[#allocation17 + $0x6c] ss:$16 sps:$4 sm:$0xff]  }
 0x2ad   :  { %v348_v26 = vmax.f32 %v343_v23, 0.0  ;;  %v6081_v27 = vpop.f32.mrb[3].mxu1  ;;  %v6261_v23 = vld [vmem:[#allocation17 + $0x64] ss:$16 sps:$4 sm:$0xff]  }
 0x2af   :  { %v7690_v28 = vpack.c.bf16 %v348_v26, %v348_v26 }
 0x2b1   :  { %6087 = vmatmul.mubr.msk.bf16.vlgmr.msra.gmra.mrb[4].mxu1 %vm372_vm4, %v7690_v28 }
 0x2b2   :  { %6102 = vmatprep.mubr.msk.bf16.mxu1 %vm7396_vm0, %v7395_v1  ;;  %6099 = vmatpush3.bf16.msra.mxu1 %v6231_v33 }
 0x2b3   :  { %6100 = vmatprep.subr.bf16.mxu1 %v7395_v1 }
 0x2b6   :  { %6101 = vmatpush3.bf16.msra.mxu1 %v6232_v34 }
 0x2b7   :  { %642 = vmatprep.subr.bf16.mxu1 %v6238_v37 }
 0x384   :  { %v413_v38 = vpop.f32.mrb[4].mxu1 }
 0x385   :  { %v466_v40 = vadd.f32 %v465_v29, %v413_v38  ;;  %v6088_v41 = vpop.f32.mrb[5].mxu1 }
 0x386   :  { %v416_v42 = vpop.f32.mrb[6].mxu1 }
 0x387   :  { %v478_v43 = vadd.f32 %v5441_v39, %v466_v40  ;;  %v6089_v44 = vpop.f32.mrb[7].mxu1 }
 0x389   :  { %v479_v45 = vmax.f32 %v478_v43, 0.0 }
 0x38b   :  { %v480_v47 = vpack.c.bf16 %v479_v45, %v479_v45 }
 0x38d   :  { %6103 = vmatmul.mubr.msk.bf16.vlgmr.msra.gmra.mrb[8].mxu1 %vm246_vm1, %v480_v47  ;;  %v5476_v47 = vld [vmem:[#allocation14 + $0x1] ss:$0 sm:$0xff] }
 0x38e   :  { %643 = vmatpush1.bf16.msra.mxu1 %v6236_v46  ;;  %674 = vmatprep.mubr.bf16.mxu1 %v7397_v57 }
 0x38f   :  { %5456 = vmatprep.subr.msk.bf16.mxu1 %vm304_vm2, %v5453_v51 }
 0x392   :  { %645 = vmatpush1.bf16.msra.mxu1 %v596_v55 }
 0x393   :  { %766 = vmatprep.subr.bf16.mxu1 %v6248_v58  ;;  %v6262_v58 = vld [vmem:[#allocation17 + $0x68] ss:$16 sps:$4 sm:$0xff]  }
 0x460   :  { %v541_v60 = vpop.f32.mrb[8].mxu1 }
 0x461   :  { %v542_v61 = vadd.f32 %v5442_v59, %v541_v60  ;;  %v6104_v62 = vpop.f32.mrb[9].mxu1  ;;  %v1006_v60 = vld [vmem:[#allocation17 + $0x80] sm:$0xff] }
 0x462   :  { %v544_v0 = vpop.f32.mrb[10].mxu1  ;;  %v5490_v62 = vcombine.high %v1006_v60, %v1006_v60 }
 0x463   :  { %v547_v3 = vmax.f32 %v542_v61, 0.0  ;;  %v6105_v4 = vpop.f32.mrb[11].mxu1  ;;  %v1007_v61 = vld [vmem:[#allocation17 + $0x88] sm:$0xff]  ;;  %v5489_v0 = vcombine.low %v1006_v60, %v1006_v60 }
 0x464   :  { %v5492_v63 = vcombine.high %v1007_v61, %v1007_v61  ;;  %v5491_v2 = vcombine.low %v1007_v61, %v1007_v61 }
 0x465   :  { %v548_v9 = vpack.c.bf16 %v547_v3, %v547_v3  ;;  %v1042_v3 = vsel %vm304_vm2, %v5489_v0, 0 }
 0x466   :  { %v1048_v4 = vsel %vm304_vm2, %v5491_v2, 0  ;;  %v6285_v2 = vld [vmem:[#allocation20] ss:$16 sps:$4 sm:$0xff]  }
 0x467   :  { %5455 = vmatmul.mubr.msk.bf16.vlgmr.msra.gmra.mrb[8].mxu0 %vm372_vm4, %v548_v9  ;;  %5457 = vmatmul.mubr.msk.bf16.vlgmr.msra.gmra.mrb[12].mxu1 %vm372_vm4, %v548_v9 }
 0x468   :  { %726 = vmatpush1.bf16.msra.mxu0 %v6243_v6  ;;  %767 = vmatpush1.bf16.msra.mxu1 %v6246_v7  ;;  %v5481_v6 = vld [vmem:[#allocation15 + $0x1] ss:$0 sm:$0xff] }
 0x469   :  { %5466 = vmatprep.subr.msk.bf16.mxu0 %vm304_vm2, %v5463_v8  ;;  %5468 = vmatprep.subr.msk.bf16.mxu1 %vm304_vm2, %v5465_v10 }
 0x46a   :  { %757 = vmatprep.mubr.bf16.mxu0 %v7397_v57  ;;  %798 = vmatprep.mubr.bf16.mxu1 %v7397_v57 }
 0x46c   :  { %728 = vmatpush1.bf16.msra.mxu0 %v714_v13  ;;  %769 = vmatpush1.bf16.msra.mxu1 %v720_v14  ;;  %v6269_v13 = vld [vmem:[#allocation12 + $0x18] sm:$0xff]   ;;  %v6270_v14 = vld [vmem:[#allocation11 + $0x20] sm:$0xff]  }
 0x46d   :  { %6106 = vmatprep.subr.bf16.mxu0 %v7395_v1  ;;  %6114 = vmatprep.subr.bf16.mxu1 %v7395_v1 }
 0x46f   :  { %5467 = vmatmul.mubr.msk.bf16.vlgmr.msra.gmra.mrb[12].mxu0 %vm372_vm4, %v7690_v28  ;;  %5469 = vmatmul.mubr.msk.bf16.vlgmr.msra.gmra.mrb[16].mxu1 %vm372_vm4, %v7690_v28 }
 0x470   :  { %6107 = vmatpush3.bf16.msra.mxu0 %v6253_v15  ;;  %6115 = vmatpush3.bf16.msra.mxu1 %v6254_v16  ;;  %v6271_v16 = vld [vmem:[#allocation12 + $0x20] ss:$0 sps:$4 sm:$0xff]  }
 0x471   :  { %6108 = vmatprep.subr.bf16.mxu0 %v7395_v1  ;;  %6116 = vmatprep.subr.bf16.mxu1 %v7395_v1 }
 0x472   :  { %6110 = vmatprep.mubr.msk.bf16.mxu0 %vm7396_vm0, %v7395_v1  ;;  %6118 = vmatprep.mubr.msk.bf16.mxu1 %vm7396_vm0, %v7395_v1 }
 0x474   :  { %6109 = vmatpush3.bf16.msra.mxu0 %v826_v19  ;;  %6117 = vmatpush3.bf16.msra.mxu1 %v6256_v18  ;;  %v1158_v18 = vsel %vm304_vm2, %v6271_v16, 0  ;;  %v6273_v19 = vld [vmem:[%s7901_s8 + $0x20] sm:$0xff]  }
 0x475   :  { %6122 = vmatprep.subr.bf16.mxu0 %v7395_v1  ;;  %1053 = vmatprep.subr.bf16.mxu1 %v6261_v23  ;;  %v6303_v16 = vld [vmem:[#allocation20 + $0x60] ss:$16 sps:$4 sm:$0xff]  }
 0x477   :  { %6111 = vmatmul.mubr.msk.bf16.vlgmr.msra.gmra.mrb[16].mxu0 %vm372_vm4, %v548_v9  ;;  %6119 = vmatmul.mubr.msk.bf16.vlgmr.msra.gmra.mrb[20].mxu1 %vm246_vm1, %v7673_v5 }
 0x478   :  { %6126 = vmatprep.mubr.msk.bf16.mxu0 %vm7396_vm0, %v7395_v1  ;;  %1085 = vmatprep.mubr.bf16.mxu1 %v7397_v57 }
 0x479   :  { %6123 = vmatpush3.bf16.msra.mxu0 %v6257_v20  ;;  %1054 = vmatpush1.bf16.msra.mxu1 %v6259_v22  ;;  %v6274_v20 = vld [vmem:[%s7901_s8 + $0x28] sm:$0xff]   ;;  %v6277_v22 = vld [vmem:[#allocation17 + $0x94] ss:$16 sps:$4 sm:$0xff]   ;;  %s7398_s8 = smov [#allocation24]  }
 0x47a   :  { %6124 = vmatprep.subr.bf16.mxu0 %v7395_v1  ;;  %5493 = vmatprep.subr.msk.bf16.mxu1 %vm304_vm2, %v5490_v62  ;;  %s5414_s10 = sshll.u32 %s7398_s8, 4  ;;  %s5415_s10 = int_to_ptr.vmem [resolvable:$true] %s5414_s10 }
 0x47b   :  { %s7339_s18 = scalar_lea.vmem %s5415_s10, 16  ;;  %s7343_s11 = scalar_lea.vmem %s5415_s10, 32 }
 0x47c   :  { %p7340_p6 = scmp.ne.s32.totalorder %s5415_s10, %s7339_s18  ;;  %p7344_p7 = scmp.lt.s32.totalorder %s5415_s10, %s5415_s10 }
 0x47d   :  { %6125 = vmatpush3.bf16.msra.mxu0 %v6258_v21  ;;  %1056 = vmatpush1.bf16.msra.mxu1 %v1042_v3  ;;  %v6275_v21 = vld [vmem:[#allocation17 + $0x90] ss:$16 sps:$4 sm:$0xff]   ;;  %v6288_v3 = vld [vmem:[#allocation20 + $0x8] ss:$16 sps:$4 sm:$0xff]   ;;  %p7345_p8 = scmp.lt.s32.totalorder %s7343_s11, %s7339_s18 }
 0x47e   :  { %1094 = vmatprep.subr.bf16.mxu0 %v6264_v24  ;;  %6130 = vmatprep.subr.bf16.mxu1 %v7395_v1 }
 0x47f   :  { %p7346_p9 = por %p7345_p8, %p7344_p7 }
 0x481   :  { %p7347_p10 = pnand %p7346_p9, %p7340_p6 }
 0x53a   :  { %v635_v25 = vpop.f32.mrb[8].mxu0  ;;  %v676_v26 = vpop.f32.mrb[12].mxu1 }
 0x53b   :  { %v637_v27 = vpop.f32.mrb[9].mxu0  ;;  %v678_v28 = vpop.f32.mrb[13].mxu1 }
 0x53c   :  { %v639_v29 = vpop.f32.mrb[10].mxu0  ;;  %v680_v30 = vpop.f32.mrb[14].mxu1 }
 0x53d   :  { %v640_v31 = vpop.f32.mrb[11].mxu0  ;;  %v681_v32 = vpop.f32.mrb[15].mxu1 }
 0x542   :  { %v759_v33 = vpop.f32.mrb[12].mxu0  ;;  %v800_v34 = vpop.f32.mrb[16].mxu1 }
 0x543   :  { %v7746_v35 = vadd.f32 %v759_v33, %v635_v25  ;;  %v7748_v36 = vadd.f32 %v800_v34, %v676_v26  ;;  %v761_v37 = vpop.f32.mrb[13].mxu0  ;;  %v802_v38 = vpop.f32.mrb[17].mxu1 }
 0x544   :  { %v7750_v39 = vadd.f32 %v761_v37, %v637_v27  ;;  %v7752_v40 = vadd.f32 %v802_v38, %v678_v28  ;;  %v763_v41 = vpop.f32.mrb[14].mxu0  ;;  %v804_v42 = vpop.f32.mrb[18].mxu1  ;;  %v5503_v38 = vld [vmem:[#allocation14 + $0x2] ss:$0 sm:$0xff] }
 0x545   :  { %v764_v43 = vpop.f32.mrb[15].mxu0  ;;  %v805_v44 = vpop.f32.mrb[19].mxu1 }
 0x54a   :  { %v862_v45 = vpop.f32.mrb[16].mxu0  ;;  %v914_v46 = vpop.f32.mrb[20].mxu1 }
 0x54b   :  { %v915_v48 = vadd.f32 %v914_v46, %v862_v45  ;;  %v6112_v49 = vpop.f32.mrb[17].mxu0  ;;  %v6120_v50 = vpop.f32.mrb[21].mxu1 }
 0x54c   :  { %v865_v51 = vpop.f32.mrb[18].mxu0  ;;  %v917_v52 = vpop.f32.mrb[22].mxu1  ;;  %v1339_v49 = vld [vmem:[#allocation17 + $0xb8] sm:$0xff] }
 0x54d   :  { %v928_v53 = vadd.f32 %v5476_v47, %v915_v48  ;;  %v6113_v54 = vpop.f32.mrb[19].mxu0  ;;  %v6121_v55 = vpop.f32.mrb[23].mxu1  ;;  %v6278_v47 = vld [vmem:[#allocation17 + $0x98] ss:$16 sps:$4 sm:$0xff]   ;;  %v5519_v52 = vcombine.high %v1339_v49, %v1339_v49 }
 0x54f   :  { %v929_v56 = vmax.f32 %v928_v53, 0.0  ;;  %v5518_v53 = vcombine.low %v1339_v49, %v1339_v49  ;;  %v6356_v49 = vld [vmem:[#allocation20 + $0x16c] ss:$16 sps:$4 sm:$0xff]  }
 0x551   :  { %v930_v59 = vpack.c.bf16 %v929_v56, %v929_v56  ;;  %v1380_v55 = vsel %vm304_vm2, %v5518_v53, 0  ;;  %v6287_v56 = vld [vmem:[#allocation20 + $0x4] ss:$16 sps:$4 sm:$0xff]   ;;  %v6362_v53 = vld [vmem:[#allocation20 + $0x18c] ss:$16 sps:$4 sm:$0xff]  }
 0x553   :  { %6127 = vmatmul.mubr.msk.bf16.vlgmr.msra.gmra.mrb[20].mxu0 %vm246_vm1, %v930_v59 }
 0x554   :  { %1095 = vmatpush1.bf16.msra.mxu0 %v6262_v58  ;;  %1126 = vmatprep.mubr.bf16.mxu0 %v7397_v57  ;;  %v6290_v58 = vld [vmem:[#allocation20 + $0xc] ss:$16 sps:$4 sm:$0xff]  }
 0x555   :  { %5495 = vmatprep.subr.msk.bf16.mxu0 %vm304_vm2, %v5492_v63 }
 0x558   :  { %1097 = vmatpush1.bf16.msra.mxu0 %v1048_v4 }
 0x559   :  { %6138 = vmatprep.subr.bf16.mxu0 %v7395_v1 }
 0x626   :  { %v993_v7 = vpop.f32.mrb[20].mxu0 }
 0x627   :  { %v994_v8 = vadd.f32 %v5481_v6, %v993_v7  ;;  %v6128_v9 = vpop.f32.mrb[21].mxu0  ;;  %v6293_v6 = vld [vmem:[#allocation20 + $0x24] ss:$16 sps:$4 sm:$0xff]   ;;  %v6296_v7 = vld [vmem:[#allocation20 + $0x2c] ss:$16 sps:$4 sm:$0xff]  }
 0x628   :  { %v996_v10 = vpop.f32.mrb[22].mxu0  ;;  %v6294_v9 = vld [vmem:[#allocation20 + $0x28] ss:$16 sps:$4 sm:$0xff]  }
 0x629   :  { %v999_v11 = vmax.f32 %v994_v8, 0.0  ;;  %v6129_v12 = vpop.f32.mrb[23].mxu0  ;;  %v6291_v8 = vld [vmem:[#allocation20 + $0x20] ss:$16 sps:$4 sm:$0xff]   ;;  %v6299_v10 = vld [vmem:[#allocation20 + $0x44] ss:$16 sps:$4 sm:$0xff]  }
 0x62a   :  { %v6297_v12 = vld [vmem:[#allocation20 + $0x40] ss:$16 sps:$4 sm:$0xff]  }
 0x62b   :  { %v1000_v15 = vpack.c.bf16 %v999_v11, %v999_v11  ;;  %v6302_v11 = vld [vmem:[#allocation20 + $0x4c] ss:$16 sps:$4 sm:$0xff]  }
 0x62d   :  { %5494 = vmatmul.mubr.msk.bf16.vlgmr.msra.gmra.mrb[24].mxu1 %vm372_vm4, %v1000_v15  ;;  %5496 = vmatmul.mubr.msk.bf16.vlgmr.msra.gmra.mrb[24].mxu0 %vm372_vm4, %v1000_v15 }
 0x62e   :  { %6131 = vmatpush3.bf16.msra.mxu1 %v6269_v13  ;;  %6139 = vmatpush3.bf16.msra.mxu0 %v6270_v14  ;;  %v6300_v13 = vld [vmem:[#allocation20 + $0x48] ss:$16 sps:$4 sm:$0xff]   ;;  %v6305_v14 = vld [vmem:[#allocation20 + $0x64] ss:$16 sps:$4 sm:$0xff]  }
 0x62f   :  { %6132 = vmatprep.subr.bf16.mxu1 %v7395_v1  ;;  %6140 = vmatprep.subr.bf16.mxu0 %v7395_v1 }
 0x630   :  { %6134 = vmatprep.mubr.msk.bf16.mxu1 %vm7396_vm0, %v7395_v1  ;;  %6142 = vmatprep.mubr.msk.bf16.mxu0 %vm7396_vm0, %v7395_v1 }
 0x632   :  { %6133 = vmatpush3.bf16.msra.mxu1 %v1158_v18  ;;  %6141 = vmatpush3.bf16.msra.mxu0 %v6272_v17  ;;  %v6306_v17 = vld [vmem:[#allocation20 + $0x68] ss:$16 sps:$4 sm:$0xff]   ;;  %v6311_v18 = vld [vmem:[#allocation20 + $0x84] ss:$16 sps:$4 sm:$0xff]  }
 0x633   :  { %6146 = vmatprep.subr.bf16.mxu1 %v7395_v1  ;;  %1385 = vmatprep.subr.bf16.mxu0 %v6277_v22  ;;  %v6317_v22 = vld [vmem:[#allocation20 + $0xa4] ss:$16 sps:$4 sm:$0xff]  }
 0x635   :  { %6135 = vmatmul.mubr.msk.bf16.vlgmr.msra.gmra.mrb[28].mxu1 %vm372_vm4, %v1000_v15  ;;  %6143 = vmatmul.mubr.msk.bf16.vlgmr.msra.gmra.mrb[28].mxu0 %vm246_vm1, %v7673_v5  ;;  %v6280_v5 = vld [vmem:[#allocation17 + $0x9c] ss:$16 sps:$4 sm:$0xff]   ;;  %v6308_v15 = vld [vmem:[#allocation20 + $0x6c] ss:$16 sps:$4 sm:$0xff]  }
 0x636   :  { %6150 = vmatprep.mubr.msk.bf16.mxu1 %vm7396_vm0, %v7395_v1  ;;  %1417 = vmatprep.mubr.bf16.mxu0 %v7397_v57 }
 0x637   :  { %6147 = vmatpush3.bf16.msra.mxu1 %v6273_v19  ;;  %1386 = vmatpush1.bf16.msra.mxu0 %v6275_v21  ;;  %v6314_v19 = vld [vmem:[#allocation20 + $0x8c] ss:$16 sps:$4 sm:$0xff]   ;;  %v6312_v21 = vld [vmem:[#allocation20 + $0x88] ss:$16 sps:$4 sm:$0xff]  }
 0x638   :  { %6148 = vmatprep.subr.bf16.mxu1 %v7395_v1 }
 0x63b   :  { %6149 = vmatpush3.bf16.msra.mxu1 %v6274_v20  ;;  %v6309_v20 = vld [vmem:[#allocation20 + $0x80] ss:$16 sps:$4 sm:$0xff]  }
 0x63c   :  { %1426 = vmatprep.subr.bf16.mxu1 %v6280_v5  ;;  %v6320_v5 = vld [vmem:[#allocation20 + $0xac] ss:$16 sps:$4 sm:$0xff]  }
 0x700   :  { %v1087_v23 = vpop.f32.mrb[24].mxu1  ;;  %v1128_v24 = vpop.f32.mrb[24].mxu0 }
 0x701   :  { %v7786_v25 = vadd.f32 %v1087_v23, %v7746_v35  ;;  %v7789_v26 = vadd.f32 %v1128_v24, %v7748_v36  ;;  %v1089_v1 = vpop.f32.mrb[25].mxu1  ;;  %v1130_v27 = vpop.f32.mrb[25].mxu0  ;;  %v6315_v23 = vld [vmem:[#allocation20 + $0xa0] ss:$16 sps:$4 sm:$0xff]   ;;  %v6318_v24 = vld [vmem:[#allocation20 + $0xa8] ss:$16 sps:$4 sm:$0xff]  }
 0x702   :  { %v7792_v28 = vadd.f32 %v1089_v1, %v7750_v39  ;;  %v7795_v29 = vadd.f32 %v1130_v27, %v7752_v40  ;;  %v1091_v30 = vpop.f32.mrb[26].mxu1  ;;  %v1132_v31 = vpop.f32.mrb[26].mxu0  ;;  %v1338_v40 = vld [vmem:[#allocation17 + $0xb0] sm:$0xff]  ;;  %v6323_v1 = vld [vmem:[#allocation20 + $0xc4] ss:$16 sps:$4 sm:$0xff]  }
 0x703   :  { %v1092_v32 = vpop.f32.mrb[27].mxu1  ;;  %v1133_v33 = vpop.f32.mrb[27].mxu0  ;;  %v5517_v50 = vcombine.high %v1338_v40, %v1338_v40  ;;  %v5516_v51 = vcombine.low %v1338_v40, %v1338_v40  ;;  %v6326_v27 = vld [vmem:[#allocation20 + $0xcc] ss:$16 sps:$4 sm:$0xff]   ;;  %v6321_v30 = vld [vmem:[#allocation20 + $0xc0] ss:$16 sps:$4 sm:$0xff]  }
 0x704   :  { %v6324_v31 = vld [vmem:[#allocation20 + $0xc8] ss:$16 sps:$4 sm:$0xff]   ;;  %v6329_v32 = vld [vmem:[#allocation20 + $0xe4] ss:$16 sps:$4 sm:$0xff]   ;;  %v6332_v33 = vld [vmem:[#allocation20 + $0xec] ss:$16 sps:$4 sm:$0xff]  }
 0x705   :  { %5520 = vmatprep.subr.msk.bf16.mxu0 %vm304_vm2, %v5517_v50  ;;  %v1374_v54 = vsel %vm304_vm2, %v5516_v51, 0  ;;  %v6353_v40 = vld [vmem:[#allocation20 + $0x164] ss:$16 sps:$4 sm:$0xff]   ;;  %v6351_v50 = vld [vmem:[#allocation20 + $0x160] ss:$16 sps:$4 sm:$0xff]  }
 0x706   :  { %1388 = vmatpush1.bf16.msra.mxu0 %v1374_v54  ;;  %v6354_v51 = vld [vmem:[#allocation20 + $0x168] ss:$16 sps:$4 sm:$0xff]   ;;  %v6357_v54 = vld [vmem:[#allocation20 + $0x180] ss:$16 sps:$4 sm:$0xff]  }
 0x707   :  { %2295 = vmatprep.subr.bf16.mxu0 %v6287_v56  ;;  %v6365_v56 = vld [vmem:[#allocation20 + $0x1a4] ss:$16 sps:$4 sm:$0xff]  }
 0x708   :  { %v1194_v34 = vpop.f32.mrb[28].mxu1  ;;  %v1246_v37 = vpop.f32.mrb[28].mxu0 }
 0x709   :  { %v1247_v35 = vadd.f32 %v1246_v37, %v1194_v34  ;;  %v6136_v41 = vpop.f32.mrb[29].mxu1  ;;  %v6144_v42 = vpop.f32.mrb[29].mxu0  ;;  %v6327_v34 = vld [vmem:[#allocation20 + $0xe0] ss:$16 sps:$4 sm:$0xff]   ;;  %v6330_v37 = vld [vmem:[#allocation20 + $0xe8] ss:$16 sps:$4 sm:$0xff]  }
 0x70a   :  { %v1197_v36 = vpop.f32.mrb[30].mxu1  ;;  %v1249_v43 = vpop.f32.mrb[30].mxu0  ;;  %v6333_v41 = vld [vmem:[#allocation20 + $0x100] ss:$16 sps:$4 sm:$0xff]   ;;  %v6336_v42 = vld [vmem:[#allocation20 + $0x108] ss:$16 sps:$4 sm:$0xff]  }
 0x70b   :  { %v1260_v44 = vadd.f32 %v5503_v38, %v1247_v35  ;;  %v6137_v45 = vpop.f32.mrb[31].mxu1  ;;  %v6145_v46 = vpop.f32.mrb[31].mxu0  ;;  %v6335_v38 = vld [vmem:[#allocation20 + $0x104] ss:$16 sps:$4 sm:$0xff]   ;;  %v6338_v35 = vld [vmem:[#allocation20 + $0x10c] ss:$16 sps:$4 sm:$0xff]  }
 0x70c   :  { %v6341_v36 = vld [vmem:[#allocation20 + $0x124] ss:$16 sps:$4 sm:$0xff]   ;;  %v6344_v43 = vld [vmem:[#allocation20 + $0x12c] ss:$16 sps:$4 sm:$0xff]   ;;  %v6342_v45 = vld [vmem:[#allocation20 + $0x128] ss:$16 sps:$4 sm:$0xff]  }
 0x70d   :  { %v1261_v39 = vmax.f32 %v1260_v44, 0.0  ;;  %v6339_v44 = vld [vmem:[#allocation20 + $0x120] ss:$16 sps:$4 sm:$0xff]   ;;  %v6347_v46 = vld [vmem:[#allocation20 + $0x144] ss:$16 sps:$4 sm:$0xff]  }
 0x70f   :  { %v1262_v48 = vpack.c.bf16 %v1261_v39, %v1261_v39  ;;  %v6350_v39 = vld [vmem:[#allocation20 + $0x14c] ss:$16 sps:$4 sm:$0xff]  }
 0x711   :  { %6151 = vmatmul.mubr.msk.bf16.vlgmr.msra.gmra.mrb[32].mxu1 %vm246_vm1, %v1262_v48  ;;  %v6348_v48 = vld [vmem:[#allocation20 + $0x148] ss:$16 sps:$4 sm:$0xff]  }
 0x712   :  { %1427 = vmatpush1.bf16.msra.mxu1 %v6278_v47  ;;  %1458 = vmatprep.mubr.bf16.mxu1 %v7397_v57  ;;  %v5508_v57 = vld [vmem:[#allocation15 + $0x2] ss:$0 sm:$0xff]  ;;  %v6345_v47 = vld [vmem:[#allocation20 + $0x140] ss:$16 sps:$4 sm:$0xff]  }
 0x713   :  { %5522 = vmatprep.subr.msk.bf16.mxu1 %vm304_vm2, %v5519_v52  ;;  %v6359_v52 = vld [vmem:[#allocation20 + $0x184] ss:$16 sps:$4 sm:$0xff]  }
 0x716   :  { %1429 = vmatpush1.bf16.msra.mxu1 %v1380_v55  ;;  %v6360_v55 = vld [vmem:[#allocation20 + $0x188] ss:$16 sps:$4 sm:$0xff]  }
 0x717   :  { %2377 = vmatprep.subr.bf16.mxu1 %v6290_v58  ;;  %v6368_v58 = vld [vmem:[#allocation20 + $0x1ac] ss:$16 sps:$4 sm:$0xff]  }
 0x7e4   :  { %v1325_v59 = vpop.f32.mrb[32].mxu1 }
 0x7e5   :  { %v1326_v60 = vadd.f32 %v5508_v57, %v1325_v59  ;;  %v6152_v61 = vpop.f32.mrb[33].mxu1  ;;  %v6363_v57 = vld [vmem:[#allocation20 + $0x1a0] ss:$16 sps:$4 sm:$0xff]   ;;  %v6366_v59 = vld [vmem:[#allocation20 + $0x1a8] ss:$16 sps:$4 sm:$0xff]  }
 0x7e6   :  { %v1328_v62 = vpop.f32.mrb[34].mxu1  ;;  %v6369_v61 = vld [vmem:[#allocation20 + $0x1c0] ss:$16 sps:$4 sm:$0xff]  }
 0x7e7   :  { %v1331_v63 = vmax.f32 %v1326_v60, 0.0  ;;  %v6153_v0 = vpop.f32.mrb[35].mxu1  ;;  %v6371_v60 = vld [vmem:[#allocation20 + $0x1c4] ss:$16 sps:$4 sm:$0xff]   ;;  %v6372_v62 = vld [vmem:[#allocation20 + $0x1c8] ss:$16 sps:$4 sm:$0xff]  }
 0x7e8   :  { %v6377_v0 = vld [vmem:[#allocation20 + $0x1e4] ss:$16 sps:$4 sm:$0xff]  }
 0x7e9   :  { %v1332_v4 = vpack.c.bf16 %v1331_v63, %v1331_v63  ;;  %v6374_v63 = vld [vmem:[#allocation20 + $0x1cc] ss:$16 sps:$4 sm:$0xff]  }
 0x7eb   :  { %5521 = vmatmul.mubr.msk.bf16.vlgmr.msra.gmra.mrb[32].mxu0 %vm372_vm4, %v1332_v4  ;;  %5523 = vmatmul.mubr.msk.bf16.vlgmr.msra.gmra.mrb[36].mxu1 %vm372_vm4, %v1332_v4  ;;  %v6378_v4 = vld [vmem:[#allocation20 + $0x1e8] ss:$16 sps:$4 sm:$0xff]  }
 0x7ec   :  { %2296 = vmatpush1.bf16.msra.mxu0 %v6285_v2  ;;  %2378 = vmatpush1.bf16.msra.mxu1 %v6288_v3  ;;  %v6380_v2 = vld [vmem:[#allocation20 + $0x1ec] ss:$16 sps:$4 sm:$0xff]   ;;  %v6375_v3 = vld [vmem:[#allocation20 + $0x1e0] ss:$16 sps:$4 sm:$0xff]  }
 0x7ed   :  { %2297 = vmatprep.subr.bf16.mxu0 %v6293_v6  ;;  %2379 = vmatprep.subr.bf16.mxu1 %v6296_v7  ;;  %v6383_v6 = vld [vmem:[#allocation20 + $0x204] ss:$16 sps:$4 sm:$0xff]   ;;  %v6386_v7 = vld [vmem:[#allocation20 + $0x20c] ss:$16 sps:$4 sm:$0xff]  }
 0x7f0   :  { %2298 = vmatpush1.bf16.msra.mxu0 %v6291_v8  ;;  %2380 = vmatpush1.bf16.msra.mxu1 %v6294_v9  ;;  %v1473_v8 = vlaneseq }
 0x7f1   :  { %2299 = vmatprep.subr.bf16.mxu0 %v6299_v10  ;;  %2381 = vmatprep.subr.bf16.mxu1 %v6302_v11 }
 0x7f2   :  { %v7806_v9 = vshrl.u32 %v1473_v8, 7 }
 0x7f4   :  { %2300 = vmatpush1.bf16.msra.mxu0 %v6297_v12  ;;  %2382 = vmatpush1.bf16.msra.mxu1 %v6300_v13  ;;  %v7809_v10 = vsub.s32 0, %v7806_v9  ;;  %v7812_v11 = vsub.s32 2, %v7806_v9  ;;  %v1471_v12 = vld [vmem:[#allocation18] sm:$0xf]  ;;  %v7815_v13 = vsub.s32 1, %v7806_v9 }
 0x7f5   :  { %2301 = vmatprep.subr.bf16.mxu0 %v6305_v14  ;;  %2383 = vmatprep.subr.bf16.mxu1 %v6308_v15  ;;  %v7818_v14 = vsub.s32 3, %v7806_v9 }
 0x7f6   :  { %v1476_v15 = vrot.slane %v1471_v12, %v7809_v10 }
 0x7f8   :  { %2302 = vmatpush1.bf16.msra.mxu0 %v6303_v16  ;;  %2384 = vmatpush1.bf16.msra.mxu1 %v6306_v17  ;;  %v1484_v16 = vrot.slane %v1471_v12, %v7812_v11 }
 0x7f9   :  { %2303 = vmatprep.subr.bf16.mxu0 %v6311_v18  ;;  %2385 = vmatprep.subr.bf16.mxu1 %v6314_v19  ;;  %v1480_v19 = vrot.slane %v1471_v12, %v7815_v13 }
 0x7fc   :  { %2304 = vmatpush1.bf16.msra.mxu0 %v6309_v20  ;;  %2386 = vmatpush1.bf16.msra.mxu1 %v6312_v21  ;;  %v1488_v20 = vrot.slane %v1471_v12, %v7818_v14  ;;  %v6434_v12 = vld [vmem:[#allocation20 + $0x30c] ss:$16 sps:$4 sm:$0xff]  }
 0x7fd   :  { %2305 = vmatprep.subr.bf16.mxu0 %v6317_v22  ;;  %2387 = vmatprep.subr.bf16.mxu1 %v6320_v5 }
 0x800   :  { %2306 = vmatpush1.bf16.msra.mxu0 %v6315_v23  ;;  %2388 = vmatpush1.bf16.msra.mxu1 %v6318_v24 }
 0x801   :  { %2307 = vmatprep.subr.bf16.mxu0 %v6323_v1  ;;  %2389 = vmatprep.subr.bf16.mxu1 %v6326_v27 }
 0x804   :  { %2308 = vmatpush1.bf16.msra.mxu0 %v6321_v30  ;;  %2390 = vmatpush1.bf16.msra.mxu1 %v6324_v31 }
 0x805   :  { %2309 = vmatprep.subr.bf16.mxu0 %v6329_v32  ;;  %2391 = vmatprep.subr.bf16.mxu1 %v6332_v33 }
 0x808   :  { %2310 = vmatpush1.bf16.msra.mxu0 %v6327_v34  ;;  %2392 = vmatpush1.bf16.msra.mxu1 %v6330_v37 }
 0x809   :  { %2311 = vmatprep.subr.bf16.mxu0 %v6335_v38  ;;  %2393 = vmatprep.subr.bf16.mxu1 %v6338_v35 }
 0x80c   :  { %2312 = vmatpush1.bf16.msra.mxu0 %v6333_v41  ;;  %2394 = vmatpush1.bf16.msra.mxu1 %v6336_v42 }
 0x80d   :  { %2313 = vmatprep.subr.bf16.mxu0 %v6341_v36  ;;  %2395 = vmatprep.subr.bf16.mxu1 %v6344_v43  ;;  %v6384_v36 = vld [vmem:[#allocation20 + $0x208] ss:$16 sps:$4 sm:$0xff]  }
 0x810   :  { %2314 = vmatpush1.bf16.msra.mxu0 %v6339_v44  ;;  %2396 = vmatpush1.bf16.msra.mxu1 %v6342_v45  ;;  %v6387_v45 = vld [vmem:[#allocation20 + $0x220] ss:$16 sps:$4 sm:$0xff]  }
 0x811   :  { %2315 = vmatprep.subr.bf16.mxu0 %v6347_v46  ;;  %2397 = vmatprep.subr.bf16.mxu1 %v6350_v39  ;;  %v6390_v46 = vld [vmem:[#allocation20 + $0x228] ss:$16 sps:$4 sm:$0xff]   ;;  %v6395_v39 = vld [vmem:[#allocation20 + $0x244] ss:$16 sps:$4 sm:$0xff]  }
 0x814   :  { %2316 = vmatpush1.bf16.msra.mxu0 %v6345_v47  ;;  %2398 = vmatpush1.bf16.msra.mxu1 %v6348_v48  ;;  %v6398_v47 = vld [vmem:[#allocation20 + $0x24c] ss:$16 sps:$4 sm:$0xff]   ;;  %v6393_v48 = vld [vmem:[#allocation20 + $0x240] ss:$16 sps:$4 sm:$0xff]  }
 0x815   :  { %2317 = vmatprep.subr.bf16.mxu0 %v6353_v40  ;;  %2399 = vmatprep.subr.bf16.mxu1 %v6356_v49  ;;  %v6396_v40 = vld [vmem:[#allocation20 + $0x248] ss:$16 sps:$4 sm:$0xff]   ;;  %v6401_v49 = vld [vmem:[#allocation20 + $0x264] ss:$16 sps:$4 sm:$0xff]  }
 0x818   :  { %2318 = vmatpush1.bf16.msra.mxu0 %v6351_v50  ;;  %2400 = vmatpush1.bf16.msra.mxu1 %v6354_v51  ;;  %v6404_v50 = vld [vmem:[#allocation20 + $0x26c] ss:$16 sps:$4 sm:$0xff]   ;;  %v6399_v51 = vld [vmem:[#allocation20 + $0x260] ss:$16 sps:$4 sm:$0xff]  }
 0x819   :  { %2319 = vmatprep.subr.bf16.mxu0 %v6359_v52  ;;  %2401 = vmatprep.subr.bf16.mxu1 %v6362_v53  ;;  %v6402_v52 = vld [vmem:[#allocation20 + $0x268] ss:$16 sps:$4 sm:$0xff]   ;;  %v6407_v53 = vld [vmem:[#allocation20 + $0x284] ss:$16 sps:$4 sm:$0xff]  }
 0x81c   :  { %2320 = vmatpush1.bf16.msra.mxu0 %v6357_v54  ;;  %2402 = vmatpush1.bf16.msra.mxu1 %v6360_v55  ;;  %v6410_v54 = vld [vmem:[#allocation20 + $0x28c] ss:$16 sps:$4 sm:$0xff]   ;;  %v6405_v55 = vld [vmem:[#allocation20 + $0x280] ss:$16 sps:$4 sm:$0xff]  }
 0x81d   :  { %2321 = vmatprep.subr.bf16.mxu0 %v6365_v56  ;;  %2403 = vmatprep.subr.bf16.mxu1 %v6368_v58  ;;  %v6408_v56 = vld [vmem:[#allocation20 + $0x288] ss:$16 sps:$4 sm:$0xff]   ;;  %v6413_v58 = vld [vmem:[#allocation20 + $0x2a4] ss:$16 sps:$4 sm:$0xff]  }
 0x820   :  { %2322 = vmatpush1.bf16.msra.mxu0 %v6363_v57  ;;  %2404 = vmatpush1.bf16.msra.mxu1 %v6366_v59  ;;  %v6416_v57 = vld [vmem:[#allocation20 + $0x2ac] ss:$16 sps:$4 sm:$0xff]   ;;  %v6411_v59 = vld [vmem:[#allocation20 + $0x2a0] ss:$16 sps:$4 sm:$0xff]  }
 0x821   :  { %2323 = vmatprep.subr.bf16.mxu0 %v6371_v60  ;;  %2405 = vmatprep.subr.bf16.mxu1 %v6374_v63  ;;  %v6414_v60 = vld [vmem:[#allocation20 + $0x2a8] ss:$16 sps:$4 sm:$0xff]   ;;  %v6417_v63 = vld [vmem:[#allocation20 + $0x2c0] ss:$16 sps:$4 sm:$0xff]  }
 0x824   :  { %2324 = vmatpush1.bf16.msra.mxu0 %v6369_v61  ;;  %2406 = vmatpush1.bf16.msra.mxu1 %v6372_v62  ;;  %v6419_v61 = vld [vmem:[#allocation20 + $0x2c4] ss:$16 sps:$4 sm:$0xff]   ;;  %v6422_v62 = vld [vmem:[#allocation20 + $0x2cc] ss:$16 sps:$4 sm:$0xff]  }
 0x825   :  { %2325 = vmatprep.subr.bf16.mxu0 %v6377_v0  ;;  %2407 = vmatprep.subr.bf16.mxu1 %v6380_v2  ;;  %v6420_v0 = vld [vmem:[#allocation20 + $0x2c8] ss:$16 sps:$4 sm:$0xff]   ;;  %v6425_v2 = vld [vmem:[#allocation20 + $0x2e4] ss:$16 sps:$4 sm:$0xff]  }
 0x828   :  { %2326 = vmatpush1.bf16.msra.mxu0 %v6375_v3  ;;  %2408 = vmatpush1.bf16.msra.mxu1 %v6378_v4  ;;  %v6428_v3 = vld [vmem:[#allocation20 + $0x2ec] ss:$16 sps:$4 sm:$0xff]   ;;  %v6423_v4 = vld [vmem:[#allocation20 + $0x2e0] ss:$16 sps:$4 sm:$0xff]  }
 0x829   :  { %2336 = vmatprep.subr.bf16.mxu0 %v6383_v6  ;;  %2418 = vmatprep.subr.bf16.mxu1 %v6386_v7  ;;  %v6426_v6 = vld [vmem:[#allocation20 + $0x2e8] ss:$16 sps:$4 sm:$0xff]   ;;  %v6431_v7 = vld [vmem:[#allocation20 + $0x304] ss:$16 sps:$4 sm:$0xff]  }
 0x8be   :  { %v1419_v17 = vpop.f32.mrb[32].mxu0  ;;  %v1460_v18 = vpop.f32.mrb[36].mxu1 }
 0x8bf   :  { %v1467_v21 = vadd.f32 %v1419_v17, %v7786_v25  ;;  %v1469_v22 = vadd.f32 %v1460_v18, %v7789_v26  ;;  %v1421_v5 = vpop.f32.mrb[33].mxu0  ;;  %v1462_v23 = vpop.f32.mrb[37].mxu1  ;;  %v6381_v26 = vld [vmem:[#allocation20 + $0x200] ss:$16 sps:$4 sm:$0xff]   ;;  %v6437_v17 = vld [vmem:[#allocation20 + $0x324] ss:$16 sps:$4 sm:$0xff]  }
 0x8c0   :  { %v1468_v24 = vadd.f32 %v1421_v5, %v7792_v28  ;;  %v1470_v1 = vadd.f32 %v1462_v23, %v7795_v29  ;;  %v1423_v27 = vpop.f32.mrb[34].mxu0  ;;  %v1464_v30 = vpop.f32.mrb[38].mxu1  ;;  %v6389_v28 = vld [vmem:[#allocation20 + $0x224] ss:$16 sps:$4 sm:$0xff]   ;;  %v6392_v29 = vld [vmem:[#allocation20 + $0x22c] ss:$16 sps:$4 sm:$0xff]  }
 0x8c1   :  { %v1493_v31 = vadd.f32 %v1476_v15, %v1467_v21  ;;  %v7828_v32 = vadd.f32 %v1484_v16, %v1469_v22  ;;  %v1424_v33 = vpop.f32.mrb[35].mxu0  ;;  %v1465_v34 = vpop.f32.mrb[39].mxu1  ;;  %v6429_v15 = vld [vmem:[#allocation20 + $0x300] ss:$16 sps:$4 sm:$0xff]   ;;  %v6432_v16 = vld [vmem:[#allocation20 + $0x308] ss:$16 sps:$4 sm:$0xff]  }
 0x8c2   :  { %v1494_v37 = vadd.f32 %v1480_v19, %v1468_v24  ;;  %v1496_v38 = vadd.f32 %v1488_v20, %v1470_v1  ;;  %v6440_v18 = vld [vmem:[#allocation20 + $0x32c] ss:$16 sps:$4 sm:$0xff]   ;;  %v6435_v19 = vld [vmem:[#allocation20 + $0x320] ss:$16 sps:$4 sm:$0xff]   ;;  %v6438_v20 = vld [vmem:[#allocation20 + $0x328] ss:$16 sps:$4 sm:$0xff]  }
 0x8c3   :  { %v1497_v35 = vmax.f32 %v1493_v31, 0.0  ;;  %v6443_v21 = vld [vmem:[#allocation20 + $0x344] ss:$16 sps:$4 sm:$0xff]   ;;  %v6446_v22 = vld [vmem:[#allocation20 + $0x34c] ss:$16 sps:$4 sm:$0xff]  }
 0x8c4   :  { %v1498_v41 = vmax.f32 %v1494_v37, 0.0  ;;  %v1500_v25 = vmax.f32 %v1496_v38, 0.0  ;;  %v6441_v5 = vld [vmem:[#allocation20 + $0x340] ss:$16 sps:$4 sm:$0xff]   ;;  %v6444_v23 = vld [vmem:[#allocation20 + $0x348] ss:$16 sps:$4 sm:$0xff]  }
 0x8c5   :  { %v1501_v43 = vpack.c.bf16 %v1497_v35, %v1497_v35  ;;  %v6449_v24 = vld [vmem:[#allocation20 + $0x364] ss:$16 sps:$4 sm:$0xff]   ;;  %v6452_v1 = vld [vmem:[#allocation20 + $0x36c] ss:$16 sps:$4 sm:$0xff]   ;;  %v6447_v27 = vld [vmem:[#allocation20 + $0x360] ss:$16 sps:$4 sm:$0xff]  }
 0x8c6   :  { %v1502_v42 = vpack.c.bf16 %v1498_v41, %v1498_v41  ;;  %v1504_v44 = vpack.c.bf16 %v1500_v25, %v1500_v25  ;;  %v6450_v30 = vld [vmem:[#allocation20 + $0x368] ss:$16 sps:$4 sm:$0xff]   ;;  %v6455_v31 = vld [vmem:[#allocation20 + $0x384] ss:$16 sps:$4 sm:$0xff]   ;;  %v6458_v33 = vld [vmem:[#allocation20 + $0x38c] ss:$16 sps:$4 sm:$0xff]  }
 0x8c7   :  { %v6453_v34 = vld [vmem:[#allocation20 + $0x380] ss:$16 sps:$4 sm:$0xff]   ;;  %v6456_v37 = vld [vmem:[#allocation20 + $0x388] ss:$16 sps:$4 sm:$0xff]   ;;  %v6461_v38 = vld [vmem:[#allocation20 + $0x3a4] ss:$16 sps:$4 sm:$0xff]  }
 0x8c8   :  { %2327 = vmatprep.mubr.bf16.mxu0 %v1502_v42  ;;  %2409 = vmatprep.mubr.bf16.mxu1 %v1502_v42  ;;  %v6464_v35 = vld [vmem:[#allocation20 + $0x3ac] ss:$16 sps:$4 sm:$0xff]   ;;  %v6459_v41 = vld [vmem:[#allocation20 + $0x3a0] ss:$16 sps:$4 sm:$0xff]   ;;  %v6462_v25 = vld [vmem:[#allocation20 + $0x3a8] ss:$16 sps:$4 sm:$0xff]  }
 0x8c9   :  { %2328 = vmatmul.mubr.bf16.vlgmr.msra.gmra.mrb[36].mxu0 %v1501_v43  ;;  %2410 = vmatmul.mubr.bf16.vlgmr.msra.gmra.mrb[40].mxu1 %v1501_v43  ;;  %v6467_v42 = vld [vmem:[#allocation20 + $0x3c4] ss:$16 sps:$4 sm:$0xff]   ;;  %v6468_v43 = vld [vmem:[#allocation20 + $0x3c8] ss:$16 sps:$4 sm:$0xff]  }
 0x8ca   :  { %2337 = vmatpush1.bf16.msra.mxu0 %v6381_v26  ;;  %2419 = vmatpush1.bf16.msra.mxu1 %v6384_v36  ;;  %v6470_v26 = vld [vmem:[#allocation20 + $0x3cc] ss:$16 sps:$4 sm:$0xff]   ;;  %v6465_v36 = vld [vmem:[#allocation20 + $0x3c0] ss:$16 sps:$4 sm:$0xff]  }
 0x8cb   :  { %2368 = vmatprep.mubr.bf16.mxu0 %v1504_v44  ;;  %2450 = vmatprep.mubr.bf16.mxu1 %v1504_v44  ;;  %v6471_v44 = vld [vmem:[#allocation20 + $0x3e0] ss:$16 sps:$4 sm:$0xff]  }
 0x8cc   :  { %2338 = vmatprep.subr.bf16.mxu0 %v6389_v28  ;;  %2420 = vmatprep.subr.bf16.mxu1 %v6392_v29  ;;  %v6473_v28 = vld [vmem:[#allocation20 + $0x3e4] ss:$16 sps:$4 sm:$0xff]   ;;  %v6476_v29 = vld [vmem:[#allocation20 + $0x3ec] ss:$16 sps:$4 sm:$0xff]  }
 0x8ce   :  { %2339 = vmatpush1.bf16.msra.mxu0 %v6387_v45  ;;  %2421 = vmatpush1.bf16.msra.mxu1 %v6390_v46  ;;  %v6474_v45 = vld [vmem:[#allocation20 + $0x3e8] ss:$16 sps:$4 sm:$0xff]   ;;  %v1499_v46 = vmax.f32 %v7828_v32, 0.0  ;;  %v6491_v32 = vld [vmem:[#allocation20 + $0x444] ss:$16 sps:$4 sm:$0xff]  }
 0x8cf   :  { %2340 = vmatprep.subr.bf16.mxu0 %v6395_v39  ;;  %2422 = vmatprep.subr.bf16.mxu1 %v6398_v47  ;;  %v6479_v39 = vld [vmem:[#allocation20 + $0x404] ss:$16 sps:$4 sm:$0xff]   ;;  %v6482_v47 = vld [vmem:[#allocation20 + $0x40c] ss:$16 sps:$4 sm:$0xff]  }
 0x8d2   :  { %2341 = vmatpush1.bf16.msra.mxu0 %v6393_v48  ;;  %2423 = vmatpush1.bf16.msra.mxu1 %v6396_v40  ;;  %v6477_v48 = vld [vmem:[#allocation20 + $0x400] ss:$16 sps:$4 sm:$0xff]   ;;  %v6480_v40 = vld [vmem:[#allocation20 + $0x408] ss:$16 sps:$4 sm:$0xff]  }
 0x8d3   :  { %2342 = vmatprep.subr.bf16.mxu0 %v6401_v49  ;;  %2424 = vmatprep.subr.bf16.mxu1 %v6404_v50  ;;  %v1503_v49 = vpack.c.bf16 %v1499_v46, %v1499_v46  ;;  %v6485_v50 = vld [vmem:[#allocation20 + $0x424] ss:$16 sps:$4 sm:$0xff]  }
 0x8d4   :  { %v6563_v46 = vld [vmem:[#allocation20 + $0x5c4] ss:$16 sps:$4 sm:$0xff]  }
 0x8d6   :  { %2343 = vmatpush1.bf16.msra.mxu0 %v6399_v51  ;;  %2425 = vmatpush1.bf16.msra.mxu1 %v6402_v52  ;;  %v6488_v51 = vld [vmem:[#allocation20 + $0x42c] ss:$16 sps:$4 sm:$0xff]   ;;  %v6483_v52 = vld [vmem:[#allocation20 + $0x420] ss:$16 sps:$4 sm:$0xff]  }
 0x8d7   :  { %2344 = vmatprep.subr.bf16.mxu0 %v6407_v53  ;;  %2426 = vmatprep.subr.bf16.mxu1 %v6410_v54  ;;  %v6486_v53 = vld [vmem:[#allocation20 + $0x428] ss:$16 sps:$4 sm:$0xff]   ;;  %v6494_v54 = vld [vmem:[#allocation20 + $0x44c] ss:$16 sps:$4 sm:$0xff]  }
 0x8da   :  { %2345 = vmatpush1.bf16.msra.mxu0 %v6405_v55  ;;  %2427 = vmatpush1.bf16.msra.mxu1 %v6408_v56  ;;  %v6489_v55 = vld [vmem:[#allocation20 + $0x440] ss:$16 sps:$4 sm:$0xff]   ;;  %v6492_v56 = vld [vmem:[#allocation20 + $0x448] ss:$16 sps:$4 sm:$0xff]  }
 0x8db   :  { %2346 = vmatprep.subr.bf16.mxu0 %v6413_v58  ;;  %2428 = vmatprep.subr.bf16.mxu1 %v6416_v57  ;;  %v6497_v58 = vld [vmem:[#allocation20 + $0x464] ss:$16 sps:$4 sm:$0xff]   ;;  %v6500_v57 = vld [vmem:[#allocation20 + $0x46c] ss:$16 sps:$4 sm:$0xff]  }
 0x8de   :  { %2347 = vmatpush1.bf16.msra.mxu0 %v6411_v59  ;;  %2429 = vmatpush1.bf16.msra.mxu1 %v6414_v60  ;;  %v6495_v59 = vld [vmem:[#allocation20 + $0x460] ss:$16 sps:$4 sm:$0xff]   ;;  %v6498_v60 = vld [vmem:[#allocation20 + $0x468] ss:$16 sps:$4 sm:$0xff]  }
 0x8df   :  { %2348 = vmatprep.subr.bf16.mxu0 %v6419_v61  ;;  %2430 = vmatprep.subr.bf16.mxu1 %v6422_v62  ;;  %v6503_v61 = vld [vmem:[#allocation20 + $0x484] ss:$16 sps:$4 sm:$0xff]   ;;  %v6506_v62 = vld [vmem:[#allocation20 + $0x48c] ss:$16 sps:$4 sm:$0xff]  }
 0x8e2   :  { %2349 = vmatpush1.bf16.msra.mxu0 %v6417_v63  ;;  %2431 = vmatpush1.bf16.msra.mxu1 %v6420_v0  ;;  %v6501_v63 = vld [vmem:[#allocation20 + $0x480] ss:$16 sps:$4 sm:$0xff]   ;;  %v6504_v0 = vld [vmem:[#allocation20 + $0x488] ss:$16 sps:$4 sm:$0xff]  }
 0x8e3   :  { %2350 = vmatprep.subr.bf16.mxu0 %v6425_v2  ;;  %2432 = vmatprep.subr.bf16.mxu1 %v6428_v3  ;;  %v6509_v2 = vld [vmem:[#allocation20 + $0x4a4] ss:$16 sps:$4 sm:$0xff]   ;;  %v6512_v3 = vld [vmem:[#allocation20 + $0x4ac] ss:$16 sps:$4 sm:$0xff]  }
 0x8e6   :  { %2351 = vmatpush1.bf16.msra.mxu0 %v6423_v4  ;;  %2433 = vmatpush1.bf16.msra.mxu1 %v6426_v6  ;;  %v6507_v4 = vld [vmem:[#allocation20 + $0x4a0] ss:$16 sps:$4 sm:$0xff]   ;;  %v6510_v6 = vld [vmem:[#allocation20 + $0x4a8] ss:$16 sps:$4 sm:$0xff]  }
 0x8e7   :  { %2352 = vmatprep.subr.bf16.mxu0 %v6431_v7  ;;  %2434 = vmatprep.subr.bf16.mxu1 %v6434_v12  ;;  %v6515_v7 = vld [vmem:[#allocation20 + $0x4c4] ss:$16 sps:$4 sm:$0xff]   ;;  %v6518_v12 = vld [vmem:[#allocation20 + $0x4cc] ss:$16 sps:$4 sm:$0xff]  }
 0x8ea   :  { %2353 = vmatpush1.bf16.msra.mxu0 %v6429_v15  ;;  %2435 = vmatpush1.bf16.msra.mxu1 %v6432_v16  ;;  %v6513_v15 = vld [vmem:[#allocation20 + $0x4c0] ss:$16 sps:$4 sm:$0xff]   ;;  %v6516_v16 = vld [vmem:[#allocation20 + $0x4c8] ss:$16 sps:$4 sm:$0xff]  }
 0x8eb   :  { %2354 = vmatprep.subr.bf16.mxu0 %v6437_v17  ;;  %2436 = vmatprep.subr.bf16.mxu1 %v6440_v18  ;;  %v6521_v17 = vld [vmem:[#allocation20 + $0x4e4] ss:$16 sps:$4 sm:$0xff]   ;;  %v6524_v18 = vld [vmem:[#allocation20 + $0x4ec] ss:$16 sps:$4 sm:$0xff]  }
 0x8ee   :  { %2355 = vmatpush1.bf16.msra.mxu0 %v6435_v19  ;;  %2437 = vmatpush1.bf16.msra.mxu1 %v6438_v20  ;;  %v6519_v19 = vld [vmem:[#allocation20 + $0x4e0] ss:$16 sps:$4 sm:$0xff]   ;;  %v6522_v20 = vld [vmem:[#allocation20 + $0x4e8] ss:$16 sps:$4 sm:$0xff]  }
 0x8ef   :  { %2356 = vmatprep.subr.bf16.mxu0 %v6443_v21  ;;  %2438 = vmatprep.subr.bf16.mxu1 %v6446_v22  ;;  %v6527_v21 = vld [vmem:[#allocation20 + $0x504] ss:$16 sps:$4 sm:$0xff]   ;;  %v6530_v22 = vld [vmem:[#allocation20 + $0x50c] ss:$16 sps:$4 sm:$0xff]  }
 0x8f2   :  { %2357 = vmatpush1.bf16.msra.mxu0 %v6441_v5  ;;  %2439 = vmatpush1.bf16.msra.mxu1 %v6444_v23  ;;  %v6525_v5 = vld [vmem:[#allocation20 + $0x500] ss:$16 sps:$4 sm:$0xff]   ;;  %v6528_v23 = vld [vmem:[#allocation20 + $0x508] ss:$16 sps:$4 sm:$0xff]  }
 0x8f3   :  { %2358 = vmatprep.subr.bf16.mxu0 %v6449_v24  ;;  %2440 = vmatprep.subr.bf16.mxu1 %v6452_v1  ;;  %v6533_v24 = vld [vmem:[#allocation20 + $0x524] ss:$16 sps:$4 sm:$0xff]   ;;  %v6536_v1 = vld [vmem:[#allocation20 + $0x52c] ss:$16 sps:$4 sm:$0xff]  }
 0x8f6   :  { %2359 = vmatpush1.bf16.msra.mxu0 %v6447_v27  ;;  %2441 = vmatpush1.bf16.msra.mxu1 %v6450_v30  ;;  %v6531_v27 = vld [vmem:[#allocation20 + $0x520] ss:$16 sps:$4 sm:$0xff]   ;;  %v6534_v30 = vld [vmem:[#allocation20 + $0x528] ss:$16 sps:$4 sm:$0xff]  }
 0x8f7   :  { %2360 = vmatprep.subr.bf16.mxu0 %v6455_v31  ;;  %2442 = vmatprep.subr.bf16.mxu1 %v6458_v33  ;;  %v6539_v31 = vld [vmem:[#allocation20 + $0x544] ss:$16 sps:$4 sm:$0xff]   ;;  %v6542_v33 = vld [vmem:[#allocation20 + $0x54c] ss:$16 sps:$4 sm:$0xff]  }
 0x8fa   :  { %2361 = vmatpush1.bf16.msra.mxu0 %v6453_v34  ;;  %2443 = vmatpush1.bf16.msra.mxu1 %v6456_v37  ;;  %v6537_v34 = vld [vmem:[#allocation20 + $0x540] ss:$16 sps:$4 sm:$0xff]   ;;  %v6540_v37 = vld [vmem:[#allocation20 + $0x548] ss:$16 sps:$4 sm:$0xff]  }
 0x8fb   :  { %2362 = vmatprep.subr.bf16.mxu0 %v6461_v38  ;;  %2444 = vmatprep.subr.bf16.mxu1 %v6464_v35  ;;  %v6545_v38 = vld [vmem:[#allocation20 + $0x564] ss:$16 sps:$4 sm:$0xff]   ;;  %v6548_v35 = vld [vmem:[#allocation20 + $0x56c] ss:$16 sps:$4 sm:$0xff]  }
 0x8fe   :  { %2363 = vmatpush1.bf16.msra.mxu0 %v6459_v41  ;;  %2445 = vmatpush1.bf16.msra.mxu1 %v6462_v25  ;;  %v6543_v41 = vld [vmem:[#allocation20 + $0x560] ss:$16 sps:$4 sm:$0xff]   ;;  %v6546_v25 = vld [vmem:[#allocation20 + $0x568] ss:$16 sps:$4 sm:$0xff]  }
 0x8ff   :  { %2364 = vmatprep.subr.bf16.mxu0 %v6467_v42  ;;  %2446 = vmatprep.subr.bf16.mxu1 %v6470_v26  ;;  %v6551_v42 = vld [vmem:[#allocation20 + $0x584] ss:$16 sps:$4 sm:$0xff]   ;;  %v6554_v26 = vld [vmem:[#allocation20 + $0x58c] ss:$16 sps:$4 sm:$0xff]  }
 0x902   :  { %2365 = vmatpush1.bf16.msra.mxu0 %v6465_v36  ;;  %2447 = vmatpush1.bf16.msra.mxu1 %v6468_v43  ;;  %v6549_v36 = vld [vmem:[#allocation20 + $0x580] ss:$16 sps:$4 sm:$0xff]   ;;  %v6552_v43 = vld [vmem:[#allocation20 + $0x588] ss:$16 sps:$4 sm:$0xff]  }
 0x903   :  { %2366 = vmatprep.subr.bf16.mxu0 %v6473_v28  ;;  %2448 = vmatprep.subr.bf16.mxu1 %v6476_v29  ;;  %v6557_v28 = vld [vmem:[#allocation20 + $0x5a4] ss:$16 sps:$4 sm:$0xff]   ;;  %v6560_v29 = vld [vmem:[#allocation20 + $0x5ac] ss:$16 sps:$4 sm:$0xff]  }
 0x906   :  { %2367 = vmatpush1.bf16.msra.mxu0 %v6471_v44  ;;  %2449 = vmatpush1.bf16.msra.mxu1 %v6474_v45  ;;  %v6555_v44 = vld [vmem:[#allocation20 + $0x5a0] ss:$16 sps:$4 sm:$0xff]   ;;  %v6558_v45 = vld [vmem:[#allocation20 + $0x5a8] ss:$16 sps:$4 sm:$0xff]  }
 0x907   :  { %3259 = vmatprep.subr.bf16.mxu0 %v6479_v39  ;;  %3341 = vmatprep.subr.bf16.mxu1 %v6482_v47  ;;  %v6566_v39 = vld [vmem:[#allocation20 + $0x5cc] ss:$16 sps:$4 sm:$0xff]   ;;  %v6561_v47 = vld [vmem:[#allocation20 + $0x5c0] ss:$16 sps:$4 sm:$0xff]  }
 0x909   :  { %2369 = vmatmul.mubr.bf16.vlgmr.msra.gmra.mrb[36].mxu0 %v1503_v49  ;;  %2451 = vmatmul.mubr.bf16.vlgmr.msra.gmra.mrb[40].mxu1 %v1503_v49  ;;  %v6572_v49 = vld [vmem:[#allocation20 + $0x5ec] ss:$16 sps:$4 sm:$0xff]  }
 0x90a   :  { %3260 = vmatpush1.bf16.msra.mxu0 %v6477_v48  ;;  %3342 = vmatpush1.bf16.msra.mxu1 %v6480_v40  ;;  %v6564_v48 = vld [vmem:[#allocation20 + $0x5c8] ss:$16 sps:$4 sm:$0xff]   ;;  %v6569_v40 = vld [vmem:[#allocation20 + $0x5e4] ss:$16 sps:$4 sm:$0xff]  }
 0x90b   :  { %3261 = vmatprep.subr.bf16.mxu0 %v6485_v50  ;;  %3343 = vmatprep.subr.bf16.mxu1 %v6488_v51  ;;  %v6567_v50 = vld [vmem:[#allocation20 + $0x5e0] ss:$16 sps:$4 sm:$0xff]   ;;  %v6570_v51 = vld [vmem:[#allocation20 + $0x5e8] ss:$16 sps:$4 sm:$0xff]  }
 0x90e   :  { %3262 = vmatpush1.bf16.msra.mxu0 %v6483_v52  ;;  %3344 = vmatpush1.bf16.msra.mxu1 %v6486_v53  ;;  %v6575_v52 = vld [vmem:[#allocation20 + $0x604] ss:$16 sps:$4 sm:$0xff]   ;;  %v6578_v53 = vld [vmem:[#allocation20 + $0x60c] ss:$16 sps:$4 sm:$0xff]  }
 0x90f   :  { %3263 = vmatprep.subr.bf16.mxu0 %v6491_v32  ;;  %3345 = vmatprep.subr.bf16.mxu1 %v6494_v54  ;;  %v7831_v32 = vld [vmem:[#allocation21] sm:$0xf] }
 0x910   :  { %v1638_v54 = vrot.slane %v7831_v32, %v7809_v10 }
 0x912   :  { %3264 = vmatpush1.bf16.msra.mxu0 %v6489_v55  ;;  %3346 = vmatpush1.bf16.msra.mxu1 %v6492_v56  ;;  %v1642_v55 = vrot.slane %v7831_v32, %v7815_v13  ;;  %v1650_v56 = vrot.slane %v7831_v32, %v7818_v14 }
 0x913   :  { %3265 = vmatprep.subr.bf16.mxu0 %v6497_v58  ;;  %3347 = vmatprep.subr.bf16.mxu1 %v6500_v57 }
 0x916   :  { %3266 = vmatpush1.bf16.msra.mxu0 %v6495_v59  ;;  %3348 = vmatpush1.bf16.msra.mxu1 %v6498_v60 }
 0x917   :  { %3267 = vmatprep.subr.bf16.mxu0 %v6503_v61  ;;  %3349 = vmatprep.subr.bf16.mxu1 %v6506_v62 }
 0x91a   :  { %3268 = vmatpush1.bf16.msra.mxu0 %v6501_v63  ;;  %3350 = vmatpush1.bf16.msra.mxu1 %v6504_v0 }
 0x91b   :  { %3269 = vmatprep.subr.bf16.mxu0 %v6509_v2  ;;  %3351 = vmatprep.subr.bf16.mxu1 %v6512_v3 }
 0x91e   :  { %3270 = vmatpush1.bf16.msra.mxu0 %v6507_v4  ;;  %3352 = vmatpush1.bf16.msra.mxu1 %v6510_v6 }
 0x91f   :  { %3271 = vmatprep.subr.bf16.mxu0 %v6515_v7  ;;  %3353 = vmatprep.subr.bf16.mxu1 %v6518_v12 }
 0x922   :  { %3272 = vmatpush1.bf16.msra.mxu0 %v6513_v15  ;;  %3354 = vmatpush1.bf16.msra.mxu1 %v6516_v16  ;;  %v6573_v16 = vld [vmem:[#allocation20 + $0x600] ss:$16 sps:$4 sm:$0xff]  }
 0x923   :  { %3273 = vmatprep.subr.bf16.mxu0 %v6521_v17  ;;  %3355 = vmatprep.subr.bf16.mxu1 %v6524_v18  ;;  %v6576_v17 = vld [vmem:[#allocation20 + $0x608] ss:$16 sps:$4 sm:$0xff]  }
 0x926   :  { %3274 = vmatpush1.bf16.msra.mxu0 %v6519_v19  ;;  %3356 = vmatpush1.bf16.msra.mxu1 %v6522_v20  ;;  %v6581_v19 = vld [vmem:[#allocation20 + $0x624] ss:$16 sps:$4 sm:$0xff]   ;;  %v6584_v20 = vld [vmem:[#allocation20 + $0x62c] ss:$16 sps:$4 sm:$0xff]  }
 0x927   :  { %3275 = vmatprep.subr.bf16.mxu0 %v6527_v21  ;;  %3357 = vmatprep.subr.bf16.mxu1 %v6530_v22  ;;  %v6579_v22 = vld [vmem:[#allocation20 + $0x620] ss:$16 sps:$4 sm:$0xff]  }
 0x92a   :  { %3276 = vmatpush1.bf16.msra.mxu0 %v6525_v5  ;;  %3358 = vmatpush1.bf16.msra.mxu1 %v6528_v23  ;;  %v6582_v5 = vld [vmem:[#allocation20 + $0x628] ss:$16 sps:$4 sm:$0xff]   ;;  %v6587_v23 = vld [vmem:[#allocation20 + $0x644] ss:$16 sps:$4 sm:$0xff]  }
 0x92b   :  { %3277 = vmatprep.subr.bf16.mxu0 %v6533_v24  ;;  %3359 = vmatprep.subr.bf16.mxu1 %v6536_v1  ;;  %v6590_v24 = vld [vmem:[#allocation20 + $0x64c] ss:$16 sps:$4 sm:$0xff]   ;;  %v6585_v1 = vld [vmem:[#allocation20 + $0x640] ss:$16 sps:$4 sm:$0xff]  }
 0x92e   :  { %3278 = vmatpush1.bf16.msra.mxu0 %v6531_v27  ;;  %3360 = vmatpush1.bf16.msra.mxu1 %v6534_v30  ;;  %v6588_v27 = vld [vmem:[#allocation20 + $0x648] ss:$16 sps:$4 sm:$0xff]   ;;  %v6593_v30 = vld [vmem:[#allocation20 + $0x664] ss:$16 sps:$4 sm:$0xff]  }
 0x92f   :  { %3279 = vmatprep.subr.bf16.mxu0 %v6539_v31  ;;  %3361 = vmatprep.subr.bf16.mxu1 %v6542_v33  ;;  %v6596_v31 = vld [vmem:[#allocation20 + $0x66c] ss:$16 sps:$4 sm:$0xff]   ;;  %v6591_v33 = vld [vmem:[#allocation20 + $0x660] ss:$16 sps:$4 sm:$0xff]  }
 0x932   :  { %3280 = vmatpush1.bf16.msra.mxu0 %v6537_v34  ;;  %3362 = vmatpush1.bf16.msra.mxu1 %v6540_v37  ;;  %v6594_v34 = vld [vmem:[#allocation20 + $0x668] ss:$16 sps:$4 sm:$0xff]   ;;  %v6599_v37 = vld [vmem:[#allocation20 + $0x684] ss:$16 sps:$4 sm:$0xff]  }
 0x933   :  { %3281 = vmatprep.subr.bf16.mxu0 %v6545_v38  ;;  %3363 = vmatprep.subr.bf16.mxu1 %v6548_v35  ;;  %v6602_v38 = vld [vmem:[#allocation20 + $0x68c] ss:$16 sps:$4 sm:$0xff]   ;;  %v6597_v35 = vld [vmem:[#allocation20 + $0x680] ss:$16 sps:$4 sm:$0xff]  }
 0x936   :  { %3282 = vmatpush1.bf16.msra.mxu0 %v6543_v41  ;;  %3364 = vmatpush1.bf16.msra.mxu1 %v6546_v25  ;;  %v6600_v41 = vld [vmem:[#allocation20 + $0x688] ss:$16 sps:$4 sm:$0xff]   ;;  %v6605_v25 = vld [vmem:[#allocation20 + $0x6a4] ss:$16 sps:$4 sm:$0xff]  }
 0x937   :  { %3283 = vmatprep.subr.bf16.mxu0 %v6551_v42  ;;  %3365 = vmatprep.subr.bf16.mxu1 %v6554_v26  ;;  %v6608_v42 = vld [vmem:[#allocation20 + $0x6ac] ss:$16 sps:$4 sm:$0xff]   ;;  %v6603_v26 = vld [vmem:[#allocation20 + $0x6a0] ss:$16 sps:$4 sm:$0xff]  }
 0x93a   :  { %3284 = vmatpush1.bf16.msra.mxu0 %v6549_v36  ;;  %3366 = vmatpush1.bf16.msra.mxu1 %v6552_v43  ;;  %v6606_v36 = vld [vmem:[#allocation20 + $0x6a8] ss:$16 sps:$4 sm:$0xff]   ;;  %v6611_v43 = vld [vmem:[#allocation20 + $0x6c4] ss:$16 sps:$4 sm:$0xff]  }
 0x93b   :  { %3285 = vmatprep.subr.bf16.mxu0 %v6557_v28  ;;  %3367 = vmatprep.subr.bf16.mxu1 %v6560_v29  ;;  %v6614_v28 = vld [vmem:[#allocation20 + $0x6cc] ss:$16 sps:$4 sm:$0xff]   ;;  %v6609_v29 = vld [vmem:[#allocation20 + $0x6c0] ss:$16 sps:$4 sm:$0xff]  }
 0x93e   :  { %3286 = vmatpush1.bf16.msra.mxu0 %v6555_v44  ;;  %3368 = vmatpush1.bf16.msra.mxu1 %v6558_v45  ;;  %v6612_v44 = vld [vmem:[#allocation20 + $0x6c8] ss:$16 sps:$4 sm:$0xff]   ;;  %v6617_v45 = vld [vmem:[#allocation20 + $0x6e4] ss:$16 sps:$4 sm:$0xff]  }
 0x93f   :  { %3287 = vmatprep.subr.bf16.mxu0 %v6563_v46  ;;  %3369 = vmatprep.subr.bf16.mxu1 %v6566_v39  ;;  %v6620_v46 = vld [vmem:[#allocation20 + $0x6ec] ss:$16 sps:$4 sm:$0xff]   ;;  %v6615_v39 = vld [vmem:[#allocation20 + $0x6e0] ss:$16 sps:$4 sm:$0xff]  }
 0x942   :  { %3288 = vmatpush1.bf16.msra.mxu0 %v6561_v47  ;;  %3370 = vmatpush1.bf16.msra.mxu1 %v6564_v48  ;;  %v6618_v47 = vld [vmem:[#allocation20 + $0x6e8] ss:$16 sps:$4 sm:$0xff]   ;;  %v6623_v48 = vld [vmem:[#allocation20 + $0x704] ss:$16 sps:$4 sm:$0xff]  }
 0x943   :  { %3289 = vmatprep.subr.bf16.mxu0 %v6569_v40  ;;  %3371 = vmatprep.subr.bf16.mxu1 %v6572_v49  ;;  %v6626_v40 = vld [vmem:[#allocation20 + $0x70c] ss:$16 sps:$4 sm:$0xff]   ;;  %v6621_v49 = vld [vmem:[#allocation20 + $0x700] ss:$16 sps:$4 sm:$0xff]  }
 0x946   :  { %3290 = vmatpush1.bf16.msra.mxu0 %v6567_v50  ;;  %3372 = vmatpush1.bf16.msra.mxu1 %v6570_v51  ;;  %v6624_v50 = vld [vmem:[#allocation20 + $0x708] ss:$16 sps:$4 sm:$0xff]   ;;  %v6629_v51 = vld [vmem:[#allocation20 + $0x724] ss:$16 sps:$4 sm:$0xff]  }
 0x947   :  { %3300 = vmatprep.subr.bf16.mxu0 %v6575_v52  ;;  %3382 = vmatprep.subr.bf16.mxu1 %v6578_v53  ;;  %v6632_v52 = vld [vmem:[#allocation20 + $0x72c] ss:$16 sps:$4 sm:$0xff]   ;;  %v6627_v53 = vld [vmem:[#allocation20 + $0x720] ss:$16 sps:$4 sm:$0xff]  }
 0x9dc   :  { %v2370_v58 = vpop.f32.mrb[36].mxu0  ;;  %v7839_v57 = vpop.f32.mrb[40].mxu1 }
 0x9dd   :  { %v6154_v59 = vadd.f32 %v2370_v58, %v1638_v54  ;;  %v2372_v60 = vpop.f32.mrb[37].mxu0  ;;  %v2454_v61 = vpop.f32.mrb[41].mxu1  ;;  %v6630_v54 = vld [vmem:[#allocation20 + $0x728] ss:$16 sps:$4 sm:$0xff]   ;;  %v6633_v58 = vld [vmem:[#allocation20 + $0x740] ss:$16 sps:$4 sm:$0xff]  }
 0x9de   :  { %v6155_v62 = vadd.f32 %v2372_v60, %v1642_v55  ;;  %v6157_v63 = vadd.f32 %v2454_v61, %v1650_v56  ;;  %v2374_v0 = vpop.f32.mrb[38].mxu0  ;;  %v2456_v2 = vpop.f32.mrb[42].mxu1  ;;  %v6635_v55 = vld [vmem:[#allocation20 + $0x744] ss:$16 sps:$4 sm:$0xff]   ;;  %v6638_v56 = vld [vmem:[#allocation20 + $0x74c] ss:$16 sps:$4 sm:$0xff]  }
 0x9df   :  { %v2459_v3 = vmax.f32 %v6154_v59, 0.0  ;;  %v2375_v4 = vpop.f32.mrb[39].mxu0  ;;  %v2457_v6 = vpop.f32.mrb[43].mxu1  ;;  %v6636_v59 = vld [vmem:[#allocation20 + $0x748] ss:$16 sps:$4 sm:$0xff]  }
 0x9e0   :  { %v2460_v7 = vmax.f32 %v6155_v62, 0.0  ;;  %v2462_v12 = vmax.f32 %v6157_v63, 0.0  ;;  %v6641_v60 = vld [vmem:[#allocation20 + $0x764] ss:$16 sps:$4 sm:$0xff]   ;;  %v6644_v61 = vld [vmem:[#allocation20 + $0x76c] ss:$16 sps:$4 sm:$0xff]  }
 0x9e1   :  { %v2463_v18 = vpack.c.bf16 %v2459_v3, %v2459_v3  ;;  %v6639_v62 = vld [vmem:[#allocation20 + $0x760] ss:$16 sps:$4 sm:$0xff]   ;;  %v6642_v63 = vld [vmem:[#allocation20 + $0x768] ss:$16 sps:$4 sm:$0xff]   ;;  %v6647_v0 = vld [vmem:[#allocation20 + $0x784] ss:$16 sps:$4 sm:$0xff]  }
 0x9e2   :  { %v2464_v15 = vpack.c.bf16 %v2460_v7, %v2460_v7  ;;  %v2466_v21 = vpack.c.bf16 %v2462_v12, %v2462_v12  ;;  %v6650_v2 = vld [vmem:[#allocation20 + $0x78c] ss:$16 sps:$4 sm:$0xff]   ;;  %v6645_v3 = vld [vmem:[#allocation20 + $0x780] ss:$16 sps:$4 sm:$0xff]   ;;  %v6648_v4 = vld [vmem:[#allocation20 + $0x788] ss:$16 sps:$4 sm:$0xff]  }
 0x9e3   :  { %v6653_v6 = vld [vmem:[#allocation20 + $0x7a4] ss:$16 sps:$4 sm:$0xff]   ;;  %v6656_v7 = vld [vmem:[#allocation20 + $0x7ac] ss:$16 sps:$4 sm:$0xff]   ;;  %v6651_v12 = vld [vmem:[#allocation20 + $0x7a0] ss:$16 sps:$4 sm:$0xff]  }
 0x9e4   :  { %3291 = vmatprep.mubr.bf16.mxu0 %v2464_v15  ;;  %3373 = vmatprep.mubr.bf16.mxu1 %v2464_v15  ;;  %v6654_v15 = vld [vmem:[#allocation20 + $0x7a8] ss:$16 sps:$4 sm:$0xff]  }
 0x9e5   :  { %3292 = vmatmul.mubr.bf16.vlgmr.msra.gmra.mrb[40].mxu0 %v2463_v18  ;;  %3374 = vmatmul.mubr.bf16.vlgmr.msra.gmra.mrb[44].mxu1 %v2463_v18  ;;  %v6662_v18 = vld [vmem:[#allocation20 + $0x7cc] ss:$16 sps:$4 sm:$0xff]  }
 0x9e6   :  { %3301 = vmatpush1.bf16.msra.mxu0 %v6573_v16  ;;  %3383 = vmatpush1.bf16.msra.mxu1 %v6576_v17  ;;  %v1646_v16 = vrot.slane %v7831_v32, %v7812_v11  ;;  %v6659_v17 = vld [vmem:[#allocation20 + $0x7c4] ss:$16 sps:$4 sm:$0xff]  }
 0x9e7   :  { %3332 = vmatprep.mubr.bf16.mxu0 %v2466_v21  ;;  %3414 = vmatprep.mubr.bf16.mxu1 %v2466_v21  ;;  %v6671_v32 = vld [vmem:[#allocation20 + $0x804] ss:$16 sps:$4 sm:$0xff]  }
 0x9e8   :  { %3302 = vmatprep.subr.bf16.mxu0 %v6581_v19  ;;  %3384 = vmatprep.subr.bf16.mxu1 %v6584_v20  ;;  %v6657_v19 = vld [vmem:[#allocation20 + $0x7c0] ss:$16 sps:$4 sm:$0xff]   ;;  %v6660_v20 = vld [vmem:[#allocation20 + $0x7c8] ss:$16 sps:$4 sm:$0xff]   ;;  %v6156_v21 = vadd.f32 %v7839_v57, %v1646_v16  ;;  %v6677_v57 = vld [vmem:[#allocation20 + $0x824] ss:$16 sps:$4 sm:$0xff]  }
 0x9e9   :  { %v6735_v16 = vld [vmem:[#allocation20 + $0x960] ss:$16 sps:$4 sm:$0xff]  }
 0x9ea   :  { %3303 = vmatpush1.bf16.msra.mxu0 %v6579_v22  ;;  %3385 = vmatpush1.bf16.msra.mxu1 %v6582_v5  ;;  %v6665_v22 = vld [vmem:[#allocation20 + $0x7e4] ss:$16 sps:$4 sm:$0xff]   ;;  %v6668_v5 = vld [vmem:[#allocation20 + $0x7ec] ss:$16 sps:$4 sm:$0xff]  }
 0x9eb   :  { %3304 = vmatprep.subr.bf16.mxu0 %v6587_v23  ;;  %3386 = vmatprep.subr.bf16.mxu1 %v6590_v24  ;;  %v6663_v23 = vld [vmem:[#allocation20 + $0x7e0] ss:$16 sps:$4 sm:$0xff]   ;;  %v6666_v24 = vld [vmem:[#allocation20 + $0x7e8] ss:$16 sps:$4 sm:$0xff]  }
 0x9ee   :  { %3305 = vmatpush1.bf16.msra.mxu0 %v6585_v1  ;;  %3387 = vmatpush1.bf16.msra.mxu1 %v6588_v27  ;;  %v2461_v1 = vmax.f32 %v6156_v21, 0.0  ;;  %v6674_v27 = vld [vmem:[#allocation20 + $0x80c] ss:$16 sps:$4 sm:$0xff]   ;;  %v6744_v21 = vld [vmem:[#allocation20 + $0x988] ss:$16 sps:$4 sm:$0xff]  }
 0x9ef   :  { %3306 = vmatprep.subr.bf16.mxu0 %v6593_v30  ;;  %3388 = vmatprep.subr.bf16.mxu1 %v6596_v31  ;;  %v6669_v30 = vld [vmem:[#allocation20 + $0x800] ss:$16 sps:$4 sm:$0xff]   ;;  %v6672_v31 = vld [vmem:[#allocation20 + $0x808] ss:$16 sps:$4 sm:$0xff]  }
 0x9f2   :  { %3307 = vmatpush1.bf16.msra.mxu0 %v6591_v33  ;;  %3389 = vmatpush1.bf16.msra.mxu1 %v6594_v34  ;;  %v2465_v33 = vpack.c.bf16 %v2461_v1, %v2461_v1  ;;  %v6680_v34 = vld [vmem:[#allocation20 + $0x82c] ss:$16 sps:$4 sm:$0xff]   ;;  %v6755_v1 = vld [vmem:[#allocation20 + $0x9c4] ss:$16 sps:$4 sm:$0xff]  }
 0x9f3   :  { %3308 = vmatprep.subr.bf16.mxu0 %v6599_v37  ;;  %3390 = vmatprep.subr.bf16.mxu1 %v6602_v38  ;;  %v6675_v37 = vld [vmem:[#allocation20 + $0x820] ss:$16 sps:$4 sm:$0xff]   ;;  %v6678_v38 = vld [vmem:[#allocation20 + $0x828] ss:$16 sps:$4 sm:$0xff]  }
 0x9f6   :  { %3309 = vmatpush1.bf16.msra.mxu0 %v6597_v35  ;;  %3391 = vmatpush1.bf16.msra.mxu1 %v6600_v41  ;;  %v6683_v35 = vld [vmem:[#allocation20 + $0x844] ss:$16 sps:$4 sm:$0xff]   ;;  %v6686_v41 = vld [vmem:[#allocation20 + $0x84c] ss:$16 sps:$4 sm:$0xff]  }
 0x9f7   :  { %3310 = vmatprep.subr.bf16.mxu0 %v6605_v25  ;;  %3392 = vmatprep.subr.bf16.mxu1 %v6608_v42  ;;  %v6681_v25 = vld [vmem:[#allocation20 + $0x840] ss:$16 sps:$4 sm:$0xff]   ;;  %v6684_v42 = vld [vmem:[#allocation20 + $0x848] ss:$16 sps:$4 sm:$0xff]  }
 0x9fa   :  { %3311 = vmatpush1.bf16.msra.mxu0 %v6603_v26  ;;  %3393 = vmatpush1.bf16.msra.mxu1 %v6606_v36  ;;  %v6689_v26 = vld [vmem:[#allocation20 + $0x864] ss:$16 sps:$4 sm:$0xff]   ;;  %v6692_v36 = vld [vmem:[#allocation20 + $0x86c] ss:$16 sps:$4 sm:$0xff]  }
 0x9fb   :  { %3312 = vmatprep.subr.bf16.mxu0 %v6611_v43  ;;  %3394 = vmatprep.subr.bf16.mxu1 %v6614_v28  ;;  %v6687_v43 = vld [vmem:[#allocation20 + $0x860] ss:$16 sps:$4 sm:$0xff]   ;;  %v6690_v28 = vld [vmem:[#allocation20 + $0x868] ss:$16 sps:$4 sm:$0xff]  }
 0x9fe   :  { %3313 = vmatpush1.bf16.msra.mxu0 %v6609_v29  ;;  %3395 = vmatpush1.bf16.msra.mxu1 %v6612_v44  ;;  %v6695_v29 = vld [vmem:[#allocation20 + $0x884] ss:$16 sps:$4 sm:$0xff]   ;;  %v6698_v44 = vld [vmem:[#allocation20 + $0x88c] ss:$16 sps:$4 sm:$0xff]  }
 0x9ff   :  { %3314 = vmatprep.subr.bf16.mxu0 %v6617_v45  ;;  %3396 = vmatprep.subr.bf16.mxu1 %v6620_v46  ;;  %v6693_v45 = vld [vmem:[#allocation20 + $0x880] ss:$16 sps:$4 sm:$0xff]   ;;  %v6696_v46 = vld [vmem:[#allocation20 + $0x888] ss:$16 sps:$4 sm:$0xff]  }
 0xa02   :  { %3315 = vmatpush1.bf16.msra.mxu0 %v6615_v39  ;;  %3397 = vmatpush1.bf16.msra.mxu1 %v6618_v47  ;;  %v6701_v39 = vld [vmem:[#allocation20 + $0x8a4] ss:$16 sps:$4 sm:$0xff]   ;;  %v6704_v47 = vld [vmem:[#allocation20 + $0x8ac] ss:$16 sps:$4 sm:$0xff]  }
 0xa03   :  { %3316 = vmatprep.subr.bf16.mxu0 %v6623_v48  ;;  %3398 = vmatprep.subr.bf16.mxu1 %v6626_v40  ;;  %v6699_v48 = vld [vmem:[#allocation20 + $0x8a0] ss:$16 sps:$4 sm:$0xff]   ;;  %v6702_v40 = vld [vmem:[#allocation20 + $0x8a8] ss:$16 sps:$4 sm:$0xff]  }
 0xa06   :  { %3317 = vmatpush1.bf16.msra.mxu0 %v6621_v49  ;;  %3399 = vmatpush1.bf16.msra.mxu1 %v6624_v50  ;;  %v6707_v49 = vld [vmem:[#allocation20 + $0x8c4] ss:$16 sps:$4 sm:$0xff]   ;;  %v6710_v50 = vld [vmem:[#allocation20 + $0x8cc] ss:$16 sps:$4 sm:$0xff]  }
 0xa07   :  { %3318 = vmatprep.subr.bf16.mxu0 %v6629_v51  ;;  %3400 = vmatprep.subr.bf16.mxu1 %v6632_v52  ;;  %v6705_v51 = vld [vmem:[#allocation20 + $0x8c0] ss:$16 sps:$4 sm:$0xff]   ;;  %v6708_v52 = vld [vmem:[#allocation20 + $0x8c8] ss:$16 sps:$4 sm:$0xff]  }
 0xa0a   :  { %3319 = vmatpush1.bf16.msra.mxu0 %v6627_v53  ;;  %3401 = vmatpush1.bf16.msra.mxu1 %v6630_v54  ;;  %v6713_v53 = vld [vmem:[#allocation20 + $0x8e4] ss:$16 sps:$4 sm:$0xff]   ;;  %v6716_v54 = vld [vmem:[#allocation20 + $0x8ec] ss:$16 sps:$4 sm:$0xff]  }
 0xa0b   :  { %3320 = vmatprep.subr.bf16.mxu0 %v6635_v55  ;;  %3402 = vmatprep.subr.bf16.mxu1 %v6638_v56  ;;  %v6711_v55 = vld [vmem:[#allocation20 + $0x8e0] ss:$16 sps:$4 sm:$0xff]   ;;  %v6714_v56 = vld [vmem:[#allocation20 + $0x8e8] ss:$16 sps:$4 sm:$0xff]  }
 0xa0e   :  { %3321 = vmatpush1.bf16.msra.mxu0 %v6633_v58  ;;  %3403 = vmatpush1.bf16.msra.mxu1 %v6636_v59  ;;  %v6719_v58 = vld [vmem:[#allocation20 + $0x904] ss:$16 sps:$4 sm:$0xff]   ;;  %v6722_v59 = vld [vmem:[#allocation20 + $0x90c] ss:$16 sps:$4 sm:$0xff]  }
 0xa0f   :  { %3322 = vmatprep.subr.bf16.mxu0 %v6641_v60  ;;  %3404 = vmatprep.subr.bf16.mxu1 %v6644_v61  ;;  %v6717_v60 = vld [vmem:[#allocation20 + $0x900] ss:$16 sps:$4 sm:$0xff]   ;;  %v6720_v61 = vld [vmem:[#allocation20 + $0x908] ss:$16 sps:$4 sm:$0xff]  }
 0xa12   :  { %3323 = vmatpush1.bf16.msra.mxu0 %v6639_v62  ;;  %3405 = vmatpush1.bf16.msra.mxu1 %v6642_v63  ;;  %v6725_v62 = vld [vmem:[#allocation20 + $0x924] ss:$16 sps:$4 sm:$0xff]   ;;  %v6728_v63 = vld [vmem:[#allocation20 + $0x92c] ss:$16 sps:$4 sm:$0xff]  }
 0xa13   :  { %3324 = vmatprep.subr.bf16.mxu0 %v6647_v0  ;;  %3406 = vmatprep.subr.bf16.mxu1 %v6650_v2  ;;  %v6723_v0 = vld [vmem:[#allocation20 + $0x920] ss:$16 sps:$4 sm:$0xff]   ;;  %v6726_v2 = vld [vmem:[#allocation20 + $0x928] ss:$16 sps:$4 sm:$0xff]  }
 0xa16   :  { %3325 = vmatpush1.bf16.msra.mxu0 %v6645_v3  ;;  %3407 = vmatpush1.bf16.msra.mxu1 %v6648_v4  ;;  %v6731_v3 = vld [vmem:[#allocation20 + $0x944] ss:$16 sps:$4 sm:$0xff]   ;;  %v6734_v4 = vld [vmem:[#allocation20 + $0x94c] ss:$16 sps:$4 sm:$0xff]  }
 0xa17   :  { %3326 = vmatprep.subr.bf16.mxu0 %v6653_v6  ;;  %3408 = vmatprep.subr.bf16.mxu1 %v6656_v7  ;;  %v6729_v6 = vld [vmem:[#allocation20 + $0x940] ss:$16 sps:$4 sm:$0xff]   ;;  %v6732_v7 = vld [vmem:[#allocation20 + $0x948] ss:$16 sps:$4 sm:$0xff]  }
 0xa1a   :  { %3327 = vmatpush1.bf16.msra.mxu0 %v6651_v12  ;;  %3409 = vmatpush1.bf16.msra.mxu1 %v6654_v15  ;;  %v6737_v12 = vld [vmem:[#allocation20 + $0x964] ss:$16 sps:$4 sm:$0xff]   ;;  %v6740_v15 = vld [vmem:[#allocation20 + $0x96c] ss:$16 sps:$4 sm:$0xff]  }
 0xa1b   :  { %3328 = vmatprep.subr.bf16.mxu0 %v6659_v17  ;;  %3410 = vmatprep.subr.bf16.mxu1 %v6662_v18  ;;  %v6738_v17 = vld [vmem:[#allocation20 + $0x968] ss:$16 sps:$4 sm:$0xff]   ;;  %v6743_v18 = vld [vmem:[#allocation20 + $0x984] ss:$16 sps:$4 sm:$0xff]  }
 0xa1e   :  { %3329 = vmatpush1.bf16.msra.mxu0 %v6657_v19  ;;  %3411 = vmatpush1.bf16.msra.mxu1 %v6660_v20  ;;  %v6746_v19 = vld [vmem:[#allocation20 + $0x98c] ss:$16 sps:$4 sm:$0xff]   ;;  %v6741_v20 = vld [vmem:[#allocation20 + $0x980] ss:$16 sps:$4 sm:$0xff]  }
 0xa1f   :  { %3330 = vmatprep.subr.bf16.mxu0 %v6665_v22  ;;  %3412 = vmatprep.subr.bf16.mxu1 %v6668_v5  ;;  %v6749_v22 = vld [vmem:[#allocation20 + $0x9a4] ss:$16 sps:$4 sm:$0xff]   ;;  %v6752_v5 = vld [vmem:[#allocation20 + $0x9ac] ss:$16 sps:$4 sm:$0xff]  }
 0xa22   :  { %3331 = vmatpush1.bf16.msra.mxu0 %v6663_v23  ;;  %3413 = vmatpush1.bf16.msra.mxu1 %v6666_v24  ;;  %v6747_v23 = vld [vmem:[#allocation20 + $0x9a0] ss:$16 sps:$4 sm:$0xff]   ;;  %v6750_v24 = vld [vmem:[#allocation20 + $0x9a8] ss:$16 sps:$4 sm:$0xff]  }
 0xa23   :  { %4223 = vmatprep.subr.bf16.mxu0 %v6671_v32  ;;  %4305 = vmatprep.subr.bf16.mxu1 %v6674_v27  ;;  %v6758_v32 = vld [vmem:[#allocation20 + $0x9cc] ss:$16 sps:$4 sm:$0xff]   ;;  %v6753_v27 = vld [vmem:[#allocation20 + $0x9c0] ss:$16 sps:$4 sm:$0xff]  }
 0xa25   :  { %3333 = vmatmul.mubr.bf16.vlgmr.msra.gmra.mrb[40].mxu0 %v2465_v33  ;;  %3415 = vmatmul.mubr.bf16.vlgmr.msra.gmra.mrb[44].mxu1 %v2465_v33  ;;  %v6764_v33 = vld [vmem:[#allocation20 + $0x9ec] ss:$16 sps:$4 sm:$0xff]  }
 0xa26   :  { %4224 = vmatpush1.bf16.msra.mxu0 %v6669_v30  ;;  %4306 = vmatpush1.bf16.msra.mxu1 %v6672_v31  ;;  %v6756_v30 = vld [vmem:[#allocation20 + $0x9c8] ss:$16 sps:$4 sm:$0xff]   ;;  %v6761_v31 = vld [vmem:[#allocation20 + $0x9e4] ss:$16 sps:$4 sm:$0xff]  }
 0xa27   :  { %4225 = vmatprep.subr.bf16.mxu0 %v6677_v57  ;;  %4307 = vmatprep.subr.bf16.mxu1 %v6680_v34  ;;  %v6759_v57 = vld [vmem:[#allocation20 + $0x9e0] ss:$16 sps:$4 sm:$0xff]   ;;  %v6762_v34 = vld [vmem:[#allocation20 + $0x9e8] ss:$16 sps:$4 sm:$0xff]  }
 0xa2a   :  { %4226 = vmatpush1.bf16.msra.mxu0 %v6675_v37  ;;  %4308 = vmatpush1.bf16.msra.mxu1 %v6678_v38  ;;  %v6767_v37 = vld [vmem:[#allocation20 + $0xa04] ss:$16 sps:$4 sm:$0xff]   ;;  %v6770_v38 = vld [vmem:[#allocation20 + $0xa0c] ss:$16 sps:$4 sm:$0xff]  }
 0xa2b   :  { %4227 = vmatprep.subr.bf16.mxu0 %v6683_v35  ;;  %4309 = vmatprep.subr.bf16.mxu1 %v6686_v41  ;;  %v7844_v35 = vld [vmem:[#allocation21 + $0x4] sm:$0xf] }
 0xa2c   :  { %v2602_v41 = vrot.slane %v7844_v35, %v7809_v10 }
 0xa2e   :  { %4228 = vmatpush1.bf16.msra.mxu0 %v6681_v25  ;;  %4310 = vmatpush1.bf16.msra.mxu1 %v6684_v42  ;;  %v2606_v25 = vrot.slane %v7844_v35, %v7815_v13  ;;  %v2614_v42 = vrot.slane %v7844_v35, %v7818_v14 }
 0xa2f   :  { %4229 = vmatprep.subr.bf16.mxu0 %v6689_v26  ;;  %4311 = vmatprep.subr.bf16.mxu1 %v6692_v36 }
 0xa32   :  { %4230 = vmatpush1.bf16.msra.mxu0 %v6687_v43  ;;  %4312 = vmatpush1.bf16.msra.mxu1 %v6690_v28 }
 0xa33   :  { %4231 = vmatprep.subr.bf16.mxu0 %v6695_v29  ;;  %4313 = vmatprep.subr.bf16.mxu1 %v6698_v44 }
 0xa36   :  { %4232 = vmatpush1.bf16.msra.mxu0 %v6693_v45  ;;  %4314 = vmatpush1.bf16.msra.mxu1 %v6696_v46 }
 0xa37   :  { %4233 = vmatprep.subr.bf16.mxu0 %v6701_v39  ;;  %4315 = vmatprep.subr.bf16.mxu1 %v6704_v47 }
 0xa3a   :  { %4234 = vmatpush1.bf16.msra.mxu0 %v6699_v48  ;;  %4316 = vmatpush1.bf16.msra.mxu1 %v6702_v40 }
 0xa3b   :  { %4235 = vmatprep.subr.bf16.mxu0 %v6707_v49  ;;  %4317 = vmatprep.subr.bf16.mxu1 %v6710_v50 }
 0xa3e   :  { %4236 = vmatpush1.bf16.msra.mxu0 %v6705_v51  ;;  %4318 = vmatpush1.bf16.msra.mxu1 %v6708_v52  ;;  %v6765_v52 = vld [vmem:[#allocation20 + $0xa00] ss:$16 sps:$4 sm:$0xff]  }
 0xa3f   :  { %4237 = vmatprep.subr.bf16.mxu0 %v6713_v53  ;;  %4319 = vmatprep.subr.bf16.mxu1 %v6716_v54  ;;  %v6768_v53 = vld [vmem:[#allocation20 + $0xa08] ss:$16 sps:$4 sm:$0xff]  }
 0xa42   :  { %4238 = vmatpush1.bf16.msra.mxu0 %v6711_v55  ;;  %4320 = vmatpush1.bf16.msra.mxu1 %v6714_v56  ;;  %v6773_v55 = vld [vmem:[#allocation20 + $0xa24] ss:$16 sps:$4 sm:$0xff]   ;;  %v6776_v56 = vld [vmem:[#allocation20 + $0xa2c] ss:$16 sps:$4 sm:$0xff]  }
 0xa43   :  { %4239 = vmatprep.subr.bf16.mxu0 %v6719_v58  ;;  %4321 = vmatprep.subr.bf16.mxu1 %v6722_v59  ;;  %v6771_v59 = vld [vmem:[#allocation20 + $0xa20] ss:$16 sps:$4 sm:$0xff]  }
 0xa46   :  { %4240 = vmatpush1.bf16.msra.mxu0 %v6717_v60  ;;  %4322 = vmatpush1.bf16.msra.mxu1 %v6720_v61  ;;  %v6774_v60 = vld [vmem:[#allocation20 + $0xa28] ss:$16 sps:$4 sm:$0xff]   ;;  %v6779_v61 = vld [vmem:[#allocation20 + $0xa44] ss:$16 sps:$4 sm:$0xff]  }
 0xa47   :  { %4241 = vmatprep.subr.bf16.mxu0 %v6725_v62  ;;  %4323 = vmatprep.subr.bf16.mxu1 %v6728_v63  ;;  %v6782_v62 = vld [vmem:[#allocation20 + $0xa4c] ss:$16 sps:$4 sm:$0xff]   ;;  %v6777_v63 = vld [vmem:[#allocation20 + $0xa40] ss:$16 sps:$4 sm:$0xff]  }
 0xa4a   :  { %4242 = vmatpush1.bf16.msra.mxu0 %v6723_v0  ;;  %4324 = vmatpush1.bf16.msra.mxu1 %v6726_v2  ;;  %v6780_v0 = vld [vmem:[#allocation20 + $0xa48] ss:$16 sps:$4 sm:$0xff]   ;;  %v6785_v2 = vld [vmem:[#allocation20 + $0xa64] ss:$16 sps:$4 sm:$0xff]  }
 0xa4b   :  { %4243 = vmatprep.subr.bf16.mxu0 %v6731_v3  ;;  %4325 = vmatprep.subr.bf16.mxu1 %v6734_v4  ;;  %v6788_v3 = vld [vmem:[#allocation20 + $0xa6c] ss:$16 sps:$4 sm:$0xff]   ;;  %v6783_v4 = vld [vmem:[#allocation20 + $0xa60] ss:$16 sps:$4 sm:$0xff]  }
 0xa4e   :  { %4244 = vmatpush1.bf16.msra.mxu0 %v6729_v6  ;;  %4326 = vmatpush1.bf16.msra.mxu1 %v6732_v7  ;;  %v6786_v6 = vld [vmem:[#allocation20 + $0xa68] ss:$16 sps:$4 sm:$0xff]   ;;  %v6791_v7 = vld [vmem:[#allocation20 + $0xa84] ss:$16 sps:$4 sm:$0xff]  }
 0xa4f   :  { %4245 = vmatprep.subr.bf16.mxu0 %v6737_v12  ;;  %4327 = vmatprep.subr.bf16.mxu1 %v6740_v15  ;;  %v6794_v12 = vld [vmem:[#allocation20 + $0xa8c] ss:$16 sps:$4 sm:$0xff]   ;;  %v6789_v15 = vld [vmem:[#allocation20 + $0xa80] ss:$16 sps:$4 sm:$0xff]  }
 0xa52   :  { %4246 = vmatpush1.bf16.msra.mxu0 %v6735_v16  ;;  %4328 = vmatpush1.bf16.msra.mxu1 %v6738_v17  ;;  %v6792_v16 = vld [vmem:[#allocation20 + $0xa88] ss:$16 sps:$4 sm:$0xff]   ;;  %v6797_v17 = vld [vmem:[#allocation20 + $0xaa4] ss:$16 sps:$4 sm:$0xff]  }
 0xa53   :  { %4247 = vmatprep.subr.bf16.mxu0 %v6743_v18  ;;  %4329 = vmatprep.subr.bf16.mxu1 %v6746_v19  ;;  %v6800_v18 = vld [vmem:[#allocation20 + $0xaac] ss:$16 sps:$4 sm:$0xff]   ;;  %v6795_v19 = vld [vmem:[#allocation20 + $0xaa0] ss:$16 sps:$4 sm:$0xff]  }
 0xa56   :  { %4248 = vmatpush1.bf16.msra.mxu0 %v6741_v20  ;;  %4330 = vmatpush1.bf16.msra.mxu1 %v6744_v21  ;;  %v6798_v20 = vld [vmem:[#allocation20 + $0xaa8] ss:$16 sps:$4 sm:$0xff]   ;;  %v6803_v21 = vld [vmem:[#allocation20 + $0xac4] ss:$16 sps:$4 sm:$0xff]  }
 0xa57   :  { %4249 = vmatprep.subr.bf16.mxu0 %v6749_v22  ;;  %4331 = vmatprep.subr.bf16.mxu1 %v6752_v5  ;;  %v6806_v22 = vld [vmem:[#allocation20 + $0xacc] ss:$16 sps:$4 sm:$0xff]   ;;  %v6801_v5 = vld [vmem:[#allocation20 + $0xac0] ss:$16 sps:$4 sm:$0xff]  }
 0xa5a   :  { %4250 = vmatpush1.bf16.msra.mxu0 %v6747_v23  ;;  %4332 = vmatpush1.bf16.msra.mxu1 %v6750_v24  ;;  %v6804_v23 = vld [vmem:[#allocation20 + $0xac8] ss:$16 sps:$4 sm:$0xff]   ;;  %v6809_v24 = vld [vmem:[#allocation20 + $0xae4] ss:$16 sps:$4 sm:$0xff]  }
 0xa5b   :  { %4251 = vmatprep.subr.bf16.mxu0 %v6755_v1  ;;  %4333 = vmatprep.subr.bf16.mxu1 %v6758_v32  ;;  %v6812_v1 = vld [vmem:[#allocation20 + $0xaec] ss:$16 sps:$4 sm:$0xff]   ;;  %v6807_v32 = vld [vmem:[#allocation20 + $0xae0] ss:$16 sps:$4 sm:$0xff]  }
 0xa5e   :  { %4252 = vmatpush1.bf16.msra.mxu0 %v6753_v27  ;;  %4334 = vmatpush1.bf16.msra.mxu1 %v6756_v30  ;;  %v6810_v27 = vld [vmem:[#allocation20 + $0xae8] ss:$16 sps:$4 sm:$0xff]   ;;  %v6815_v30 = vld [vmem:[#allocation20 + $0xb04] ss:$16 sps:$4 sm:$0xff]  }
 0xa5f   :  { %4253 = vmatprep.subr.bf16.mxu0 %v6761_v31  ;;  %4335 = vmatprep.subr.bf16.mxu1 %v6764_v33  ;;  %v6818_v31 = vld [vmem:[#allocation20 + $0xb0c] ss:$16 sps:$4 sm:$0xff]   ;;  %v6813_v33 = vld [vmem:[#allocation20 + $0xb00] ss:$16 sps:$4 sm:$0xff]  }
 0xa62   :  { %4254 = vmatpush1.bf16.msra.mxu0 %v6759_v57  ;;  %4336 = vmatpush1.bf16.msra.mxu1 %v6762_v34  ;;  %v6816_v57 = vld [vmem:[#allocation20 + $0xb08] ss:$16 sps:$4 sm:$0xff]   ;;  %v6821_v34 = vld [vmem:[#allocation20 + $0xb24] ss:$16 sps:$4 sm:$0xff]  }
 0xa63   :  { %4264 = vmatprep.subr.bf16.mxu0 %v6767_v37  ;;  %4346 = vmatprep.subr.bf16.mxu1 %v6770_v38  ;;  %v6824_v37 = vld [vmem:[#allocation20 + $0xb2c] ss:$16 sps:$4 sm:$0xff]   ;;  %v6819_v38 = vld [vmem:[#allocation20 + $0xb20] ss:$16 sps:$4 sm:$0xff]  }
 0xaf8   :  { %v3334_v26 = vpop.f32.mrb[40].mxu0  ;;  %v7852_v36 = vpop.f32.mrb[44].mxu1 }
 0xaf9   :  { %v6158_v43 = vadd.f32 %v3334_v26, %v2602_v41  ;;  %v3336_v28 = vpop.f32.mrb[41].mxu0  ;;  %v3418_v29 = vpop.f32.mrb[45].mxu1  ;;  %v6822_v41 = vld [vmem:[#allocation20 + $0xb28] ss:$16 sps:$4 sm:$0xff]   ;;  %v6825_v26 = vld [vmem:[#allocation20 + $0xb40] ss:$16 sps:$4 sm:$0xff]  }
 0xafa   :  { %v6159_v44 = vadd.f32 %v3336_v28, %v2606_v25  ;;  %v6161_v45 = vadd.f32 %v3418_v29, %v2614_v42  ;;  %v3338_v46 = vpop.f32.mrb[42].mxu0  ;;  %v3420_v39 = vpop.f32.mrb[46].mxu1  ;;  %v6827_v25 = vld [vmem:[#allocation20 + $0xb44] ss:$16 sps:$4 sm:$0xff]   ;;  %v6830_v42 = vld [vmem:[#allocation20 + $0xb4c] ss:$16 sps:$4 sm:$0xff]  }
 0xafb   :  { %v3423_v47 = vmax.f32 %v6158_v43, 0.0  ;;  %v3339_v48 = vpop.f32.mrb[43].mxu0  ;;  %v3421_v40 = vpop.f32.mrb[47].mxu1  ;;  %v6828_v43 = vld [vmem:[#allocation20 + $0xb48] ss:$16 sps:$4 sm:$0xff]  }
 0xafc   :  { %v3424_v49 = vmax.f32 %v6159_v44, 0.0  ;;  %v3426_v50 = vmax.f32 %v6161_v45, 0.0  ;;  %v6833_v28 = vld [vmem:[#allocation20 + $0xb64] ss:$16 sps:$4 sm:$0xff]   ;;  %v6836_v29 = vld [vmem:[#allocation20 + $0xb6c] ss:$16 sps:$4 sm:$0xff]  }
 0xafd   :  { %v3427_v54 = vpack.c.bf16 %v3423_v47, %v3423_v47  ;;  %v6831_v44 = vld [vmem:[#allocation20 + $0xb60] ss:$16 sps:$4 sm:$0xff]   ;;  %v6834_v45 = vld [vmem:[#allocation20 + $0xb68] ss:$16 sps:$4 sm:$0xff]   ;;  %v6839_v46 = vld [vmem:[#allocation20 + $0xb84] ss:$16 sps:$4 sm:$0xff]  }
 0xafe   :  { %v3428_v51 = vpack.c.bf16 %v3424_v49, %v3424_v49  ;;  %v3430_v58 = vpack.c.bf16 %v3426_v50, %v3426_v50  ;;  %v6842_v39 = vld [vmem:[#allocation20 + $0xb8c] ss:$16 sps:$4 sm:$0xff]   ;;  %v6837_v47 = vld [vmem:[#allocation20 + $0xb80] ss:$16 sps:$4 sm:$0xff]   ;;  %v6840_v48 = vld [vmem:[#allocation20 + $0xb88] ss:$16 sps:$4 sm:$0xff]  }
 0xaff   :  { %v6845_v40 = vld [vmem:[#allocation20 + $0xba4] ss:$16 sps:$4 sm:$0xff]   ;;  %v6848_v49 = vld [vmem:[#allocation20 + $0xbac] ss:$16 sps:$4 sm:$0xff]   ;;  %v6843_v50 = vld [vmem:[#allocation20 + $0xba0] ss:$16 sps:$4 sm:$0xff]  }
 0xb00   :  { %4255 = vmatprep.mubr.bf16.mxu0 %v3428_v51  ;;  %4337 = vmatprep.mubr.bf16.mxu1 %v3428_v51  ;;  %v6846_v51 = vld [vmem:[#allocation20 + $0xba8] ss:$16 sps:$4 sm:$0xff]  }
 0xb01   :  { %4256 = vmatmul.mubr.bf16.vlgmr.msra.gmra.mrb[44].mxu0 %v3427_v54  ;;  %4338 = vmatmul.mubr.bf16.vlgmr.msra.gmra.mrb[48].mxu1 %v3427_v54  ;;  %v6854_v54 = vld [vmem:[#allocation20 + $0xbcc] ss:$16 sps:$4 sm:$0xff]  }
 0xb02   :  { %4265 = vmatpush1.bf16.msra.mxu0 %v6765_v52  ;;  %4347 = vmatpush1.bf16.msra.mxu1 %v6768_v53  ;;  %v2610_v52 = vrot.slane %v7844_v35, %v7812_v11  ;;  %v6851_v53 = vld [vmem:[#allocation20 + $0xbc4] ss:$16 sps:$4 sm:$0xff]  }
 0xb03   :  { %4296 = vmatprep.mubr.bf16.mxu0 %v3430_v58  ;;  %4378 = vmatprep.mubr.bf16.mxu1 %v3430_v58  ;;  %v6863_v35 = vld [vmem:[#allocation20 + $0xc04] ss:$16 sps:$4 sm:$0xff]  }
 0xb04   :  { %4266 = vmatprep.subr.bf16.mxu0 %v6773_v55  ;;  %4348 = vmatprep.subr.bf16.mxu1 %v6776_v56  ;;  %v6849_v55 = vld [vmem:[#allocation20 + $0xbc0] ss:$16 sps:$4 sm:$0xff]   ;;  %v6852_v56 = vld [vmem:[#allocation20 + $0xbc8] ss:$16 sps:$4 sm:$0xff]   ;;  %v6160_v58 = vadd.f32 %v7852_v36, %v2610_v52  ;;  %v6869_v36 = vld [vmem:[#allocation20 + $0xc24] ss:$16 sps:$4 sm:$0xff]  }
 0xb05   :  { %v6927_v52 = vld [vmem:[#allocation20 + $0xd60] ss:$16 sps:$4 sm:$0xff]  }
 0xb06   :  { %4267 = vmatpush1.bf16.msra.mxu0 %v6771_v59  ;;  %4349 = vmatpush1.bf16.msra.mxu1 %v6774_v60  ;;  %v6857_v59 = vld [vmem:[#allocation20 + $0xbe4] ss:$16 sps:$4 sm:$0xff]   ;;  %v6860_v60 = vld [vmem:[#allocation20 + $0xbec] ss:$16 sps:$4 sm:$0xff]  }
 0xb07   :  { %4268 = vmatprep.subr.bf16.mxu0 %v6779_v61  ;;  %4350 = vmatprep.subr.bf16.mxu1 %v6782_v62  ;;  %v6855_v61 = vld [vmem:[#allocation20 + $0xbe0] ss:$16 sps:$4 sm:$0xff]   ;;  %v6858_v62 = vld [vmem:[#allocation20 + $0xbe8] ss:$16 sps:$4 sm:$0xff]  }
 0xb0a   :  { %4269 = vmatpush1.bf16.msra.mxu0 %v6777_v63  ;;  %4351 = vmatpush1.bf16.msra.mxu1 %v6780_v0  ;;  %v3425_v63 = vmax.f32 %v6160_v58, 0.0  ;;  %v6866_v0 = vld [vmem:[#allocation20 + $0xc0c] ss:$16 sps:$4 sm:$0xff]   ;;  %v6936_v58 = vld [vmem:[#allocation20 + $0xd88] ss:$16 sps:$4 sm:$0xff]  }
 0xb0b   :  { %4270 = vmatprep.subr.bf16.mxu0 %v6785_v2  ;;  %4352 = vmatprep.subr.bf16.mxu1 %v6788_v3  ;;  %v6861_v2 = vld [vmem:[#allocation20 + $0xc00] ss:$16 sps:$4 sm:$0xff]   ;;  %v6864_v3 = vld [vmem:[#allocation20 + $0xc08] ss:$16 sps:$4 sm:$0xff]  }
 0xb0e   :  { %4271 = vmatpush1.bf16.msra.mxu0 %v6783_v4  ;;  %4353 = vmatpush1.bf16.msra.mxu1 %v6786_v6  ;;  %v3429_v4 = vpack.c.bf16 %v3425_v63, %v3425_v63  ;;  %v6872_v6 = vld [vmem:[#allocation20 + $0xc2c] ss:$16 sps:$4 sm:$0xff]   ;;  %v6947_v63 = vld [vmem:[#allocation20 + $0xdc4] ss:$16 sps:$4 sm:$0xff]  }
 0xb0f   :  { %4272 = vmatprep.subr.bf16.mxu0 %v6791_v7  ;;  %4354 = vmatprep.subr.bf16.mxu1 %v6794_v12  ;;  %v6867_v7 = vld [vmem:[#allocation20 + $0xc20] ss:$16 sps:$4 sm:$0xff]   ;;  %v6870_v12 = vld [vmem:[#allocation20 + $0xc28] ss:$16 sps:$4 sm:$0xff]  }
 0xb12   :  { %4273 = vmatpush1.bf16.msra.mxu0 %v6789_v15  ;;  %4355 = vmatpush1.bf16.msra.mxu1 %v6792_v16  ;;  %v6875_v15 = vld [vmem:[#allocation20 + $0xc44] ss:$16 sps:$4 sm:$0xff]   ;;  %v6878_v16 = vld [vmem:[#allocation20 + $0xc4c] ss:$16 sps:$4 sm:$0xff]  }
 0xb13   :  { %4274 = vmatprep.subr.bf16.mxu0 %v6797_v17  ;;  %4356 = vmatprep.subr.bf16.mxu1 %v6800_v18  ;;  %v6873_v17 = vld [vmem:[#allocation20 + $0xc40] ss:$16 sps:$4 sm:$0xff]   ;;  %v6876_v18 = vld [vmem:[#allocation20 + $0xc48] ss:$16 sps:$4 sm:$0xff]  }
 0xb16   :  { %4275 = vmatpush1.bf16.msra.mxu0 %v6795_v19  ;;  %4357 = vmatpush1.bf16.msra.mxu1 %v6798_v20  ;;  %v6881_v19 = vld [vmem:[#allocation20 + $0xc64] ss:$16 sps:$4 sm:$0xff]   ;;  %v6884_v20 = vld [vmem:[#allocation20 + $0xc6c] ss:$16 sps:$4 sm:$0xff]  }
 0xb17   :  { %4276 = vmatprep.subr.bf16.mxu0 %v6803_v21  ;;  %4358 = vmatprep.subr.bf16.mxu1 %v6806_v22  ;;  %v6879_v21 = vld [vmem:[#allocation20 + $0xc60] ss:$16 sps:$4 sm:$0xff]   ;;  %v6882_v22 = vld [vmem:[#allocation20 + $0xc68] ss:$16 sps:$4 sm:$0xff]  }
 0xb1a   :  { %4277 = vmatpush1.bf16.msra.mxu0 %v6801_v5  ;;  %4359 = vmatpush1.bf16.msra.mxu1 %v6804_v23  ;;  %v6887_v5 = vld [vmem:[#allocation20 + $0xc84] ss:$16 sps:$4 sm:$0xff]   ;;  %v6890_v23 = vld [vmem:[#allocation20 + $0xc8c] ss:$16 sps:$4 sm:$0xff]  }
 0xb1b   :  { %4278 = vmatprep.subr.bf16.mxu0 %v6809_v24  ;;  %4360 = vmatprep.subr.bf16.mxu1 %v6812_v1  ;;  %v6885_v24 = vld [vmem:[#allocation20 + $0xc80] ss:$16 sps:$4 sm:$0xff]   ;;  %v6888_v1 = vld [vmem:[#allocation20 + $0xc88] ss:$16 sps:$4 sm:$0xff]  }
 0xb1e   :  { %4279 = vmatpush1.bf16.msra.mxu0 %v6807_v32  ;;  %4361 = vmatpush1.bf16.msra.mxu1 %v6810_v27  ;;  %v6893_v32 = vld [vmem:[#allocation20 + $0xca4] ss:$16 sps:$4 sm:$0xff]   ;;  %v6896_v27 = vld [vmem:[#allocation20 + $0xcac] ss:$16 sps:$4 sm:$0xff]  }
 0xb1f   :  { %4280 = vmatprep.subr.bf16.mxu0 %v6815_v30  ;;  %4362 = vmatprep.subr.bf16.mxu1 %v6818_v31  ;;  %v6891_v30 = vld [vmem:[#allocation20 + $0xca0] ss:$16 sps:$4 sm:$0xff]   ;;  %v6894_v31 = vld [vmem:[#allocation20 + $0xca8] ss:$16 sps:$4 sm:$0xff]  }
 0xb22   :  { %4281 = vmatpush1.bf16.msra.mxu0 %v6813_v33  ;;  %4363 = vmatpush1.bf16.msra.mxu1 %v6816_v57  ;;  %v6899_v33 = vld [vmem:[#allocation20 + $0xcc4] ss:$16 sps:$4 sm:$0xff]   ;;  %v6902_v57 = vld [vmem:[#allocation20 + $0xccc] ss:$16 sps:$4 sm:$0xff]  }
 0xb23   :  { %4282 = vmatprep.subr.bf16.mxu0 %v6821_v34  ;;  %4364 = vmatprep.subr.bf16.mxu1 %v6824_v37  ;;  %v6897_v34 = vld [vmem:[#allocation20 + $0xcc0] ss:$16 sps:$4 sm:$0xff]   ;;  %v6900_v37 = vld [vmem:[#allocation20 + $0xcc8] ss:$16 sps:$4 sm:$0xff]  }
 0xb26   :  { %4283 = vmatpush1.bf16.msra.mxu0 %v6819_v38  ;;  %4365 = vmatpush1.bf16.msra.mxu1 %v6822_v41  ;;  %v6905_v38 = vld [vmem:[#allocation20 + $0xce4] ss:$16 sps:$4 sm:$0xff]   ;;  %v6908_v41 = vld [vmem:[#allocation20 + $0xcec] ss:$16 sps:$4 sm:$0xff]  }
 0xb27   :  { %4284 = vmatprep.subr.bf16.mxu0 %v6827_v25  ;;  %4366 = vmatprep.subr.bf16.mxu1 %v6830_v42  ;;  %v6903_v25 = vld [vmem:[#allocation20 + $0xce0] ss:$16 sps:$4 sm:$0xff]   ;;  %v6906_v42 = vld [vmem:[#allocation20 + $0xce8] ss:$16 sps:$4 sm:$0xff]  }
 0xb2a   :  { %4285 = vmatpush1.bf16.msra.mxu0 %v6825_v26  ;;  %4367 = vmatpush1.bf16.msra.mxu1 %v6828_v43  ;;  %v6911_v26 = vld [vmem:[#allocation20 + $0xd04] ss:$16 sps:$4 sm:$0xff]   ;;  %v6914_v43 = vld [vmem:[#allocation20 + $0xd0c] ss:$16 sps:$4 sm:$0xff]  }
 0xb2b   :  { %4286 = vmatprep.subr.bf16.mxu0 %v6833_v28  ;;  %4368 = vmatprep.subr.bf16.mxu1 %v6836_v29  ;;  %v6909_v28 = vld [vmem:[#allocation20 + $0xd00] ss:$16 sps:$4 sm:$0xff]   ;;  %v6912_v29 = vld [vmem:[#allocation20 + $0xd08] ss:$16 sps:$4 sm:$0xff]  }
 0xb2e   :  { %4287 = vmatpush1.bf16.msra.mxu0 %v6831_v44  ;;  %4369 = vmatpush1.bf16.msra.mxu1 %v6834_v45  ;;  %v6917_v44 = vld [vmem:[#allocation20 + $0xd24] ss:$16 sps:$4 sm:$0xff]   ;;  %v6920_v45 = vld [vmem:[#allocation20 + $0xd2c] ss:$16 sps:$4 sm:$0xff]  }
 0xb2f   :  { %4288 = vmatprep.subr.bf16.mxu0 %v6839_v46  ;;  %4370 = vmatprep.subr.bf16.mxu1 %v6842_v39  ;;  %v6915_v46 = vld [vmem:[#allocation20 + $0xd20] ss:$16 sps:$4 sm:$0xff]   ;;  %v6918_v39 = vld [vmem:[#allocation20 + $0xd28] ss:$16 sps:$4 sm:$0xff]  }
 0xb32   :  { %4289 = vmatpush1.bf16.msra.mxu0 %v6837_v47  ;;  %4371 = vmatpush1.bf16.msra.mxu1 %v6840_v48  ;;  %v6923_v47 = vld [vmem:[#allocation20 + $0xd44] ss:$16 sps:$4 sm:$0xff]   ;;  %v6926_v48 = vld [vmem:[#allocation20 + $0xd4c] ss:$16 sps:$4 sm:$0xff]  }
 0xb33   :  { %4290 = vmatprep.subr.bf16.mxu0 %v6845_v40  ;;  %4372 = vmatprep.subr.bf16.mxu1 %v6848_v49  ;;  %v6921_v40 = vld [vmem:[#allocation20 + $0xd40] ss:$16 sps:$4 sm:$0xff]   ;;  %v6924_v49 = vld [vmem:[#allocation20 + $0xd48] ss:$16 sps:$4 sm:$0xff]  }
 0xb36   :  { %4291 = vmatpush1.bf16.msra.mxu0 %v6843_v50  ;;  %4373 = vmatpush1.bf16.msra.mxu1 %v6846_v51  ;;  %v6929_v50 = vld [vmem:[#allocation20 + $0xd64] ss:$16 sps:$4 sm:$0xff]   ;;  %v6932_v51 = vld [vmem:[#allocation20 + $0xd6c] ss:$16 sps:$4 sm:$0xff]  }
 0xb37   :  { %4292 = vmatprep.subr.bf16.mxu0 %v6851_v53  ;;  %4374 = vmatprep.subr.bf16.mxu1 %v6854_v54  ;;  %v6930_v53 = vld [vmem:[#allocation20 + $0xd68] ss:$16 sps:$4 sm:$0xff]   ;;  %v6935_v54 = vld [vmem:[#allocation20 + $0xd84] ss:$16 sps:$4 sm:$0xff]  }
 0xb3a   :  { %4293 = vmatpush1.bf16.msra.mxu0 %v6849_v55  ;;  %4375 = vmatpush1.bf16.msra.mxu1 %v6852_v56  ;;  %v6938_v55 = vld [vmem:[#allocation20 + $0xd8c] ss:$16 sps:$4 sm:$0xff]   ;;  %v6933_v56 = vld [vmem:[#allocation20 + $0xd80] ss:$16 sps:$4 sm:$0xff]  }
 0xb3b   :  { %4294 = vmatprep.subr.bf16.mxu0 %v6857_v59  ;;  %4376 = vmatprep.subr.bf16.mxu1 %v6860_v60  ;;  %v6941_v59 = vld [vmem:[#allocation20 + $0xda4] ss:$16 sps:$4 sm:$0xff]   ;;  %v6944_v60 = vld [vmem:[#allocation20 + $0xdac] ss:$16 sps:$4 sm:$0xff]  }
 0xb3e   :  { %4295 = vmatpush1.bf16.msra.mxu0 %v6855_v61  ;;  %4377 = vmatpush1.bf16.msra.mxu1 %v6858_v62  ;;  %v6939_v61 = vld [vmem:[#allocation20 + $0xda0] ss:$16 sps:$4 sm:$0xff]   ;;  %v6942_v62 = vld [vmem:[#allocation20 + $0xda8] ss:$16 sps:$4 sm:$0xff]  }
 0xb3f   :  { %5187 = vmatprep.subr.bf16.mxu0 %v6863_v35  ;;  %5269 = vmatprep.subr.bf16.mxu1 %v6866_v0  ;;  %v6950_v35 = vld [vmem:[#allocation20 + $0xdcc] ss:$16 sps:$4 sm:$0xff]   ;;  %v6945_v0 = vld [vmem:[#allocation20 + $0xdc0] ss:$16 sps:$4 sm:$0xff]  }
 0xb41   :  { %4297 = vmatmul.mubr.bf16.vlgmr.msra.gmra.mrb[44].mxu0 %v3429_v4  ;;  %4379 = vmatmul.mubr.bf16.vlgmr.msra.gmra.mrb[48].mxu1 %v3429_v4  ;;  %v6956_v4 = vld [vmem:[#allocation20 + $0xdec] ss:$16 sps:$4 sm:$0xff]  }
 0xb42   :  { %5188 = vmatpush1.bf16.msra.mxu0 %v6861_v2  ;;  %5270 = vmatpush1.bf16.msra.mxu1 %v6864_v3  ;;  %v6948_v2 = vld [vmem:[#allocation20 + $0xdc8] ss:$16 sps:$4 sm:$0xff]   ;;  %v6953_v3 = vld [vmem:[#allocation20 + $0xde4] ss:$16 sps:$4 sm:$0xff]  }
 0xb43   :  { %5189 = vmatprep.subr.bf16.mxu0 %v6869_v36  ;;  %5271 = vmatprep.subr.bf16.mxu1 %v6872_v6  ;;  %v6951_v36 = vld [vmem:[#allocation20 + $0xde0] ss:$16 sps:$4 sm:$0xff]   ;;  %v6954_v6 = vld [vmem:[#allocation20 + $0xde8] ss:$16 sps:$4 sm:$0xff]  }
 0xb46   :  { %5190 = vmatpush1.bf16.msra.mxu0 %v6867_v7  ;;  %5272 = vmatpush1.bf16.msra.mxu1 %v6870_v12  ;;  %v6959_v7 = vld [vmem:[#allocation20 + $0xe04] ss:$16 sps:$4 sm:$0xff]   ;;  %v6962_v12 = vld [vmem:[#allocation20 + $0xe0c] ss:$16 sps:$4 sm:$0xff]  }
 0xb47   :  { %5191 = vmatprep.subr.bf16.mxu0 %v6875_v15  ;;  %5273 = vmatprep.subr.bf16.mxu1 %v6878_v16  ;;  %v7857_v15 = vld [vmem:[#allocation21 + $0x8] sm:$0xf] }
 0xb48   :  { %v3566_v16 = vrot.slane %v7857_v15, %v7809_v10 }
 0xb4a   :  { %5192 = vmatpush1.bf16.msra.mxu0 %v6873_v17  ;;  %5274 = vmatpush1.bf16.msra.mxu1 %v6876_v18  ;;  %v3570_v17 = vrot.slane %v7857_v15, %v7815_v13  ;;  %v3578_v18 = vrot.slane %v7857_v15, %v7818_v14 }
 0xb4b   :  { %5193 = vmatprep.subr.bf16.mxu0 %v6881_v19  ;;  %5275 = vmatprep.subr.bf16.mxu1 %v6884_v20 }
 0xb4e   :  { %5194 = vmatpush1.bf16.msra.mxu0 %v6879_v21  ;;  %5276 = vmatpush1.bf16.msra.mxu1 %v6882_v22 }
 0xb4f   :  { %5195 = vmatprep.subr.bf16.mxu0 %v6887_v5  ;;  %5277 = vmatprep.subr.bf16.mxu1 %v6890_v23 }
 0xb52   :  { %5196 = vmatpush1.bf16.msra.mxu0 %v6885_v24  ;;  %5278 = vmatpush1.bf16.msra.mxu1 %v6888_v1 }
 0xb53   :  { %5197 = vmatprep.subr.bf16.mxu0 %v6893_v32  ;;  %5279 = vmatprep.subr.bf16.mxu1 %v6896_v27 }
 0xb56   :  { %5198 = vmatpush1.bf16.msra.mxu0 %v6891_v30  ;;  %5280 = vmatpush1.bf16.msra.mxu1 %v6894_v31 }
 0xb57   :  { %5199 = vmatprep.subr.bf16.mxu0 %v6899_v33  ;;  %5281 = vmatprep.subr.bf16.mxu1 %v6902_v57 }
 0xb5a   :  { %5200 = vmatpush1.bf16.msra.mxu0 %v6897_v34  ;;  %5282 = vmatpush1.bf16.msra.mxu1 %v6900_v37  ;;  %v6957_v37 = vld [vmem:[#allocation20 + $0xe00] ss:$16 sps:$4 sm:$0xff]  }
 0xb5b   :  { %5201 = vmatprep.subr.bf16.mxu0 %v6905_v38  ;;  %5283 = vmatprep.subr.bf16.mxu1 %v6908_v41  ;;  %v6960_v38 = vld [vmem:[#allocation20 + $0xe08] ss:$16 sps:$4 sm:$0xff]  }
 0xb5e   :  { %5202 = vmatpush1.bf16.msra.mxu0 %v6903_v25  ;;  %5284 = vmatpush1.bf16.msra.mxu1 %v6906_v42  ;;  %v6965_v25 = vld [vmem:[#allocation20 + $0xe24] ss:$16 sps:$4 sm:$0xff]   ;;  %v6968_v42 = vld [vmem:[#allocation20 + $0xe2c] ss:$16 sps:$4 sm:$0xff]  }
 0xb5f   :  { %5203 = vmatprep.subr.bf16.mxu0 %v6911_v26  ;;  %5285 = vmatprep.subr.bf16.mxu1 %v6914_v43  ;;  %v6963_v43 = vld [vmem:[#allocation20 + $0xe20] ss:$16 sps:$4 sm:$0xff]  }
 0xb62   :  { %5204 = vmatpush1.bf16.msra.mxu0 %v6909_v28  ;;  %5286 = vmatpush1.bf16.msra.mxu1 %v6912_v29  ;;  %v6966_v28 = vld [vmem:[#allocation20 + $0xe28] ss:$16 sps:$4 sm:$0xff]   ;;  %v6971_v29 = vld [vmem:[#allocation20 + $0xe44] ss:$16 sps:$4 sm:$0xff]  }
 0xb63   :  { %5205 = vmatprep.subr.bf16.mxu0 %v6917_v44  ;;  %5287 = vmatprep.subr.bf16.mxu1 %v6920_v45  ;;  %v6974_v44 = vld [vmem:[#allocation20 + $0xe4c] ss:$16 sps:$4 sm:$0xff]   ;;  %v6969_v45 = vld [vmem:[#allocation20 + $0xe40] ss:$16 sps:$4 sm:$0xff]  }
 0xb66   :  { %5206 = vmatpush1.bf16.msra.mxu0 %v6915_v46  ;;  %5288 = vmatpush1.bf16.msra.mxu1 %v6918_v39  ;;  %v6972_v46 = vld [vmem:[#allocation20 + $0xe48] ss:$16 sps:$4 sm:$0xff]   ;;  %v6977_v39 = vld [vmem:[#allocation20 + $0xe64] ss:$16 sps:$4 sm:$0xff]  }
 0xb67   :  { %5207 = vmatprep.subr.bf16.mxu0 %v6923_v47  ;;  %5289 = vmatprep.subr.bf16.mxu1 %v6926_v48  ;;  %v6980_v47 = vld [vmem:[#allocation20 + $0xe6c] ss:$16 sps:$4 sm:$0xff]   ;;  %v6975_v48 = vld [vmem:[#allocation20 + $0xe60] ss:$16 sps:$4 sm:$0xff]  }
 0xb6a   :  { %5208 = vmatpush1.bf16.msra.mxu0 %v6921_v40  ;;  %5290 = vmatpush1.bf16.msra.mxu1 %v6924_v49  ;;  %v6978_v40 = vld [vmem:[#allocation20 + $0xe68] ss:$16 sps:$4 sm:$0xff]   ;;  %v6983_v49 = vld [vmem:[#allocation20 + $0xe84] ss:$16 sps:$4 sm:$0xff]  }
 0xb6b   :  { %5209 = vmatprep.subr.bf16.mxu0 %v6929_v50  ;;  %5291 = vmatprep.subr.bf16.mxu1 %v6932_v51  ;;  %v6986_v50 = vld [vmem:[#allocation20 + $0xe8c] ss:$16 sps:$4 sm:$0xff]   ;;  %v6981_v51 = vld [vmem:[#allocation20 + $0xe80] ss:$16 sps:$4 sm:$0xff]  }
 0xb6e   :  { %5210 = vmatpush1.bf16.msra.mxu0 %v6927_v52  ;;  %5292 = vmatpush1.bf16.msra.mxu1 %v6930_v53  ;;  %v6984_v52 = vld [vmem:[#allocation20 + $0xe88] ss:$16 sps:$4 sm:$0xff]   ;;  %v6989_v53 = vld [vmem:[#allocation20 + $0xea4] ss:$16 sps:$4 sm:$0xff]  }
 0xb6f   :  { %5211 = vmatprep.subr.bf16.mxu0 %v6935_v54  ;;  %5293 = vmatprep.subr.bf16.mxu1 %v6938_v55  ;;  %v6992_v54 = vld [vmem:[#allocation20 + $0xeac] ss:$16 sps:$4 sm:$0xff]   ;;  %v6987_v55 = vld [vmem:[#allocation20 + $0xea0] ss:$16 sps:$4 sm:$0xff]  }
 0xb72   :  { %5212 = vmatpush1.bf16.msra.mxu0 %v6933_v56  ;;  %5294 = vmatpush1.bf16.msra.mxu1 %v6936_v58  ;;  %v6990_v56 = vld [vmem:[#allocation20 + $0xea8] ss:$16 sps:$4 sm:$0xff]   ;;  %v6995_v58 = vld [vmem:[#allocation20 + $0xec4] ss:$16 sps:$4 sm:$0xff]  }
 0xb73   :  { %5213 = vmatprep.subr.bf16.mxu0 %v6941_v59  ;;  %5295 = vmatprep.subr.bf16.mxu1 %v6944_v60  ;;  %v6998_v59 = vld [vmem:[#allocation20 + $0xecc] ss:$16 sps:$4 sm:$0xff]   ;;  %v6993_v60 = vld [vmem:[#allocation20 + $0xec0] ss:$16 sps:$4 sm:$0xff]  }
 0xb76   :  { %5214 = vmatpush1.bf16.msra.mxu0 %v6939_v61  ;;  %5296 = vmatpush1.bf16.msra.mxu1 %v6942_v62  ;;  %v6996_v61 = vld [vmem:[#allocation20 + $0xec8] ss:$16 sps:$4 sm:$0xff]   ;;  %v7001_v62 = vld [vmem:[#allocation20 + $0xee4] ss:$16 sps:$4 sm:$0xff]  }
 0xb77   :  { %5215 = vmatprep.subr.bf16.mxu0 %v6947_v63  ;;  %5297 = vmatprep.subr.bf16.mxu1 %v6950_v35  ;;  %v7004_v63 = vld [vmem:[#allocation20 + $0xeec] ss:$16 sps:$4 sm:$0xff]   ;;  %v6999_v35 = vld [vmem:[#allocation20 + $0xee0] ss:$16 sps:$4 sm:$0xff]  }
 0xb7a   :  { %5216 = vmatpush1.bf16.msra.mxu0 %v6945_v0  ;;  %5298 = vmatpush1.bf16.msra.mxu1 %v6948_v2  ;;  %v7002_v0 = vld [vmem:[#allocation20 + $0xee8] ss:$16 sps:$4 sm:$0xff]   ;;  %v7007_v2 = vld [vmem:[#allocation20 + $0xf04] ss:$16 sps:$4 sm:$0xff]  }
 0xb7b   :  { %5217 = vmatprep.subr.bf16.mxu0 %v6953_v3  ;;  %5299 = vmatprep.subr.bf16.mxu1 %v6956_v4  ;;  %v7010_v3 = vld [vmem:[#allocation20 + $0xf0c] ss:$16 sps:$4 sm:$0xff]   ;;  %v7005_v4 = vld [vmem:[#allocation20 + $0xf00] ss:$16 sps:$4 sm:$0xff]  }
 0xb7e   :  { %5218 = vmatpush1.bf16.msra.mxu0 %v6951_v36  ;;  %5300 = vmatpush1.bf16.msra.mxu1 %v6954_v6  ;;  %v7008_v36 = vld [vmem:[#allocation20 + $0xf08] ss:$16 sps:$4 sm:$0xff]   ;;  %v7013_v6 = vld [vmem:[#allocation20 + $0xf24] ss:$16 sps:$4 sm:$0xff]  }
 0xb7f   :  { %5228 = vmatprep.subr.bf16.mxu0 %v6959_v7  ;;  %5310 = vmatprep.subr.bf16.mxu1 %v6962_v12  ;;  %v7016_v7 = vld [vmem:[#allocation20 + $0xf2c] ss:$16 sps:$4 sm:$0xff]   ;;  %v7011_v12 = vld [vmem:[#allocation20 + $0xf20] ss:$16 sps:$4 sm:$0xff]  }
 0xc14   :  { %v4298_v19 = vpop.f32.mrb[44].mxu0  ;;  %v7865_v20 = vpop.f32.mrb[48].mxu1 }
 0xc15   :  { %v6162_v21 = vadd.f32 %v4298_v19, %v3566_v16  ;;  %v4300_v22 = vpop.f32.mrb[45].mxu0  ;;  %v4382_v5 = vpop.f32.mrb[49].mxu1  ;;  %v7014_v16 = vld [vmem:[#allocation20 + $0xf28] ss:$16 sps:$4 sm:$0xff]   ;;  %v7017_v19 = vld [vmem:[#allocation20 + $0xf40] ss:$16 sps:$4 sm:$0xff]  }
 0xc16   :  { %v6163_v23 = vadd.f32 %v4300_v22, %v3570_v17  ;;  %v6165_v24 = vadd.f32 %v4382_v5, %v3578_v18  ;;  %v4302_v1 = vpop.f32.mrb[46].mxu0  ;;  %v4384_v32 = vpop.f32.mrb[50].mxu1  ;;  %v7019_v17 = vld [vmem:[#allocation20 + $0xf44] ss:$16 sps:$4 sm:$0xff]   ;;  %v7022_v18 = vld [vmem:[#allocation20 + $0xf4c] ss:$16 sps:$4 sm:$0xff]  }
 0xc17   :  { %v4387_v27 = vmax.f32 %v6162_v21, 0.0  ;;  %v4303_v30 = vpop.f32.mrb[47].mxu0  ;;  %v4385_v31 = vpop.f32.mrb[51].mxu1  ;;  %v7020_v21 = vld [vmem:[#allocation20 + $0xf48] ss:$16 sps:$4 sm:$0xff]  }
 0xc18   :  { %v4388_v33 = vmax.f32 %v6163_v23, 0.0  ;;  %v4390_v57 = vmax.f32 %v6165_v24, 0.0  ;;  %v7025_v22 = vld [vmem:[#allocation20 + $0xf64] ss:$16 sps:$4 sm:$0xff]   ;;  %v7028_v5 = vld [vmem:[#allocation20 + $0xf6c] ss:$16 sps:$4 sm:$0xff]  }
 0xc19   :  { %v4391_v41 = vpack.c.bf16 %v4387_v27, %v4387_v27  ;;  %v7023_v23 = vld [vmem:[#allocation20 + $0xf60] ss:$16 sps:$4 sm:$0xff]   ;;  %v7026_v24 = vld [vmem:[#allocation20 + $0xf68] ss:$16 sps:$4 sm:$0xff]   ;;  %v7031_v1 = vld [vmem:[#allocation20 + $0xf84] ss:$16 sps:$4 sm:$0xff]  }
 0xc1a   :  { %v4392_v34 = vpack.c.bf16 %v4388_v33, %v4388_v33  ;;  %v4394_v26 = vpack.c.bf16 %v4390_v57, %v4390_v57  ;;  %v7034_v32 = vld [vmem:[#allocation20 + $0xf8c] ss:$16 sps:$4 sm:$0xff]   ;;  %v7029_v27 = vld [vmem:[#allocation20 + $0xf80] ss:$16 sps:$4 sm:$0xff]   ;;  %v7032_v30 = vld [vmem:[#allocation20 + $0xf88] ss:$16 sps:$4 sm:$0xff]  }
 0xc1b   :  { %v7037_v31 = vld [vmem:[#allocation20 + $0xfa4] ss:$16 sps:$4 sm:$0xff]   ;;  %v7040_v33 = vld [vmem:[#allocation20 + $0xfac] ss:$16 sps:$4 sm:$0xff]   ;;  %v7035_v57 = vld [vmem:[#allocation20 + $0xfa0] ss:$16 sps:$4 sm:$0xff]  }
 0xc1c   :  { %5219 = vmatprep.mubr.bf16.mxu0 %v4392_v34  ;;  %5301 = vmatprep.mubr.bf16.mxu1 %v4392_v34  ;;  %v7038_v34 = vld [vmem:[#allocation20 + $0xfa8] ss:$16 sps:$4 sm:$0xff]  }
 0xc1d   :  { %5220 = vmatmul.mubr.bf16.vlgmr.msra.gmra.mrb[48].mxu0 %v4391_v41  ;;  %5302 = vmatmul.mubr.bf16.vlgmr.msra.gmra.mrb[52].mxu1 %v4391_v41  ;;  %v7046_v41 = vld [vmem:[#allocation20 + $0xfcc] ss:$16 sps:$4 sm:$0xff]  }
 0xc1e   :  { %5229 = vmatpush1.bf16.msra.mxu0 %v6957_v37  ;;  %5311 = vmatpush1.bf16.msra.mxu1 %v6960_v38  ;;  %v3574_v37 = vrot.slane %v7857_v15, %v7812_v11  ;;  %v7043_v38 = vld [vmem:[#allocation20 + $0xfc4] ss:$16 sps:$4 sm:$0xff]  }
 0xc1f   :  { %5260 = vmatprep.mubr.bf16.mxu0 %v4394_v26  ;;  %5342 = vmatprep.mubr.bf16.mxu1 %v4394_v26 }
 0xc20   :  { %5230 = vmatprep.subr.bf16.mxu0 %v6965_v25  ;;  %5312 = vmatprep.subr.bf16.mxu1 %v6968_v42  ;;  %v7041_v25 = vld [vmem:[#allocation20 + $0xfc0] ss:$16 sps:$4 sm:$0xff]   ;;  %v7044_v42 = vld [vmem:[#allocation20 + $0xfc8] ss:$16 sps:$4 sm:$0xff]   ;;  %v6164_v26 = vadd.f32 %v7865_v20, %v3574_v37 }
 0xc22   :  { %5231 = vmatpush1.bf16.msra.mxu0 %v6963_v43  ;;  %5313 = vmatpush1.bf16.msra.mxu1 %v6966_v28  ;;  %v7049_v43 = vld [vmem:[#allocation20 + $0xfe4] ss:$16 sps:$4 sm:$0xff]   ;;  %v7052_v28 = vld [vmem:[#allocation20 + $0xfec] ss:$16 sps:$4 sm:$0xff]  }
 0xc23   :  { %5232 = vmatprep.subr.bf16.mxu0 %v6971_v29  ;;  %5314 = vmatprep.subr.bf16.mxu1 %v6974_v44  ;;  %v7047_v29 = vld [vmem:[#allocation20 + $0xfe0] ss:$16 sps:$4 sm:$0xff]   ;;  %v7050_v44 = vld [vmem:[#allocation20 + $0xfe8] ss:$16 sps:$4 sm:$0xff]  }
 0xc26   :  { %5233 = vmatpush1.bf16.msra.mxu0 %v6969_v45  ;;  %5315 = vmatpush1.bf16.msra.mxu1 %v6972_v46  ;;  %v4389_v45 = vmax.f32 %v6164_v26, 0.0  ;;  %v4525_v46 = vld [vmem:[#allocation21 + $0xc] sm:$0xf] }
 0xc27   :  { %5234 = vmatprep.subr.bf16.mxu0 %v6977_v39  ;;  %5316 = vmatprep.subr.bf16.mxu1 %v6980_v47  ;;  %v4530_v39 = vrot.slane %v4525_v46, %v7809_v10  ;;  %v4538_v20 = vrot.slane %v4525_v46, %v7812_v11  ;;  %v5355_v47 = vld [vmem:[#allocation23] sm:$0xf] }
 0xc28   :  { %v4393_v15 = vpack.c.bf16 %v4389_v45, %v4389_v45 }
 0xc2a   :  { %5235 = vmatpush1.bf16.msra.mxu0 %v6975_v48  ;;  %5317 = vmatpush1.bf16.msra.mxu1 %v6978_v40  ;;  %v4534_v48 = vrot.slane %v4525_v46, %v7815_v13  ;;  %v4542_v40 = vrot.slane %v4525_v46, %v7818_v14 }
 0xc2b   :  { %5236 = vmatprep.subr.bf16.mxu0 %v6983_v49  ;;  %5318 = vmatprep.subr.bf16.mxu1 %v6986_v50 }
 0xc2e   :  { %5237 = vmatpush1.bf16.msra.mxu0 %v6981_v51  ;;  %5319 = vmatpush1.bf16.msra.mxu1 %v6984_v52  ;;  %v5360_v52 = vrot.slane %v5355_v47, %v7809_v10 }
 0xc2f   :  { %5238 = vmatprep.subr.bf16.mxu0 %v6989_v53  ;;  %5320 = vmatprep.subr.bf16.mxu1 %v6992_v54 }
 0xc32   :  { %5239 = vmatpush1.bf16.msra.mxu0 %v6987_v55  ;;  %5321 = vmatpush1.bf16.msra.mxu1 %v6990_v56 }
 0xc33   :  { %5240 = vmatprep.subr.bf16.mxu0 %v6995_v58  ;;  %5322 = vmatprep.subr.bf16.mxu1 %v6998_v59  ;;  %v5364_v58 = vrot.slane %v5355_v47, %v7815_v13 }
 0xc36   :  { %5241 = vmatpush1.bf16.msra.mxu0 %v6993_v60  ;;  %5323 = vmatpush1.bf16.msra.mxu1 %v6996_v61 }
 0xc37   :  { %5242 = vmatprep.subr.bf16.mxu0 %v7001_v62  ;;  %5324 = vmatprep.subr.bf16.mxu1 %v7004_v63 }
 0xc3a   :  { %5243 = vmatpush1.bf16.msra.mxu0 %v6999_v35  ;;  %5325 = vmatpush1.bf16.msra.mxu1 %v7002_v0 }
 0xc3b   :  { %5244 = vmatprep.subr.bf16.mxu0 %v7007_v2  ;;  %5326 = vmatprep.subr.bf16.mxu1 %v7010_v3  ;;  %v5368_v2 = vrot.slane %v5355_v47, %v7812_v11 }
 0xc3e   :  { %5245 = vmatpush1.bf16.msra.mxu0 %v7005_v4  ;;  %5327 = vmatpush1.bf16.msra.mxu1 %v7008_v36 }
 0xc3f   :  { %5246 = vmatprep.subr.bf16.mxu0 %v7013_v6  ;;  %5328 = vmatprep.subr.bf16.mxu1 %v7016_v7  ;;  %v5372_v7 = vrot.slane %v5355_v47, %v7818_v14 }
 0xc42   :  { %5247 = vmatpush1.bf16.msra.mxu0 %v7011_v12  ;;  %5329 = vmatpush1.bf16.msra.mxu1 %v7014_v16 }
 0xc43   :  { %5248 = vmatprep.subr.bf16.mxu0 %v7019_v17  ;;  %5330 = vmatprep.subr.bf16.mxu1 %v7022_v18 }
 0xc46   :  { %5249 = vmatpush1.bf16.msra.mxu0 %v7017_v19  ;;  %5331 = vmatpush1.bf16.msra.mxu1 %v7020_v21  ;;  %v5386_v19 = vld [vmem:[#allocation2] sm:$0x1] }
 0xc47   :  { %5250 = vmatprep.subr.bf16.mxu0 %v7025_v22  ;;  %5332 = vmatprep.subr.bf16.mxu1 %v7028_v5  ;;  %v5400_v22 = vand.u32 127, %v1473_v8 }
 0xc4a   :  { %5251 = vmatpush1.bf16.msra.mxu0 %v7023_v23  ;;  %5333 = vmatpush1.bf16.msra.mxu1 %v7026_v24  ;;  %v5403_v23 = vsub.s32 %v5400_v22, %v7806_v9 }
 0xc4b   :  { %5252 = vmatprep.subr.bf16.mxu0 %v7031_v1  ;;  %5334 = vmatprep.subr.bf16.mxu1 %v7034_v32 }
 0xc4e   :  { %5253 = vmatpush1.bf16.msra.mxu0 %v7029_v27  ;;  %5335 = vmatpush1.bf16.msra.mxu1 %v7032_v30 }
 0xc4f   :  { %5254 = vmatprep.subr.bf16.mxu0 %v7037_v31  ;;  %5336 = vmatprep.subr.bf16.mxu1 %v7040_v33 }
 0xc52   :  { %5255 = vmatpush1.bf16.msra.mxu0 %v7035_v57  ;;  %5337 = vmatpush1.bf16.msra.mxu1 %v7038_v34 }
 0xc53   :  { %5256 = vmatprep.subr.bf16.mxu0 %v7043_v38  ;;  %5338 = vmatprep.subr.bf16.mxu1 %v7046_v41 }
 0xc56   :  { %5257 = vmatpush1.bf16.msra.mxu0 %v7041_v25  ;;  %5339 = vmatpush1.bf16.msra.mxu1 %v7044_v42 }
 0xc57   :  { %5258 = vmatprep.subr.bf16.mxu0 %v7049_v43  ;;  %5340 = vmatprep.subr.bf16.mxu1 %v7052_v28 }
 0xc5a   :  { %5259 = vmatpush1.bf16.msra.mxu0 %v7047_v29  ;;  %5341 = vmatpush1.bf16.msra.mxu1 %v7050_v44 }
 0xc5d   :  { %5261 = vmatmul.mubr.bf16.vlgmr.msra.gmra.mrb[48].mxu0 %v4393_v15  ;;  %5343 = vmatmul.mubr.bf16.vlgmr.msra.gmra.mrb[52].mxu1 %v4393_v15 }
 0xd30   :  { %v5262_v49 = vpop.f32.mrb[48].mxu0  ;;  %v5344_v50 = vpop.f32.mrb[52].mxu1 }
 0xd31   :  { %v6166_v51 = vadd.f32 %v5262_v49, %v4530_v39  ;;  %v6168_v53 = vadd.f32 %v5344_v50, %v4538_v20  ;;  %v5264_v54 = vpop.f32.mrb[49].mxu0  ;;  %v5346_v55 = vpop.f32.mrb[53].mxu1 }
 0xd32   :  { %v6167_v56 = vadd.f32 %v5264_v54, %v4534_v48  ;;  %v6169_v59 = vadd.f32 %v5346_v55, %v4542_v40  ;;  %v5266_v60 = vpop.f32.mrb[50].mxu0  ;;  %v5348_v61 = vpop.f32.mrb[54].mxu1 }
 0xd33   :  { %v5351_v62 = vmax.f32 %v6166_v51, 0.0  ;;  %v5267_v63 = vpop.f32.mrb[51].mxu0  ;;  %v5349_v35 = vpop.f32.mrb[55].mxu1  ;;  %v5353_v0 = vmax.f32 %v6168_v53, 0.0 }
 0xd34   :  { %v5352_v3 = vmax.f32 %v6167_v56, 0.0  ;;  %v5354_v6 = vmax.f32 %v6169_v59, 0.0 }
 0xd35   :  { %v5377_v4 = vmul.f32 %v5360_v52, %v5351_v62  ;;  %v5379_v12 = vmul.f32 %v5368_v2, %v5353_v0 }
 0xd36   :  { %v5378_v36 = vmul.f32 %v5364_v58, %v5352_v3  ;;  %v5380_v17 = vmul.f32 %v5372_v7, %v5354_v6 }
 0xd38   :  { %v5381_v16 = vadd.f32 %v5378_v36, %v5377_v4 }
 0xd3a   :  { %v5382_v18 = vadd.f32 %v5381_v16, %v5379_v12 }
 0xd3c   :  { %v5383_v13 = vadd.f32 %v5382_v18, %v5380_v17 }
 0xd3e   :  { %5384 = vadd.xlane.f32.xlu0 %v5383_v13 }
 0xd54   :  { %5389 = vperm.xlu0 %6224, %v5386_v19  }
 0xdcb   :  { %v5385_v21 = vpop.xlane.xlu0 %5384 }
 0xdd3   :  { %v5390_v5 = vpop.permute.xlu0 %5389 }
 0xdd4   :  { %v5395_v11 = vrot.slane %v5390_v5, %v7809_v10 }
 0xdd6   :  { %v5396_v24 = vadd.f32 %v5395_v11, %v5385_v21 }
 0xdd8   :  { %v5397_v14 = vmax.f32 %v5396_v24, 0.0 }
 0xdda   :  { %v5404_v1 = vrot.slane %v5397_v14, %v5403_v23 }
 0xddc   :  { %5407 = vst.msk [vmem:[#allocation24] sm:$0x1] %vm5406_vm5, %v5404_v1 }
 0xddd   :  { %7350 = shalt.err (!%p7347_p10)
}
 0xdde   :  { %s7351_s21 = scalar_lea.hbm %s7909_s16, 16 }
 0xddf   :  { %p7352_p11 = scmp.ne.s32.totalorder %s7909_s16, %s7351_s21  ;;  %p7355_p12 = scmp.lt.u32.totalorder %s7351_s21, %s7909_s16 }
 0xde1   :  { %p7357_p13 = pnand %p7355_p12, %p7352_p11 }
 0xde3   :  { %7360 = shalt.err (!%p7357_p13)
}
 0xde4   :  { %5417 = dma.vmem_to_hbm [thread:$0]  %s5415_s10, 16, %s7909_s16, [#allocation5]  }
 0xde5   :  { %7375 = dma.done.wait [#allocation5], 16  }
 0xde6   :  { %7376 = vsyncadd [#allocation5], 4294967280 }
 0xde7   :  { %5421 = vsyncpa [#allocation4], 1 }
 0xde8   :  { %5422 = vsyncpa [#allocation7], 1 }
 0xde9   :  { %5423 = vsyncpa [#allocation10], 1 }
 0xdea   :  { %5424 = vsyncpa [#allocation13], 1 }
 0xdeb   :  { %5425 = vsyncpa [#allocation16], 1 }
 0xdec   :  { %5426 = vsyncpa [#allocation19], 1 }
 0xded   :  { %5427 = vsyncpa [#allocation22], 1 }
 0xdee   :  { %5428 = vsyncpa [#allocation5], 1 }

</bundles_post_ra>
